<compile_context>
chip_gen: v7x
topology: tpu7x:2x2x1
jax: 0.10.0
libtpu: 0.0.40
codegen_flags: <defaults>
</compile_context>

<pallas_src>
import functools

import jax
import jax.numpy as jnp
from jax.experimental import pallas as pl
from jax.experimental.pallas import tpu as pltpu

EPS = 1e-5
KPAD = 8                   # conv1 contraction dim padded 3 -> 8
DEFAULT_TILE_ROWS = 1024   # rows (points) per tile; multiple of 16 (bf16 sublane packing)


def _round_up(x, m):
    return (x + m - 1) // m * m


# ---------------------------------------------------------------------------
# In-kernel helpers.
# ---------------------------------------------------------------------------
def _valid_row_mask(r, tr, n_valid):
    """(1, tr) f32 mask selecting the real (non-padded) rows of this tile."""
    col = r * tr + jax.lax.broadcasted_iota(jnp.int32, (1, tr), 1)
    return (col < n_valid).astype(jnp.float32)


def _masked_moments(vmask, z):
    """Per-channel sum and sum-of-squares over valid rows, reduced on the MXU."""
    s = jnp.dot(vmask, z, preferred_element_type=jnp.float32)        # (1, C)
    sq = jnp.dot(vmask, z * z, preferred_element_type=jnp.float32)   # (1, C)
    return s, sq


def _conv1(x, w1_ref):
    return jnp.dot(x, w1_ref[...], preferred_element_type=jnp.float32)       # (tr, 64)


def _conv2(h1, w2_ref):
    return jnp.dot(h1.astype(jnp.bfloat16), w2_ref[...],
                   preferred_element_type=jnp.float32)                        # (tr, 128)


# ---------------------------------------------------------------------------
# Pass 1: conv1 (per-point linear 3->64), statistics only.
# Padded x rows are zero and there is no bias, so they contribute 0 anyway; the mask
# keeps it exact regardless.
# ---------------------------------------------------------------------------
def _conv1_stats_kernel(n_valid, x_ref, w1_ref, sum_ref, sq_ref):
    r = pl.program_id(1)
    tr = x_ref.shape[1]
    z1 = _conv1(x_ref[0], w1_ref)                                    # (tr, 64) f32
    s, sq = _masked_moments(_valid_row_mask(r, tr, n_valid), z1)

    @pl.when(r == 0)
    def _():
        sum_ref[0] = s
        sq_ref[0] = sq

    @pl.when(r > 0)
    def _():
        sum_ref[0] += s
        sq_ref[0] += sq


# ---------------------------------------------------------------------------
# Pass 2: recompute conv1 in VMEM, fold bn1+relu, conv2 (64->128), statistics only.
# ---------------------------------------------------------------------------
def _conv2_stats_kernel(n_valid, x_ref, w1_ref, s1_ref, t1_ref, w2_ref, sum_ref, sq_ref):
    r = pl.program_id(1)
    tr = x_ref.shape[1]
    z1 = _conv1(x_ref[0], w1_ref)
    h1 = jnp.maximum(z1 * s1_ref[...] + t1_ref[...], 0.0)
    z2 = _conv2(h1, w2_ref)                                          # (tr, 128) f32
    # Padded rows of x give garbage h1/z2 rows, but the mask-vector reduction excludes
    # them from the statistics exactly.
    s, sq = _masked_moments(_valid_row_mask(r, tr, n_valid), z2)

    @pl.when(r == 0)
    def _():
        sum_ref[0] = s
        sq_ref[0] = sq

    @pl.when(r > 0)
    def _():
        sum_ref[0] += s
        sq_ref[0] += sq


# ---------------------------------------------------------------------------
# Pass 3: recompute conv1/conv2, fold bn2+relu, conv3 (128->1024), statistics and fused
# max-pool (running per-batch max/min of the *raw* conv3 output; bn3+relu applied later).
# ---------------------------------------------------------------------------
def _conv3_pool_kernel(n_valid, x_ref, w1_ref, s1_ref, t1_ref, w2_ref, s2_ref, t2_ref,
                       w3_ref, sum_ref, sq_ref, mx_ref, mn_ref):
    r = pl.program_id(1)
    tr = x_ref.shape[1]
    z1 = _conv1(x_ref[0], w1_ref)
    h1 = jnp.maximum(z1 * s1_ref[...] + t1_ref[...], 0.0)
    z2 = _conv2(h1, w2_ref)
    h2 = jnp.maximum(z2 * s2_ref[...] + t2_ref[...], 0.0)
    # Replace padded rows with the tile's first (always valid) row: duplicates never
    # change max/min, and the mask-vector reduction keeps the sums exact, so no
    # (tr, 1024) +/-inf select is needed on any tile.
    rowid = r * tr + jax.lax.broadcasted_iota(jnp.int32, (tr, 1), 0)
    h2 = jnp.where(rowid < n_valid, h2, h2[0:1, :])
    z3 = jnp.dot(h2.astype(jnp.bfloat16), w3_ref[...],
                 preferred_element_type=jnp.float32)                          # (tr, 1024)
    s, sq = _masked_moments(_valid_row_mask(r, tr, n_valid), z3)
    tile_max = jnp.max(z3, axis=0, keepdims=True)                             # (1, 1024)
    tile_min = jnp.min(z3, axis=0, keepdims=True)

    @pl.when(r == 0)
    def _():
        sum_ref[0] = s
        sq_ref[0] = sq
        mx_ref[0] = tile_max
        mn_ref[0] = tile_min

    @pl.when(r > 0)
    def _():
        sum_ref[0] += s
        sq_ref[0] += sq
        mx_ref[0] = jnp.maximum(mx_ref[0], tile_max)
        mn_ref[0] = jnp.minimum(mn_ref[0], tile_min)


# ---------------------------------------------------------------------------
# Head: bn3+relu on the pooled extrema, fc1/bn4/relu, fc2/bn5/relu, fc3 + identity.
# B rows only -> single un-gridded program.
# ---------------------------------------------------------------------------
def _bn_rows(x):
    mean = jnp.mean(x, axis=0, keepdims=True)
    var = jnp.mean((x - mean) ** 2, axis=0, keepdims=True)
    return (x - mean) * jax.lax.rsqrt(var + EPS)


def _head_kernel(k, zmax_ref, zmin_ref, s3_ref, t3_ref,
                 wf1_ref, g4_ref, be4_ref,
                 wf2_ref, g5_ref, be5_ref,
                 wf3_ref, bf3_ref, out_ref):
    s3 = s3_ref[...]
    # max_n relu(s*z_n + t) == relu(max(s*zmax, s*zmin) + t)   (exact for any gamma sign)
    pooled = jnp.maximum(
        jnp.maximum(s3 * zmax_ref[...], s3 * zmin_ref[...]) + t3_ref[...], 0.0)  # (B,1024)
    h = jnp.dot(pooled.astype(jnp.bfloat16), wf1_ref[...],
                preferred_element_type=jnp.float32)
    h = jnp.maximum(_bn_rows(h) * g4_ref[...] + be4_ref[...], 0.0)
    h = jnp.dot(h.astype(jnp.bfloat16), wf2_ref[...],
                preferred_element_type=jnp.float32)
    h = jnp.maximum(_bn_rows(h) * g5_ref[...] + be5_ref[...], 0.0)
    h = jnp.dot(h, wf3_ref[...], preferred_element_type=jnp.float32) + bf3_ref[...]
    # identity built in-kernel: diagonal of a k x k matrix flattened (k==3 -> k+1 == 4).
    idx = jax.lax.broadcasted_iota(jnp.int32, (1, k * k), 1)
    iden = (idx % (k + 1) == 0).astype(jnp.float32)
    out_ref[...] = h + iden


# ---------------------------------------------------------------------------
# Parameters (fresh-module equivalent).  Biases feeding a train-mode BN are omitted
# (mathematically cancelled); fc3 weight/bias are zero as in the module.
# ---------------------------------------------------------------------------
def init_params(key, k=3):
    ks = jax.random.split(key, 5)
    scale = 0.05

    def rnd(kk, shape):
        return scale * jax.random.normal(kk, shape, dtype=jnp.float32)

    return dict(
        w1=rnd(ks[0], (k, 64)),          # conv weights stored as (in, out)
        w2=rnd(ks[1], (64, 128)),
        w3=rnd(ks[2], (128, 1024)),
        wf1=rnd(ks[3], (1024, 512)),
        wf2=rnd(ks[4], (512, 256)),
        wf3=jnp.zeros((256, k * k), jnp.float32),
        bf3=jnp.zeros((1, k * k), jnp.float32),
        g1=jnp.ones((1, 64), jnp.float32),   be1=jnp.zeros((1, 64), jnp.float32),
        g2=jnp.ones((1, 128), jnp.float32),  be2=jnp.zeros((1, 128), jnp.float32),
        g3=jnp.ones((1, 1024), jnp.float32), be3=jnp.zeros((1, 1024), jnp.float32),
        g4=jnp.ones((1, 512), jnp.float32),  be4=jnp.zeros((1, 512), jnp.float32),
        g5=jnp.ones((1, 256), jnp.float32),  be5=jnp.zeros((1, 256), jnp.float32),
    )


def _bn_scale_shift(sums, sqs, count, gamma, beta):
    # sums/sqs: (B, 1, C) per-batch partial sums; train-mode (biased) BN over B*N rows.
    mean = jnp.sum(sums, axis=0) / count                     # (1, C)
    var = jnp.maximum(jnp.sum(sqs, axis=0) / count - mean * mean, 0.0)
    scale = gamma * jax.lax.rsqrt(var + EPS)
    shift = beta - mean * scale
    return scale, shift


def stn3d_forward(x, params, k=3, tile_rows=DEFAULT_TILE_ROWS):
    B, C, N, K = x.shape
    assert C == 1 and K == k == 3, "this kernel implements the k==3 STN3d configuration"

    tr = _round_up(min(tile_rows, _round_up(N, 16)), 16)     # rows per tile
    npad = _round_up(N, tr)
    R = npad // tr
    cnt = float(B * N)

    p = params
    # Padded bf16 input (B, npad, KPAD); padded rows / columns are zero.
    x3 = x.reshape(B, N, k).astype(jnp.bfloat16)
    xp = jnp.zeros((B, npad, KPAD), jnp.bfloat16).at[:, :N, :k].set(x3)
    w1b = jnp.zeros((KPAD, 64), jnp.bfloat16).at[:k, :].set(p["w1"].astype(jnp.bfloat16))
    w2b = p["w2"].astype(jnp.bfloat16)
    w3b = p["w3"].astype(jnp.bfloat16)

    grid = (B, R)
    cparams = pltpu.CompilerParams(dimension_semantics=("parallel", "arbitrary"))

    x_spec = pl.BlockSpec((1, tr, KPAD), lambda b, r: (b, r, 0))
    w1_spec = pl.BlockSpec((KPAD, 64), lambda b, r: (0, 0))
    w2_spec = pl.BlockSpec((64, 128), lambda b, r: (0, 0))
    w3_spec = pl.BlockSpec((128, 1024), lambda b, r: (0, 0))
    row64_spec = pl.BlockSpec((1, 64), lambda b, r: (0, 0))
    row128_spec = pl.BlockSpec((1, 128), lambda b, r: (0, 0))

    def _stat(c):
        return (pl.BlockSpec((1, 1, c), lambda b, r: (b, 0, 0)),
                jax.ShapeDtypeStruct((B, 1, c), jnp.float32))

    st64_spec, st64_shape = _stat(64)
    st128_spec, st128_shape = _stat(128)
    st1024_spec, st1024_shape = _stat(1024)

    # ---- pass 1: conv1 statistics -------------------------------------------
    sum1, sq1 = pl.pallas_call(
        functools.partial(_conv1_stats_kernel, N),
        grid=grid,
        in_specs=[x_spec, w1_spec],
        out_specs=(st64_spec, st64_spec),
        out_shape=(st64_shape, st64_shape),
        compiler_params=cparams,
        cost_estimate=pl.CostEstimate(
            flops=2 * B * npad * KPAD * 64, transcendentals=0,
            bytes_accessed=B * npad * KPAD * 2 + KPAD * 64 * 2 + B * 2 * 64 * 4),
    )(xp, w1b)
    s1, t1 = _bn_scale_shift(sum1, sq1, cnt, p["g1"], p["be1"])

    # ---- pass 2: conv2 statistics (conv1 recomputed in VMEM) -----------------
    sum2, sq2 = pl.pallas_call(
        functools.partial(_conv2_stats_kernel, N),
        grid=grid,
        in_specs=[x_spec, w1_spec, row64_spec, row64_spec, w2_spec],
        out_specs=(st128_spec, st128_spec),
        out_shape=(st128_shape, st128_shape),
        compiler_params=cparams,
        cost_estimate=pl.CostEstimate(
            flops=2 * B * npad * (KPAD * 64 + 64 * 128), transcendentals=0,
            bytes_accessed=B * npad * KPAD * 2 + 64 * 128 * 2 + B * 2 * 128 * 4),
    )(xp, w1b, s1, t1, w2b)
    s2, t2 = _bn_scale_shift(sum2, sq2, cnt, p["g2"], p["be2"])

    # ---- pass 3: conv3 + statistics + fused max-pool --------------------------
    sum3, sq3, zmax, zmin = pl.pallas_call(
        functools.partial(_conv3_pool_kernel, N),
        grid=grid,
        in_specs=[x_spec, w1_spec, row64_spec, row64_spec, w2_spec,
                  row128_spec, row128_spec, w3_spec],
        out_specs=(st1024_spec, st1024_spec, st1024_spec, st1024_spec),
        out_shape=(st1024_shape, st1024_shape, st1024_shape, st1024_shape),
        compiler_params=cparams,
        cost_estimate=pl.CostEstimate(
            flops=2 * B * npad * (KPAD * 64 + 64 * 128 + 128 * 1024), transcendentals=0,
            bytes_accessed=B * npad * KPAD * 2 + 128 * 1024 * 2 + B * 4 * 1024 * 4),
    )(xp, w1b, s1, t1, w2b, s2, t2, w3b)
    s3, t3 = _bn_scale_shift(sum3, sq3, cnt, p["g3"], p["be3"])

    # ---- fc head (tiny: B rows) ------------------------------------------------
    vmem = pl.BlockSpec(memory_space=pltpu.MemorySpace.VMEM)
    head_args = (zmax[:, 0, :], zmin[:, 0, :], s3, t3,
                 p["wf1"].astype(jnp.bfloat16), p["g4"], p["be4"],
                 p["wf2"].astype(jnp.bfloat16), p["g5"], p["be5"],
                 p["wf3"], p["bf3"])
    out = pl.pallas_call(
        functools.partial(_head_kernel, k),
        out_shape=jax.ShapeDtypeStruct((B, k * k), jnp.float32),
        in_specs=[vmem] * len(head_args),
        out_specs=vmem,
    )(*head_args)
    return out.reshape(B, k, k)


if __name__ == "__main__":
    key = jax.random.PRNGKey(0)
    kx, kp = jax.random.split(key)
    k = 3
    params = init_params(kp, k=k)

    # Small single-tile case (num_points stand-in for the module's default 2500).
    B, N = 2, 64
    x = jax.random.normal(kx, (B, 1, N, k), dtype=jnp.float32)
    fwd = jax.jit(functools.partial(stn3d_forward, k=k))
    out = jax.block_until_ready(fwd(x, params))
    assert out.shape == (B, k, k)

    # Multi-tile case with row padding (exercises the accumulation path and the padded
    # last tile: N=200 points, 64-row tiles -> 4 tiles, 56 padded rows).
    B2, N2 = 2, 200
    x2 = jax.random.normal(kx, (B2, 1, N2, k), dtype=jnp.float32)
    fwd2 = jax.jit(functools.partial(stn3d_forward, k=k, tile_rows=64))
    out2 = jax.block_until_ready(fwd2(x2, params))
    assert out2.shape == (B2, k, k)

    print("KERNEL_OK")
</pallas_src>

<mosaic_0001>
module attributes {stable_mosaic.version = 11 : i64} {
  func.func @_conv1_stats_kernel(%arg0: i32, %arg1: i32, %arg2: memref<1x64x8xbf16, #tpu.memory_space<vmem>>, %arg3: memref<8x64xbf16, #tpu.memory_space<vmem>>, %arg4: memref<1x1x64xf32, #tpu.memory_space<vmem>>, %arg5: memref<1x1x64xf32, #tpu.memory_space<vmem>>) attributes {dimension_semantics = [#tpu.dimension_semantics<parallel>, #tpu.dimension_semantics<arbitrary>], iteration_bounds = array<i64: 2, 1>, scalar_prefetch = 0 : i64, scratch_operands = 0 : i64, tpu.core_type = #tpu.core_type<tc>, window_params = [{transform_indices = @transform_0, window_bounds = array<i64: 1, 64, 8>}, {pipeline_mode = #tpu.pipeline_mode<synchronous>, transform_indices = @transform_1, window_bounds = array<i64: 8, 64>}, {transform_indices = @transform_2, window_bounds = array<i64: 1, 1, 64>}, {transform_indices = @transform_3, window_bounds = array<i64: 1, 1, 64>}]} {
    %c0 = arith.constant 0 : index
    %c0_0 = arith.constant 0 : index
    %c0_1 = arith.constant 0 : index
    %0 = vector.load %arg2[%c0, %c0_0, %c0_1] : memref<1x64x8xbf16, #tpu.memory_space<vmem>>, vector<1x64x8xbf16>
    %1 = vector.shape_cast %0 : vector<1x64x8xbf16> to vector<64x8xbf16>
    %c0_2 = arith.constant 0 : index
    %c0_3 = arith.constant 0 : index
    %2 = vector.load %arg3[%c0_2, %c0_3] : memref<8x64xbf16, #tpu.memory_space<vmem>>, vector<8x64xbf16>
    %cst = arith.constant dense<0.000000e+00> : vector<64x64xf32>
    %3 = tpu.matmul %1, %2, %cst {dimension_numbers = #tpu.dot_dimension_numbers<[1], [0], [0], [1], [0, 0, 1, 1], [], []>} : vector<64x8xbf16>, vector<8x64xbf16>, vector<64x64xf32> -> vector<64x64xf32>
    %c64_i32 = arith.constant 64 : i32
    %4 = arith.muli %arg1, %c64_i32 : i32
    %5 = tpu.iota {dimensions = array<i32: 1>} : vector<1x64xi32>
    %6 = vector.broadcast %4 : i32 to vector<1x64xi32>
    %7 = arith.addi %6, %5 : vector<1x64xi32>
    %c64_i32_4 = arith.constant 64 : i32
    %8 = vector.broadcast %c64_i32_4 : i32 to vector<1x64xi32>
    %9 = arith.cmpi slt, %7, %8 : vector<1x64xi32>
    %10 = arith.extui %9 : vector<1x64xi1> to vector<1x64xi32>
    %11 = arith.sitofp %10 : vector<1x64xi32> to vector<1x64xf32>
    %cst_5 = arith.constant dense<0.000000e+00> : vector<1x64xf32>
    %12 = tpu.matmul %11, %3, %cst_5 {dimension_numbers = #tpu.dot_dimension_numbers<[1], [0], [0], [1], [0, 0, 1, 1], [], []>} : vector<1x64xf32>, vector<64x64xf32>, vector<1x64xf32> -> vector<1x64xf32>
    %13 = arith.mulf %3, %3 : vector<64x64xf32>
    %cst_6 = arith.constant dense<0.000000e+00> : vector<1x64xf32>
    %14 = tpu.matmul %11, %13, %cst_6 {dimension_numbers = #tpu.dot_dimension_numbers<[1], [0], [0], [1], [0, 0, 1, 1], [], []>} : vector<1x64xf32>, vector<64x64xf32>, vector<1x64xf32> -> vector<1x64xf32>
    %c0_i32 = arith.constant 0 : i32
    %15 = arith.cmpi eq, %arg1, %c0_i32 : i32
    %16 = arith.extui %15 : i1 to i32
    %c0_i32_7 = arith.constant 0 : i32
    %17 = arith.cmpi ne, %16, %c0_i32_7 : i32
    scf.if %17 {
      %c0_10 = arith.constant 0 : index
      %c0_11 = arith.constant 0 : index
      %c0_12 = arith.constant 0 : index
      %21 = vector.load %arg4[%c0_10, %c0_11, %c0_12] : memref<1x1x64xf32, #tpu.memory_space<vmem>>, vector<1x1x64xf32>
      %22 = vector.shape_cast %21 : vector<1x1x64xf32> to vector<1x64xf32>
      %23 = vector.shape_cast %12 : vector<1x64xf32> to vector<1x1x64xf32>
      tpu.vector_store %arg4[%c0_10, %c0_11, %c0_12], %23 {strides = array<i32>} : memref<1x1x64xf32, #tpu.memory_space<vmem>>, vector<1x1x64xf32>,
      %c0_13 = arith.constant 0 : index
      %c0_14 = arith.constant 0 : index
      %c0_15 = arith.constant 0 : index
      %24 = vector.load %arg5[%c0_13, %c0_14, %c0_15] : memref<1x1x64xf32, #tpu.memory_space<vmem>>, vector<1x1x64xf32>
      %25 = vector.shape_cast %24 : vector<1x1x64xf32> to vector<1x64xf32>
      %26 = vector.shape_cast %14 : vector<1x64xf32> to vector<1x1x64xf32>
      tpu.vector_store %arg5[%c0_13, %c0_14, %c0_15], %26 {strides = array<i32>} : memref<1x1x64xf32, #tpu.memory_space<vmem>>, vector<1x1x64xf32>,
    } else {
    }
    %c0_i32_8 = arith.constant 0 : i32
    %18 = arith.cmpi sgt, %arg1, %c0_i32_8 : i32
    %19 = arith.extui %18 : i1 to i32
    %c0_i32_9 = arith.constant 0 : i32
    %20 = arith.cmpi ne, %19, %c0_i32_9 : i32
    scf.if %20 {
      %c0_10 = arith.constant 0 : index
      %c0_11 = arith.constant 0 : index
      %c0_12 = arith.constant 0 : index
      %21 = vector.load %arg4[%c0_10, %c0_11, %c0_12] : memref<1x1x64xf32, #tpu.memory_space<vmem>>, vector<1x1x64xf32>
      %22 = vector.shape_cast %21 : vector<1x1x64xf32> to vector<1x64xf32>
      %23 = arith.addf %22, %12 : vector<1x64xf32>
      %c0_13 = arith.constant 0 : index
      %c0_14 = arith.constant 0 : index
      %c0_15 = arith.constant 0 : index
      %24 = vector.load %arg4[%c0_13, %c0_14, %c0_15] : memref<1x1x64xf32, #tpu.memory_space<vmem>>, vector<1x1x64xf32>
      %25 = vector.shape_cast %24 : vector<1x1x64xf32> to vector<1x64xf32>
      %26 = vector.shape_cast %23 : vector<1x64xf32> to vector<1x1x64xf32>
      tpu.vector_store %arg4[%c0_13, %c0_14, %c0_15], %26 {strides = array<i32>} : memref<1x1x64xf32, #tpu.memory_space<vmem>>, vector<1x1x64xf32>,
      %c0_16 = arith.constant 0 : index
      %c0_17 = arith.constant 0 : index
      %c0_18 = arith.constant 0 : index
      %27 = vector.load %arg5[%c0_16, %c0_17, %c0_18] : memref<1x1x64xf32, #tpu.memory_space<vmem>>, vector<1x1x64xf32>
      %28 = vector.shape_cast %27 : vector<1x1x64xf32> to vector<1x64xf32>
      %29 = arith.addf %28, %14 : vector<1x64xf32>
      %c0_19 = arith.constant 0 : index
      %c0_20 = arith.constant 0 : index
      %c0_21 = arith.constant 0 : index
      %30 = vector.load %arg5[%c0_19, %c0_20, %c0_21] : memref<1x1x64xf32, #tpu.memory_space<vmem>>, vector<1x1x64xf32>
      %31 = vector.shape_cast %30 : vector<1x1x64xf32> to vector<1x64xf32>
      %32 = vector.shape_cast %29 : vector<1x64xf32> to vector<1x1x64xf32>
      tpu.vector_store %arg5[%c0_19, %c0_20, %c0_21], %32 {strides = array<i32>} : memref<1x1x64xf32, #tpu.memory_space<vmem>>, vector<1x1x64xf32>,
    } else {
    }
    return
  }
  func.func @transform_0(%arg0: i32, %arg1: i32) -> (i32, i32, i32) {
    %c0_i32 = arith.constant 0 : i32
    %c0_i32_0 = arith.constant 0 : i32
    return %arg0, %arg1, %c0_i32 : i32, i32, i32
  }
  func.func @transform_1(%arg0: i32, %arg1: i32) -> (i32, i32) {
    %c0_i32 = arith.constant 0 : i32
    %c0_i32_0 = arith.constant 0 : i32
    %c0_i32_1 = arith.constant 0 : i32
    return %c0_i32, %c0_i32_0 : i32, i32
  }
  func.func @transform_2(%arg0: i32, %arg1: i32) -> (i32, i32, i32) {
    %c0_i32 = arith.constant 0 : i32
    %c0_i32_0 = arith.constant 0 : i32
    %c0_i32_1 = arith.constant 0 : i32
    return %arg0, %c0_i32, %c0_i32_0 : i32, i32, i32
  }
  func.func @transform_3(%arg0: i32, %arg1: i32) -> (i32, i32, i32) {
    %c0_i32 = arith.constant 0 : i32
    %c0_i32_0 = arith.constant 0 : i32
    %c0_i32_1 = arith.constant 0 : i32
    return %arg0, %c0_i32, %c0_i32_0 : i32, i32, i32
  }
}

module attributes {stable_mosaic.version = 11 : i64} {
  func.func @_conv2_stats_kernel(%arg0: i32, %arg1: i32, %arg2: memref<1x64x8xbf16, #tpu.memory_space<vmem>>, %arg3: memref<8x64xbf16, #tpu.memory_space<vmem>>, %arg4: memref<1x64xf32, #tpu.memory_space<vmem>>, %arg5: memref<1x64xf32, #tpu.memory_space<vmem>>, %arg6: memref<64x128xbf16, #tpu.memory_space<vmem>>, %arg7: memref<1x1x128xf32, #tpu.memory_space<vmem>>, %arg8: memref<1x1x128xf32, #tpu.memory_space<vmem>>) attributes {dimension_semantics = [#tpu.dimension_semantics<parallel>, #tpu.dimension_semantics<arbitrary>], iteration_bounds = array<i64: 2, 1>, scalar_prefetch = 0 : i64, scratch_operands = 0 : i64, tpu.core_type = #tpu.core_type<tc>, window_params = [{transform_indices = @transform_0, window_bounds = array<i64: 1, 64, 8>}, {pipeline_mode = #tpu.pipeline_mode<synchronous>, transform_indices = @transform_1, window_bounds = array<i64: 8, 64>}, {pipeline_mode = #tpu.pipeline_mode<synchronous>, transform_indices = @transform_2, window_bounds = array<i64: 1, 64>}, {pipeline_mode = #tpu.pipeline_mode<synchronous>, transform_indices = @transform_3, window_bounds = array<i64: 1, 64>}, {pipeline_mode = #tpu.pipeline_mode<synchronous>, transform_indices = @transform_4, window_bounds = array<i64: 64, 128>}, {transform_indices = @transform_5, window_bounds = array<i64: 1, 1, 128>}, {transform_indices = @transform_6, window_bounds = array<i64: 1, 1, 128>}]} {
    %c0 = arith.constant 0 : index
    %c0_0 = arith.constant 0 : index
    %c0_1 = arith.constant 0 : index
    %0 = vector.load %arg2[%c0, %c0_0, %c0_1] : memref<1x64x8xbf16, #tpu.memory_space<vmem>>, vector<1x64x8xbf16>
    %1 = vector.shape_cast %0 : vector<1x64x8xbf16> to vector<64x8xbf16>
    %c0_2 = arith.constant 0 : index
    %c0_3 = arith.constant 0 : index
    %2 = vector.load %arg3[%c0_2, %c0_3] : memref<8x64xbf16, #tpu.memory_space<vmem>>, vector<8x64xbf16>
    %cst = arith.constant dense<0.000000e+00> : vector<64x64xf32>
    %3 = tpu.matmul %1, %2, %cst {dimension_numbers = #tpu.dot_dimension_numbers<[1], [0], [0], [1], [0, 0, 1, 1], [], []>} : vector<64x8xbf16>, vector<8x64xbf16>, vector<64x64xf32> -> vector<64x64xf32>
    %c0_4 = arith.constant 0 : index
    %c0_5 = arith.constant 0 : index
    %4 = vector.load %arg4[%c0_4, %c0_5] : memref<1x64xf32, #tpu.memory_space<vmem>>, vector<1x64xf32>
    %5 = vector.broadcast %4 : vector<1x64xf32> to vector<64x64xf32>
    %6 = arith.mulf %3, %5 : vector<64x64xf32>
    %c0_6 = arith.constant 0 : index
    %c0_7 = arith.constant 0 : index
    %7 = vector.load %arg5[%c0_6, %c0_7] : memref<1x64xf32, #tpu.memory_space<vmem>>, vector<1x64xf32>
    %8 = vector.broadcast %7 : vector<1x64xf32> to vector<64x64xf32>
    %9 = arith.addf %6, %8 : vector<64x64xf32>
    %cst_8 = arith.constant 0.000000e+00 : f32
    %10 = vector.broadcast %cst_8 : f32 to vector<64x64xf32>
    %11 = arith.maximumf %9, %10 : vector<64x64xf32>
    %12 = arith.truncf %11 : vector<64x64xf32> to vector<64x64xbf16>
    %c0_9 = arith.constant 0 : index
    %c0_10 = arith.constant 0 : index
    %13 = vector.load %arg6[%c0_9, %c0_10] : memref<64x128xbf16, #tpu.memory_space<vmem>>, vector<64x128xbf16>
    %cst_11 = arith.constant dense<0.000000e+00> : vector<64x128xf32>
    %14 = tpu.matmul %12, %13, %cst_11 {dimension_numbers = #tpu.dot_dimension_numbers<[1], [0], [0], [1], [0, 0, 1, 1], [], []>} : vector<64x64xbf16>, vector<64x128xbf16>, vector<64x128xf32> -> vector<64x128xf32>
    %c64_i32 = arith.constant 64 : i32
    %15 = arith.muli %arg1, %c64_i32 : i32
    %16 = tpu.iota {dimensions = array<i32: 1>} : vector<1x64xi32>
    %17 = vector.broadcast %15 : i32 to vector<1x64xi32>
    %18 = arith.addi %17, %16 : vector<1x64xi32>
    %c64_i32_12 = arith.constant 64 : i32
    %19 = vector.broadcast %c64_i32_12 : i32 to vector<1x64xi32>
    %20 = arith.cmpi slt, %18, %19 : vector<1x64xi32>
    %21 = arith.extui %20 : vector<1x64xi1> to vector<1x64xi32>
    %22 = arith.sitofp %21 : vector<1x64xi32> to vector<1x64xf32>
    %cst_13 = arith.constant dense<0.000000e+00> : vector<1x128xf32>
    %23 = tpu.matmul %22, %14, %cst_13 {dimension_numbers = #tpu.dot_dimension_numbers<[1], [0], [0], [1], [0, 0, 1, 1], [], []>} : vector<1x64xf32>, vector<64x128xf32>, vector<1x128xf32> -> vector<1x128xf32>
    %24 = arith.mulf %14, %14 : vector<64x128xf32>
    %cst_14 = arith.constant dense<0.000000e+00> : vector<1x128xf32>
    %25 = tpu.matmul %22, %24, %cst_14 {dimension_numbers = #tpu.dot_dimension_numbers<[1], [0], [0], [1], [0, 0, 1, 1], [], []>} : vector<1x64xf32>, vector<64x128xf32>, vector<1x128xf32> -> vector<1x128xf32>
    %c0_i32 = arith.constant 0 : i32
    %26 = arith.cmpi eq, %arg1, %c0_i32 : i32
    %27 = arith.extui %26 : i1 to i32
    %c0_i32_15 = arith.constant 0 : i32
    %28 = arith.cmpi ne, %27, %c0_i32_15 : i32
    scf.if %28 {
      %c0_18 = arith.constant 0 : index
      %c0_19 = arith.constant 0 : index
      %c0_20 = arith.constant 0 : index
      %32 = vector.load %arg7[%c0_18, %c0_19, %c0_20] : memref<1x1x128xf32, #tpu.memory_space<vmem>>, vector<1x1x128xf32>
      %33 = vector.shape_cast %32 : vector<1x1x128xf32> to vector<1x128xf32>
      %34 = vector.shape_cast %23 : vector<1x128xf32> to vector<1x1x128xf32>
      tpu.vector_store %arg7[%c0_18, %c0_19, %c0_20], %34 {strides = array<i32>} : memref<1x1x128xf32, #tpu.memory_space<vmem>>, vector<1x1x128xf32>,
      %c0_21 = arith.constant 0 : index
      %c0_22 = arith.constant 0 : index
      %c0_23 = arith.constant 0 : index
      %35 = vector.load %arg8[%c0_21, %c0_22, %c0_23] : memref<1x1x128xf32, #tpu.memory_space<vmem>>, vector<1x1x128xf32>
      %36 = vector.shape_cast %35 : vector<1x1x128xf32> to vector<1x128xf32>
      %37 = vector.shape_cast %25 : vector<1x128xf32> to vector<1x1x128xf32>
      tpu.vector_store %arg8[%c0_21, %c0_22, %c0_23], %37 {strides = array<i32>} : memref<1x1x128xf32, #tpu.memory_space<vmem>>, vector<1x1x128xf32>,
    } else {
    }
    %c0_i32_16 = arith.constant 0 : i32
    %29 = arith.cmpi sgt, %arg1, %c0_i32_16 : i32
    %30 = arith.extui %29 : i1 to i32
    %c0_i32_17 = arith.constant 0 : i32
    %31 = arith.cmpi ne, %30, %c0_i32_17 : i32
    scf.if %31 {
      %c0_18 = arith.constant 0 : index
      %c0_19 = arith.constant 0 : index
      %c0_20 = arith.constant 0 : index
      %32 = vector.load %arg7[%c0_18, %c0_19, %c0_20] : memref<1x1x128xf32, #tpu.memory_space<vmem>>, vector<1x1x128xf32>
      %33 = vector.shape_cast %32 : vector<1x1x128xf32> to vector<1x128xf32>
      %34 = arith.addf %33, %23 : vector<1x128xf32>
      %c0_21 = arith.constant 0 : index
      %c0_22 = arith.constant 0 : index
      %c0_23 = arith.constant 0 : index
      %35 = vector.load %arg7[%c0_21, %c0_22, %c0_23] : memref<1x1x128xf32, #tpu.memory_space<vmem>>, vector<1x1x128xf32>
      %36 = vector.shape_cast %35 : vector<1x1x128xf32> to vector<1x128xf32>
      %37 = vector.shape_cast %34 : vector<1x128xf32> to vector<1x1x128xf32>
      tpu.vector_store %arg7[%c0_21, %c0_22, %c0_23], %37 {strides = array<i32>} : memref<1x1x128xf32, #tpu.memory_space<vmem>>, vector<1x1x128xf32>,
      %c0_24 = arith.constant 0 : index
      %c0_25 = arith.constant 0 : index
      %c0_26 = arith.constant 0 : index
      %38 = vector.load %arg8[%c0_24, %c0_25, %c0_26] : memref<1x1x128xf32, #tpu.memory_space<vmem>>, vector<1x1x128xf32>
      %39 = vector.shape_cast %38 : vector<1x1x128xf32> to vector<1x128xf32>
      %40 = arith.addf %39, %25 : vector<1x128xf32>
      %c0_27 = arith.constant 0 : index
      %c0_28 = arith.constant 0 : index
      %c0_29 = arith.constant 0 : index
      %41 = vector.load %arg8[%c0_27, %c0_28, %c0_29] : memref<1x1x128xf32, #tpu.memory_space<vmem>>, vector<1x1x128xf32>
      %42 = vector.shape_cast %41 : vector<1x1x128xf32> to vector<1x128xf32>
      %43 = vector.shape_cast %40 : vector<1x128xf32> to vector<1x1x128xf32>
      tpu.vector_store %arg8[%c0_27, %c0_28, %c0_29], %43 {strides = array<i32>} : memref<1x1x128xf32, #tpu.memory_space<vmem>>, vector<1x1x128xf32>,
    } else {
    }
    return
  }
  func.func @transform_0(%arg0: i32, %arg1: i32) -> (i32, i32, i32) {
    %c0_i32 = arith.constant 0 : i32
    %c0_i32_0 = arith.constant 0 : i32
    return %arg0, %arg1, %c0_i32 : i32, i32, i32
  }
  func.func @transform_1(%arg0: i32, %arg1: i32) -> (i32, i32) {
    %c0_i32 = arith.constant 0 : i32
    %c0_i32_0 = arith.constant 0 : i32
    %c0_i32_1 = arith.constant 0 : i32
    return %c0_i32, %c0_i32_0 : i32, i32
  }
  func.func @transform_2(%arg0: i32, %arg1: i32) -> (i32, i32) {
    %c0_i32 = arith.constant 0 : i32
    %c0_i32_0 = arith.constant 0 : i32
    %c0_i32_1 = arith.constant 0 : i32
    return %c0_i32, %c0_i32_0 : i32, i32
  }
  func.func @transform_3(%arg0: i32, %arg1: i32) -> (i32, i32) {
    %c0_i32 = arith.constant 0 : i32
    %c0_i32_0 = arith.constant 0 : i32
    %c0_i32_1 = arith.constant 0 : i32
    return %c0_i32, %c0_i32_0 : i32, i32
  }
  func.func @transform_4(%arg0: i32, %arg1: i32) -> (i32, i32) {
    %c0_i32 = arith.constant 0 : i32
    %c0_i32_0 = arith.constant 0 : i32
    %c0_i32_1 = arith.constant 0 : i32
    return %c0_i32, %c0_i32_0 : i32, i32
  }
  func.func @transform_5(%arg0: i32, %arg1: i32) -> (i32, i32, i32) {
    %c0_i32 = arith.constant 0 : i32
    %c0_i32_0 = arith.constant 0 : i32
    %c0_i32_1 = arith.constant 0 : i32
    return %arg0, %c0_i32, %c0_i32_0 : i32, i32, i32
  }
  func.func @transform_6(%arg0: i32, %arg1: i32) -> (i32, i32, i32) {
    %c0_i32 = arith.constant 0 : i32
    %c0_i32_0 = arith.constant 0 : i32
    %c0_i32_1 = arith.constant 0 : i32
    return %arg0, %c0_i32, %c0_i32_0 : i32, i32, i32
  }
}

module attributes {stable_mosaic.version = 11 : i64} {
  func.func @_conv3_pool_kernel(%arg0: i32, %arg1: i32, %arg2: memref<1x64x8xbf16, #tpu.memory_space<vmem>>, %arg3: memref<8x64xbf16, #tpu.memory_space<vmem>>, %arg4: memref<1x64xf32, #tpu.memory_space<vmem>>, %arg5: memref<1x64xf32, #tpu.memory_space<vmem>>, %arg6: memref<64x128xbf16, #tpu.memory_space<vmem>>, %arg7: memref<1x128xf32, #tpu.memory_space<vmem>>, %arg8: memref<1x128xf32, #tpu.memory_space<vmem>>, %arg9: memref<128x1024xbf16, #tpu.memory_space<vmem>>, %arg10: memref<1x1x1024xf32, #tpu.memory_space<vmem>>, %arg11: memref<1x1x1024xf32, #tpu.memory_space<vmem>>, %arg12: memref<1x1x1024xf32, #tpu.memory_space<vmem>>, %arg13: memref<1x1x1024xf32, #tpu.memory_space<vmem>>) attributes {dimension_semantics = [#tpu.dimension_semantics<parallel>, #tpu.dimension_semantics<arbitrary>], iteration_bounds = array<i64: 2, 1>, scalar_prefetch = 0 : i64, scratch_operands = 0 : i64, tpu.core_type = #tpu.core_type<tc>, window_params = [{transform_indices = @transform_0, window_bounds = array<i64: 1, 64, 8>}, {pipeline_mode = #tpu.pipeline_mode<synchronous>, transform_indices = @transform_1, window_bounds = array<i64: 8, 64>}, {pipeline_mode = #tpu.pipeline_mode<synchronous>, transform_indices = @transform_2, window_bounds = array<i64: 1, 64>}, {pipeline_mode = #tpu.pipeline_mode<synchronous>, transform_indices = @transform_3, window_bounds = array<i64: 1, 64>}, {pipeline_mode = #tpu.pipeline_mode<synchronous>, transform_indices = @transform_4, window_bounds = array<i64: 64, 128>}, {pipeline_mode = #tpu.pipeline_mode<synchronous>, transform_indices = @transform_5, window_bounds = array<i64: 1, 128>}, {pipeline_mode = #tpu.pipeline_mode<synchronous>, transform_indices = @transform_6, window_bounds = array<i64: 1, 128>}, {pipeline_mode = #tpu.pipeline_mode<synchronous>, transform_indices = @transform_7, window_bounds = array<i64: 128, 1024>}, {transform_indices = @transform_8, window_bounds = array<i64: 1, 1, 1024>}, {transform_indices = @transform_9, window_bounds = array<i64: 1, 1, 1024>}, {transform_indices = @transform_10, window_bounds = array<i64: 1, 1, 1024>}, {transform_indices = @transform_11, window_bounds = array<i64: 1, 1, 1024>}]} {
    %c0 = arith.constant 0 : index
    %c0_0 = arith.constant 0 : index
    %c0_1 = arith.constant 0 : index
    %0 = vector.load %arg2[%c0, %c0_0, %c0_1] : memref<1x64x8xbf16, #tpu.memory_space<vmem>>, vector<1x64x8xbf16>
    %1 = vector.shape_cast %0 : vector<1x64x8xbf16> to vector<64x8xbf16>
    %c0_2 = arith.constant 0 : index
    %c0_3 = arith.constant 0 : index
    %2 = vector.load %arg3[%c0_2, %c0_3] : memref<8x64xbf16, #tpu.memory_space<vmem>>, vector<8x64xbf16>
    %cst = arith.constant dense<0.000000e+00> : vector<64x64xf32>
    %3 = tpu.matmul %1, %2, %cst {dimension_numbers = #tpu.dot_dimension_numbers<[1], [0], [0], [1], [0, 0, 1, 1], [], []>} : vector<64x8xbf16>, vector<8x64xbf16>, vector<64x64xf32> -> vector<64x64xf32>
    %c0_4 = arith.constant 0 : index
    %c0_5 = arith.constant 0 : index
    %4 = vector.load %arg4[%c0_4, %c0_5] : memref<1x64xf32, #tpu.memory_space<vmem>>, vector<1x64xf32>
    %5 = vector.broadcast %4 : vector<1x64xf32> to vector<64x64xf32>
    %6 = arith.mulf %3, %5 : vector<64x64xf32>
    %c0_6 = arith.constant 0 : index
    %c0_7 = arith.constant 0 : index
    %7 = vector.load %arg5[%c0_6, %c0_7] : memref<1x64xf32, #tpu.memory_space<vmem>>, vector<1x64xf32>
    %8 = vector.broadcast %7 : vector<1x64xf32> to vector<64x64xf32>
    %9 = arith.addf %6, %8 : vector<64x64xf32>
    %cst_8 = arith.constant 0.000000e+00 : f32
    %10 = vector.broadcast %cst_8 : f32 to vector<64x64xf32>
    %11 = arith.maximumf %9, %10 : vector<64x64xf32>
    %12 = arith.truncf %11 : vector<64x64xf32> to vector<64x64xbf16>
    %c0_9 = arith.constant 0 : index
    %c0_10 = arith.constant 0 : index
    %13 = vector.load %arg6[%c0_9, %c0_10] : memref<64x128xbf16, #tpu.memory_space<vmem>>, vector<64x128xbf16>
    %cst_11 = arith.constant dense<0.000000e+00> : vector<64x128xf32>
    %14 = tpu.matmul %12, %13, %cst_11 {dimension_numbers = #tpu.dot_dimension_numbers<[1], [0], [0], [1], [0, 0, 1, 1], [], []>} : vector<64x64xbf16>, vector<64x128xbf16>, vector<64x128xf32> -> vector<64x128xf32>
    %c0_12 = arith.constant 0 : index
    %c0_13 = arith.constant 0 : index
    %15 = vector.load %arg7[%c0_12, %c0_13] : memref<1x128xf32, #tpu.memory_space<vmem>>, vector<1x128xf32>
    %16 = vector.broadcast %15 : vector<1x128xf32> to vector<64x128xf32>
    %17 = arith.mulf %14, %16 : vector<64x128xf32>
    %c0_14 = arith.constant 0 : index
    %c0_15 = arith.constant 0 : index
    %18 = vector.load %arg8[%c0_14, %c0_15] : memref<1x128xf32, #tpu.memory_space<vmem>>, vector<1x128xf32>
    %19 = vector.broadcast %18 : vector<1x128xf32> to vector<64x128xf32>
    %20 = arith.addf %17, %19 : vector<64x128xf32>
    %cst_16 = arith.constant 0.000000e+00 : f32
    %21 = vector.broadcast %cst_16 : f32 to vector<64x128xf32>
    %22 = arith.maximumf %20, %21 : vector<64x128xf32>
    %c64_i32 = arith.constant 64 : i32
    %23 = arith.muli %arg1, %c64_i32 : i32
    %24 = tpu.iota {dimensions = array<i32: 0>} : vector<64x1xi32>
    %25 = vector.broadcast %23 : i32 to vector<64x1xi32>
    %26 = arith.addi %25, %24 : vector<64x1xi32>
    %c64_i32_17 = arith.constant 64 : i32
    %27 = vector.broadcast %c64_i32_17 : i32 to vector<64x1xi32>
    %28 = arith.cmpi slt, %26, %27 : vector<64x1xi32>
    %29 = vector.extract_strided_slice %22 {offsets = [0, 0], sizes = [1, 128], strides = [1, 1]} : vector<64x128xf32> to vector<1x128xf32>
    %30 = vector.shape_cast %28 : vector<64x1xi1> to vector<64x1xi1>
    %31 = vector.broadcast %30 : vector<64x1xi1> to vector<64x128xi1>
    %32 = vector.shape_cast %29 : vector<1x128xf32> to vector<1x128xf32>
    %33 = vector.broadcast %32 : vector<1x128xf32> to vector<64x128xf32>
    %34 = arith.select %31, %22, %33 : vector<64x128xi1>, vector<64x128xf32>
    %35 = arith.truncf %34 : vector<64x128xf32> to vector<64x128xbf16>
    %c0_18 = arith.constant 0 : index
    %c0_19 = arith.constant 0 : index
    %36 = vector.load %arg9[%c0_18, %c0_19] : memref<128x1024xbf16, #tpu.memory_space<vmem>>, vector<128x1024xbf16>
    %cst_20 = arith.constant dense<0.000000e+00> : vector<64x1024xf32>
    %37 = tpu.matmul %35, %36, %cst_20 {dimension_numbers = #tpu.dot_dimension_numbers<[1], [0], [0], [1], [0, 0, 1, 1], [], []>} : vector<64x128xbf16>, vector<128x1024xbf16>, vector<64x1024xf32> -> vector<64x1024xf32>
    %c64_i32_21 = arith.constant 64 : i32
    %38 = arith.muli %arg1, %c64_i32_21 : i32
    %39 = tpu.iota {dimensions = array<i32: 1>} : vector<1x64xi32>
    %40 = vector.broadcast %38 : i32 to vector<1x64xi32>
    %41 = arith.addi %40, %39 : vector<1x64xi32>
    %c64_i32_22 = arith.constant 64 : i32
    %42 = vector.broadcast %c64_i32_22 : i32 to vector<1x64xi32>
    %43 = arith.cmpi slt, %41, %42 : vector<1x64xi32>
    %44 = arith.extui %43 : vector<1x64xi1> to vector<1x64xi32>
    %45 = arith.sitofp %44 : vector<1x64xi32> to vector<1x64xf32>
    %cst_23 = arith.constant dense<0.000000e+00> : vector<1x1024xf32>
    %46 = tpu.matmul %45, %37, %cst_23 {dimension_numbers = #tpu.dot_dimension_numbers<[1], [0], [0], [1], [0, 0, 1, 1], [], []>} : vector<1x64xf32>, vector<64x1024xf32>, vector<1x1024xf32> -> vector<1x1024xf32>
    %47 = arith.mulf %37, %37 : vector<64x1024xf32>
    %cst_24 = arith.constant dense<0.000000e+00> : vector<1x1024xf32>
    %48 = tpu.matmul %45, %47, %cst_24 {dimension_numbers = #tpu.dot_dimension_numbers<[1], [0], [0], [1], [0, 0, 1, 1], [], []>} : vector<1x64xf32>, vector<64x1024xf32>, vector<1x1024xf32> -> vector<1x1024xf32>
    %cst_25 = arith.constant dense<0xFF800000> : vector<1024xf32>
    %49 = vector.multi_reduction <maximumf>, %37, %cst_25 [0] : vector<64x1024xf32> to vector<1024xf32>
    %50 = vector.shape_cast %49 : vector<1024xf32> to vector<1x1024xf32>
    %cst_26 = arith.constant dense<0x7F800000> : vector<1024xf32>
    %51 = vector.multi_reduction <minimumf>, %37, %cst_26 [0] : vector<64x1024xf32> to vector<1024xf32>
    %52 = vector.shape_cast %51 : vector<1024xf32> to vector<1x1024xf32>
    %c0_i32 = arith.constant 0 : i32
    %53 = arith.cmpi eq, %arg1, %c0_i32 : i32
    %54 = arith.extui %53 : i1 to i32
    %c0_i32_27 = arith.constant 0 : i32
    %55 = arith.cmpi ne, %54, %c0_i32_27 : i32
    scf.if %55 {
      %c0_30 = arith.constant 0 : index
      %c0_31 = arith.constant 0 : index
      %c0_32 = arith.constant 0 : index
      %59 = vector.load %arg10[%c0_30, %c0_31, %c0_32] : memref<1x1x1024xf32, #tpu.memory_space<vmem>>, vector<1x1x1024xf32>
      %60 = vector.shape_cast %59 : vector<1x1x1024xf32> to vector<1x1024xf32>
      %61 = vector.shape_cast %46 : vector<1x1024xf32> to vector<1x1x1024xf32>
      tpu.vector_store %arg10[%c0_30, %c0_31, %c0_32], %61 {strides = array<i32>} : memref<1x1x1024xf32, #tpu.memory_space<vmem>>, vector<1x1x1024xf32>,
      %c0_33 = arith.constant 0 : index
      %c0_34 = arith.constant 0 : index
      %c0_35 = arith.constant 0 : index
      %62 = vector.load %arg11[%c0_33, %c0_34, %c0_35] : memref<1x1x1024xf32, #tpu.memory_space<vmem>>, vector<1x1x1024xf32>
      %63 = vector.shape_cast %62 : vector<1x1x1024xf32> to vector<1x1024xf32>
      %64 = vector.shape_cast %48 : vector<1x1024xf32> to vector<1x1x1024xf32>
      tpu.vector_store %arg11[%c0_33, %c0_34, %c0_35], %64 {strides = array<i32>} : memref<1x1x1024xf32, #tpu.memory_space<vmem>>, vector<1x1x1024xf32>,
      %c0_36 = arith.constant 0 : index
      %c0_37 = arith.constant 0 : index
      %c0_38 = arith.constant 0 : index
      %65 = vector.load %arg12[%c0_36, %c0_37, %c0_38] : memref<1x1x1024xf32, #tpu.memory_space<vmem>>, vector<1x1x1024xf32>
      %66 = vector.shape_cast %65 : vector<1x1x1024xf32> to vector<1x1024xf32>
      %67 = vector.shape_cast %50 : vector<1x1024xf32> to vector<1x1x1024xf32>
      tpu.vector_store %arg12[%c0_36, %c0_37, %c0_38], %67 {strides = array<i32>} : memref<1x1x1024xf32, #tpu.memory_space<vmem>>, vector<1x1x1024xf32>,
      %c0_39 = arith.constant 0 : index
      %c0_40 = arith.constant 0 : index
      %c0_41 = arith.constant 0 : index
      %68 = vector.load %arg13[%c0_39, %c0_40, %c0_41] : memref<1x1x1024xf32, #tpu.memory_space<vmem>>, vector<1x1x1024xf32>
      %69 = vector.shape_cast %68 : vector<1x1x1024xf32> to vector<1x1024xf32>
      %70 = vector.shape_cast %52 : vector<1x1024xf32> to vector<1x1x1024xf32>
      tpu.vector_store %arg13[%c0_39, %c0_40, %c0_41], %70 {strides = array<i32>} : memref<1x1x1024xf32, #tpu.memory_space<vmem>>, vector<1x1x1024xf32>,
    } else {
    }
    %c0_i32_28 = arith.constant 0 : i32
    %56 = arith.cmpi sgt, %arg1, %c0_i32_28 : i32
    %57 = arith.extui %56 : i1 to i32
    %c0_i32_29 = arith.constant 0 : i32
    %58 = arith.cmpi ne, %57, %c0_i32_29 : i32
    scf.if %58 {
      %c0_30 = arith.constant 0 : index
      %c0_31 = arith.constant 0 : index
      %c0_32 = arith.constant 0 : index
      %59 = vector.load %arg10[%c0_30, %c0_31, %c0_32] : memref<1x1x1024xf32, #tpu.memory_space<vmem>>, vector<1x1x1024xf32>
      %60 = vector.shape_cast %59 : vector<1x1x1024xf32> to vector<1x1024xf32>
      %61 = arith.addf %60, %46 : vector<1x1024xf32>
      %c0_33 = arith.constant 0 : index
      %c0_34 = arith.constant 0 : index
      %c0_35 = arith.constant 0 : index
      %62 = vector.load %arg10[%c0_33, %c0_34, %c0_35] : memref<1x1x1024xf32, #tpu.memory_space<vmem>>, vector<1x1x1024xf32>
      %63 = vector.shape_cast %62 : vector<1x1x1024xf32> to vector<1x1024xf32>
      %64 = vector.shape_cast %61 : vector<1x1024xf32> to vector<1x1x1024xf32>
      tpu.vector_store %arg10[%c0_33, %c0_34, %c0_35], %64 {strides = array<i32>} : memref<1x1x1024xf32, #tpu.memory_space<vmem>>, vector<1x1x1024xf32>,
      %c0_36 = arith.constant 0 : index
      %c0_37 = arith.constant 0 : index
      %c0_38 = arith.constant 0 : index
      %65 = vector.load %arg11[%c0_36, %c0_37, %c0_38] : memref<1x1x1024xf32, #tpu.memory_space<vmem>>, vector<1x1x1024xf32>
      %66 = vector.shape_cast %65 : vector<1x1x1024xf32> to vector<1x1024xf32>
      %67 = arith.addf %66, %48 : vector<1x1024xf32>
      %c0_39 = arith.constant 0 : index
      %c0_40 = arith.constant 0 : index
      %c0_41 = arith.constant 0 : index
      %68 = vector.load %arg11[%c0_39, %c0_40, %c0_41] : memref<1x1x1024xf32, #tpu.memory_space<vmem>>, vector<1x1x1024xf32>
      %69 = vector.shape_cast %68 : vector<1x1x1024xf32> to vector<1x1024xf32>
      %70 = vector.shape_cast %67 : vector<1x1024xf32> to vector<1x1x1024xf32>
      tpu.vector_store %arg11[%c0_39, %c0_40, %c0_41], %70 {strides = array<i32>} : memref<1x1x1024xf32, #tpu.memory_space<vmem>>, vector<1x1x1024xf32>,
      %c0_42 = arith.constant 0 : index
      %c0_43 = arith.constant 0 : index
      %c0_44 = arith.constant 0 : index
      %71 = vector.load %arg12[%c0_42, %c0_43, %c0_44] : memref<1x1x1024xf32, #tpu.memory_space<vmem>>, vector<1x1x1024xf32>
      %72 = vector.shape_cast %71 : vector<1x1x1024xf32> to vector<1x1024xf32>
      %73 = arith.maximumf %72, %50 : vector<1x1024xf32>
      %c0_45 = arith.constant 0 : index
      %c0_46 = arith.constant 0 : index
      %c0_47 = arith.constant 0 : index
      %74 = vector.load %arg12[%c0_45, %c0_46, %c0_47] : memref<1x1x1024xf32, #tpu.memory_space<vmem>>, vector<1x1x1024xf32>
      %75 = vector.shape_cast %74 : vector<1x1x1024xf32> to vector<1x1024xf32>
      %76 = vector.shape_cast %73 : vector<1x1024xf32> to vector<1x1x1024xf32>
      tpu.vector_store %arg12[%c0_45, %c0_46, %c0_47], %76 {strides = array<i32>} : memref<1x1x1024xf32, #tpu.memory_space<vmem>>, vector<1x1x1024xf32>,
      %c0_48 = arith.constant 0 : index
      %c0_49 = arith.constant 0 : index
      %c0_50 = arith.constant 0 : index
      %77 = vector.load %arg13[%c0_48, %c0_49, %c0_50] : memref<1x1x1024xf32, #tpu.memory_space<vmem>>, vector<1x1x1024xf32>
      %78 = vector.shape_cast %77 : vector<1x1x1024xf32> to vector<1x1024xf32>
      %79 = arith.minimumf %78, %52 : vector<1x1024xf32>
      %c0_51 = arith.constant 0 : index
      %c0_52 = arith.constant 0 : index
      %c0_53 = arith.constant 0 : index
      %80 = vector.load %arg13[%c0_51, %c0_52, %c0_53] : memref<1x1x1024xf32, #tpu.memory_space<vmem>>, vector<1x1x1024xf32>
      %81 = vector.shape_cast %80 : vector<1x1x1024xf32> to vector<1x1024xf32>
      %82 = vector.shape_cast %79 : vector<1x1024xf32> to vector<1x1x1024xf32>
      tpu.vector_store %arg13[%c0_51, %c0_52, %c0_53], %82 {strides = array<i32>} : memref<1x1x1024xf32, #tpu.memory_space<vmem>>, vector<1x1x1024xf32>,
    } else {
    }
    return
  }
  func.func @transform_0(%arg0: i32, %arg1: i32) -> (i32, i32, i32) {
    %c0_i32 = arith.constant 0 : i32
    %c0_i32_0 = arith.constant 0 : i32
    return %arg0, %arg1, %c0_i32 : i32, i32, i32
  }
  func.func @transform_1(%arg0: i32, %arg1: i32) -> (i32, i32) {
    %c0_i32 = arith.constant 0 : i32
    %c0_i32_0 = arith.constant 0 : i32
    %c0_i32_1 = arith.constant 0 : i32
    return %c0_i32, %c0_i32_0 : i32, i32
  }
  func.func @transform_2(%arg0: i32, %arg1: i32) -> (i32, i32) {
    %c0_i32 = arith.constant 0 : i32
    %c0_i32_0 = arith.constant 0 : i32
    %c0_i32_1 = arith.constant 0 : i32
    return %c0_i32, %c0_i32_0 : i32, i32
  }
  func.func @transform_3(%arg0: i32, %arg1: i32) -> (i32, i32) {
    %c0_i32 = arith.constant 0 : i32
    %c0_i32_0 = arith.constant 0 : i32
    %c0_i32_1 = arith.constant 0 : i32
    return %c0_i32, %c0_i32_0 : i32, i32
  }
  func.func @transform_4(%arg0: i32, %arg1: i32) -> (i32, i32) {
    %c0_i32 = arith.constant 0 : i32
    %c0_i32_0 = arith.constant 0 : i32
    %c0_i32_1 = arith.constant 0 : i32
    return %c0_i32, %c0_i32_0 : i32, i32
  }
  func.func @transform_5(%arg0: i32, %arg1: i32) -> (i32, i32) {
    %c0_i32 = arith.constant 0 : i32
    %c0_i32_0 = arith.constant 0 : i32
    %c0_i32_1 = arith.constant 0 : i32
    return %c0_i32, %c0_i32_0 : i32, i32
  }
  func.func @transform_6(%arg0: i32, %arg1: i32) -> (i32, i32) {
    %c0_i32 = arith.constant 0 : i32
    %c0_i32_0 = arith.constant 0 : i32
    %c0_i32_1 = arith.constant 0 : i32
    return %c0_i32, %c0_i32_0 : i32, i32
  }
  func.func @transform_7(%arg0: i32, %arg1: i32) -> (i32, i32) {
    %c0_i32 = arith.constant 0 : i32
    %c0_i32_0 = arith.constant 0 : i32
    %c0_i32_1 = arith.constant 0 : i32
    return %c0_i32, %c0_i32_0 : i32, i32
  }
  func.func @transform_8(%arg0: i32, %arg1: i32) -> (i32, i32, i32) {
    %c0_i32 = arith.constant 0 : i32
    %c0_i32_0 = arith.constant 0 : i32
    %c0_i32_1 = arith.constant 0 : i32
    return %arg0, %c0_i32, %c0_i32_0 : i32, i32, i32
  }
  func.func @transform_9(%arg0: i32, %arg1: i32) -> (i32, i32, i32) {
    %c0_i32 = arith.constant 0 : i32
    %c0_i32_0 = arith.constant 0 : i32
    %c0_i32_1 = arith.constant 0 : i32
    return %arg0, %c0_i32, %c0_i32_0 : i32, i32, i32
  }
  func.func @transform_10(%arg0: i32, %arg1: i32) -> (i32, i32, i32) {
    %c0_i32 = arith.constant 0 : i32
    %c0_i32_0 = arith.constant 0 : i32
    %c0_i32_1 = arith.constant 0 : i32
    return %arg0, %c0_i32, %c0_i32_0 : i32, i32, i32
  }
  func.func @transform_11(%arg0: i32, %arg1: i32) -> (i32, i32, i32) {
    %c0_i32 = arith.constant 0 : i32
    %c0_i32_0 = arith.constant 0 : i32
    %c0_i32_1 = arith.constant 0 : i32
    return %arg0, %c0_i32, %c0_i32_0 : i32, i32, i32
  }
}

module attributes {stable_mosaic.version = 11 : i64} {
  func.func @_head_kernel(%arg0: memref<2x1024xf32, #tpu.memory_space<vmem>>, %arg1: memref<2x1024xf32, #tpu.memory_space<vmem>>, %arg2: memref<1x1024xf32, #tpu.memory_space<vmem>>, %arg3: memref<1x1024xf32, #tpu.memory_space<vmem>>, %arg4: memref<1024x512xbf16, #tpu.memory_space<vmem>>, %arg5: memref<1x512xf32, #tpu.memory_space<vmem>>, %arg6: memref<1x512xf32, #tpu.memory_space<vmem>>, %arg7: memref<512x256xbf16, #tpu.memory_space<vmem>>, %arg8: memref<1x256xf32, #tpu.memory_space<vmem>>, %arg9: memref<1x256xf32, #tpu.memory_space<vmem>>, %arg10: memref<256x9xf32, #tpu.memory_space<vmem>>, %arg11: memref<1x9xf32, #tpu.memory_space<vmem>>, %arg12: memref<2x9xf32, #tpu.memory_space<vmem>>) attributes {dimension_semantics = [], scalar_prefetch = 0 : i64, scratch_operands = 0 : i64, tpu.core_type = #tpu.core_type<tc>} {
    %c0 = arith.constant 0 : index
    %c0_0 = arith.constant 0 : index
    %0 = vector.load %arg2[%c0, %c0_0] : memref<1x1024xf32, #tpu.memory_space<vmem>>, vector<1x1024xf32>
    %c0_1 = arith.constant 0 : index
    %c0_2 = arith.constant 0 : index
    %1 = vector.load %arg0[%c0_1, %c0_2] : memref<2x1024xf32, #tpu.memory_space<vmem>>, vector<2x1024xf32>
    %2 = vector.broadcast %0 : vector<1x1024xf32> to vector<2x1024xf32>
    %3 = arith.mulf %2, %1 : vector<2x1024xf32>
    %c0_3 = arith.constant 0 : index
    %c0_4 = arith.constant 0 : index
    %4 = vector.load %arg1[%c0_3, %c0_4] : memref<2x1024xf32, #tpu.memory_space<vmem>>, vector<2x1024xf32>
    %5 = vector.broadcast %0 : vector<1x1024xf32> to vector<2x1024xf32>
    %6 = arith.mulf %5, %4 : vector<2x1024xf32>
    %7 = arith.maximumf %3, %6 : vector<2x1024xf32>
    %c0_5 = arith.constant 0 : index
    %c0_6 = arith.constant 0 : index
    %8 = vector.load %arg3[%c0_5, %c0_6] : memref<1x1024xf32, #tpu.memory_space<vmem>>, vector<1x1024xf32>
    %9 = vector.broadcast %8 : vector<1x1024xf32> to vector<2x1024xf32>
    %10 = arith.addf %7, %9 : vector<2x1024xf32>
    %cst = arith.constant 0.000000e+00 : f32
    %11 = vector.broadcast %cst : f32 to vector<2x1024xf32>
    %12 = arith.maximumf %10, %11 : vector<2x1024xf32>
    %13 = arith.truncf %12 : vector<2x1024xf32> to vector<2x1024xbf16>
    %c0_7 = arith.constant 0 : index
    %c0_8 = arith.constant 0 : index
    %14 = vector.load %arg4[%c0_7, %c0_8] : memref<1024x512xbf16, #tpu.memory_space<vmem>>, vector<1024x512xbf16>
    %cst_9 = arith.constant dense<0.000000e+00> : vector<2x512xf32>
    %15 = tpu.matmul %13, %14, %cst_9 {dimension_numbers = #tpu.dot_dimension_numbers<[1], [0], [0], [1], [0, 0, 1, 1], [], []>} : vector<2x1024xbf16>, vector<1024x512xbf16>, vector<2x512xf32> -> vector<2x512xf32>
    %cst_10 = arith.constant dense<0.000000e+00> : vector<512xf32>
    %16 = vector.multi_reduction <add>, %15, %cst_10 [0] : vector<2x512xf32> to vector<512xf32>
    %17 = vector.shape_cast %16 : vector<512xf32> to vector<1x512xf32>
    %cst_11 = arith.constant 2.000000e+00 : f32
    %18 = vector.broadcast %cst_11 : f32 to vector<1x512xf32>
    %19 = arith.divf %17, %18 : vector<1x512xf32>
    %20 = vector.broadcast %19 : vector<1x512xf32> to vector<2x512xf32>
    %21 = arith.subf %15, %20 : vector<2x512xf32>
    %22 = arith.mulf %21, %21 : vector<2x512xf32>
    %cst_12 = arith.constant dense<0.000000e+00> : vector<512xf32>
    %23 = vector.multi_reduction <add>, %22, %cst_12 [0] : vector<2x512xf32> to vector<512xf32>
    %24 = vector.shape_cast %23 : vector<512xf32> to vector<1x512xf32>
    %cst_13 = arith.constant 2.000000e+00 : f32
    %25 = vector.broadcast %cst_13 : f32 to vector<1x512xf32>
    %26 = arith.divf %24, %25 : vector<1x512xf32>
    %27 = vector.broadcast %19 : vector<1x512xf32> to vector<2x512xf32>
    %28 = arith.subf %15, %27 : vector<2x512xf32>
    %cst_14 = arith.constant 9.99999974E-6 : f32
    %29 = vector.broadcast %cst_14 : f32 to vector<1x512xf32>
    %30 = arith.addf %26, %29 : vector<1x512xf32>
    %31 = math.rsqrt %30 : vector<1x512xf32>
    %32 = vector.broadcast %31 : vector<1x512xf32> to vector<2x512xf32>
    %33 = arith.mulf %28, %32 : vector<2x512xf32>
    %c0_15 = arith.constant 0 : index
    %c0_16 = arith.constant 0 : index
    %34 = vector.load %arg5[%c0_15, %c0_16] : memref<1x512xf32, #tpu.memory_space<vmem>>, vector<1x512xf32>
    %35 = vector.broadcast %34 : vector<1x512xf32> to vector<2x512xf32>
    %36 = arith.mulf %33, %35 : vector<2x512xf32>
    %c0_17 = arith.constant 0 : index
    %c0_18 = arith.constant 0 : index
    %37 = vector.load %arg6[%c0_17, %c0_18] : memref<1x512xf32, #tpu.memory_space<vmem>>, vector<1x512xf32>
    %38 = vector.broadcast %37 : vector<1x512xf32> to vector<2x512xf32>
    %39 = arith.addf %36, %38 : vector<2x512xf32>
    %cst_19 = arith.constant 0.000000e+00 : f32
    %40 = vector.broadcast %cst_19 : f32 to vector<2x512xf32>
    %41 = arith.maximumf %39, %40 : vector<2x512xf32>
    %42 = arith.truncf %41 : vector<2x512xf32> to vector<2x512xbf16>
    %c0_20 = arith.constant 0 : index
    %c0_21 = arith.constant 0 : index
    %43 = vector.load %arg7[%c0_20, %c0_21] : memref<512x256xbf16, #tpu.memory_space<vmem>>, vector<512x256xbf16>
    %cst_22 = arith.constant dense<0.000000e+00> : vector<2x256xf32>
    %44 = tpu.matmul %42, %43, %cst_22 {dimension_numbers = #tpu.dot_dimension_numbers<[1], [0], [0], [1], [0, 0, 1, 1], [], []>} : vector<2x512xbf16>, vector<512x256xbf16>, vector<2x256xf32> -> vector<2x256xf32>
    %cst_23 = arith.constant dense<0.000000e+00> : vector<256xf32>
    %45 = vector.multi_reduction <add>, %44, %cst_23 [0] : vector<2x256xf32> to vector<256xf32>
    %46 = vector.shape_cast %45 : vector<256xf32> to vector<1x256xf32>
    %cst_24 = arith.constant 2.000000e+00 : f32
    %47 = vector.broadcast %cst_24 : f32 to vector<1x256xf32>
    %48 = arith.divf %46, %47 : vector<1x256xf32>
    %49 = vector.broadcast %48 : vector<1x256xf32> to vector<2x256xf32>
    %50 = arith.subf %44, %49 : vector<2x256xf32>
    %51 = arith.mulf %50, %50 : vector<2x256xf32>
    %cst_25 = arith.constant dense<0.000000e+00> : vector<256xf32>
    %52 = vector.multi_reduction <add>, %51, %cst_25 [0] : vector<2x256xf32> to vector<256xf32>
    %53 = vector.shape_cast %52 : vector<256xf32> to vector<1x256xf32>
    %cst_26 = arith.constant 2.000000e+00 : f32
    %54 = vector.broadcast %cst_26 : f32 to vector<1x256xf32>
    %55 = arith.divf %53, %54 : vector<1x256xf32>
    %56 = vector.broadcast %48 : vector<1x256xf32> to vector<2x256xf32>
    %57 = arith.subf %44, %56 : vector<2x256xf32>
    %cst_27 = arith.constant 9.99999974E-6 : f32
    %58 = vector.broadcast %cst_27 : f32 to vector<1x256xf32>
    %59 = arith.addf %55, %58 : vector<1x256xf32>
    %60 = math.rsqrt %59 : vector<1x256xf32>
    %61 = vector.broadcast %60 : vector<1x256xf32> to vector<2x256xf32>
    %62 = arith.mulf %57, %61 : vector<2x256xf32>
    %c0_28 = arith.constant 0 : index
    %c0_29 = arith.constant 0 : index
    %63 = vector.load %arg8[%c0_28, %c0_29] : memref<1x256xf32, #tpu.memory_space<vmem>>, vector<1x256xf32>
    %64 = vector.broadcast %63 : vector<1x256xf32> to vector<2x256xf32>
    %65 = arith.mulf %62, %64 : vector<2x256xf32>
    %c0_30 = arith.constant 0 : index
    %c0_31 = arith.constant 0 : index
    %66 = vector.load %arg9[%c0_30, %c0_31] : memref<1x256xf32, #tpu.memory_space<vmem>>, vector<1x256xf32>
    %67 = vector.broadcast %66 : vector<1x256xf32> to vector<2x256xf32>
    %68 = arith.addf %65, %67 : vector<2x256xf32>
    %cst_32 = arith.constant 0.000000e+00 : f32
    %69 = vector.broadcast %cst_32 : f32 to vector<2x256xf32>
    %70 = arith.maximumf %68, %69 : vector<2x256xf32>
    %c0_33 = arith.constant 0 : index
    %c0_34 = arith.constant 0 : index
    %71 = vector.load %arg10[%c0_33, %c0_34] : memref<256x9xf32, #tpu.memory_space<vmem>>, vector<256x9xf32>
    %cst_35 = arith.constant dense<0.000000e+00> : vector<2x9xf32>
    %72 = tpu.matmul %70, %71, %cst_35 {dimension_numbers = #tpu.dot_dimension_numbers<[1], [0], [0], [1], [0, 0, 1, 1], [], []>} : vector<2x256xf32>, vector<256x9xf32>, vector<2x9xf32> -> vector<2x9xf32>
    %c0_36 = arith.constant 0 : index
    %c0_37 = arith.constant 0 : index
    %73 = vector.load %arg11[%c0_36, %c0_37] : memref<1x9xf32, #tpu.memory_space<vmem>>, vector<1x9xf32>
    %74 = vector.broadcast %73 : vector<1x9xf32> to vector<2x9xf32>
    %75 = arith.addf %72, %74 : vector<2x9xf32>
    %76 = tpu.iota {dimensions = array<i32: 1>} : vector<1x9xi32>
    %c4_i32 = arith.constant 4 : i32
    %c0_i32 = arith.constant 0 : i32
    %77 = arith.cmpi eq, %c4_i32, %c0_i32 : i32
    %c1_i32 = arith.constant 1 : i32
    %78 = arith.select %77, %c1_i32, %c4_i32 : i32
    %79 = vector.broadcast %78 : i32 to vector<1x9xi32>
    %80 = arith.remsi %76, %79 : vector<1x9xi32>
    %c0_i32_38 = arith.constant 0 : i32
    %81 = vector.broadcast %c0_i32_38 : i32 to vector<1x9xi32>
    %82 = arith.cmpi ne, %80, %81 : vector<1x9xi32>
    %c0_i32_39 = arith.constant 0 : i32
    %83 = vector.broadcast %c0_i32_39 : i32 to vector<1x9xi32>
    %84 = arith.cmpi slt, %80, %83 : vector<1x9xi32>
    %c0_i32_40 = arith.constant 0 : i32
    %85 = arith.cmpi slt, %78, %c0_i32_40 : i32
    %86 = vector.broadcast %85 : i1 to vector<1x9xi1>
    %87 = vector.broadcast %86 : vector<1x9xi1> to vector<1x9xi1>
    %88 = arith.xori %84, %87 : vector<1x9xi1>
    %89 = arith.andi %88, %82 : vector<1x9xi1>
    %90 = vector.broadcast %78 : i32 to vector<1x9xi32>
    %91 = arith.addi %80, %90 : vector<1x9xi32>
    %92 = arith.select %89, %91, %80 : vector<1x9xi1>, vector<1x9xi32>
    %c0_i32_41 = arith.constant 0 : i32
    %93 = vector.broadcast %c0_i32_41 : i32 to vector<1x9xi32>
    %94 = arith.cmpi eq, %92, %93 : vector<1x9xi32>
    %95 = arith.extui %94 : vector<1x9xi1> to vector<1x9xi32>
    %96 = arith.sitofp %95 : vector<1x9xi32> to vector<1x9xf32>
    %97 = vector.broadcast %96 : vector<1x9xf32> to vector<2x9xf32>
    %98 = arith.addf %75, %97 : vector<2x9xf32>
    %c0_42 = arith.constant 0 : index
    %c0_43 = arith.constant 0 : index
    %99 = vector.load %arg12[%c0_42, %c0_43] : memref<2x9xf32, #tpu.memory_space<vmem>>, vector<2x9xf32>
    tpu.vector_store %arg12[%c0_42, %c0_43], %98 {strides = array<i32>} : memref<2x9xf32, #tpu.memory_space<vmem>>, vector<2x9xf32>,
    return
  }
}

</mosaic_0001>

<bundles_post_ra>
// kernel: stn3d_forward.4
= control target key start
LH: loop header
LB: loop body
LE: loop exit
PB: predicated region body
PF: predicated region fallthrough
CT: control target
= control target key end

     0   :  { %s775_s12 = smov 0   ;;  %s777_s13 = smov 0   ;;  %s819_s0 = inlined_call_operand.vmem [shape: bf16[2,64,8], index: 0, kind: input, shape index: {}]   ;;  %s820_s1 = inlined_call_operand.vmem [shape: bf16[8,64], index: 1, kind: input, shape index: {}]   ;;  %s821_s2 = inlined_call_operand.vmem [shape: f32[2,1,64], index: 2, kind: output, shape index: {0}]   ;;  %s822_s3 = inlined_call_operand.vmem [shape: f32[2,1,64], index: 3, kind: output, shape index: {1}]  }
   0x1   :  { %s779_s14 = smov 0  }
   0x2 LB: > { %s26_s15 = sadd.s32 1, %s746_s13  ;;  %p584_p0 = scmp.ge.s32.totalorder %s750_s14, 1  ;;  %s750_s14 = sphi %s779_s14, %s14_s14   ;;  %s746_s13 = sphi %s777_s13, %s824_s13   ;;  %s742_s12 = sphi %s775_s12, %s823_s12  }
   0x3   : > { %p28_p1 = scmp.ge.s32.totalorder %s26_s15, 2  ;;  %p159_p2 = scmp.lt.s32.totalorder %s750_s14, 3 }
   0x5   : > { %s826_s15 = smov (%p28_p1, %s26_s15), 0  ;;  %p160_p3 = pnand %p584_p0, %p159_p2 }
   0x6   : > { %v213_v0 = vld [vmem:[%s820_s1] sm:$0xf] (!%p160_p3)  ;;  %vm247_vm0 = vcmask (!%p160_p3), 1043456   ;;  %p189_p4 = scmp.lt.s32.totalorder (!%p160_p3), %s742_s12, 1  ;;  %vm234_vm1 = vcmask (!%p160_p3), 64512   ;;  %v752_v6 = vmov (!%p160_p3), 0.0|0.0   ;;  %v317_v20 = vlaneseq (!%p160_p3) }
   0x7   : > { %163 = sbr.rel (%p160_p3) target bundleno = 466 (0x1d2), region = 28  ;;  %696 = vmatprep.subr.msk.bf16.mxu0 (!%p160_p3), %vm247_vm0, %v213_v0  ;;  %v249_v1 = vsel (!%p160_p3), %vm247_vm0, %v213_v0, 0  ;;  %672 = vmatprep.subr.bf16.mxu1 (!%p160_p3), %v752_v6  ;;  %vm753_vm2 = vmmov (!%p160_p3), 0   ;;  %v754_v7 = vmov (!%p160_p3), 0.0   ;;  %vm324_vm4 = vcmask (!%p160_p3), 523264  }
   0x8   : > { %625 = vmatpush3.bf16.msra.mxu0 (!%p160_p3), %v249_v1  ;;  %650 = vmatprep.mubr.msk.f32.mxu1 (!%p160_p3), %vm753_vm2, %v754_v7  ;;  %v318_v28 = vand.u32 (!%p160_p3), 127, %v317_v20  ;;  %vm480_vm5 = vcmask (!%p160_p3), 516096  }
   0x9   : > { %684 = vmatprep.subr.bf16.mxu0 (!%p160_p3), %v752_v6 }
   0xa   : > { %vm321_vm3 = vcmp.lt.s32.totalorder (!%p160_p3), %v318_v28, 64 }
   0xb   : > { %v595_v34 = vsel (!%p160_p3), %vm321_vm3, 1.0, %v754_v7 }
   0xe   : > { %s828_s12 = smov (!%p189_p4, %s742_s12), 1 }
   0xf   : > { %s600_s18 = sshll.u32 %s828_s12, 5  ;;  %s200_s24 = scalar_lea.vmem %s821_s2, %s828_s12 }
  0x10   : > { %s196_s21 = scalar_lea.vmem %s819_s0, %s600_s18  ;;  %s203_s27 = scalar_lea.vmem %s822_s3, %s828_s12 }
  0x11   : > { %v724_v2 = vld [vmem:[%s196_s21] sm:$0xff]   ;;  %v725_v3 = vld [vmem:[%s196_s21 + $0x8] sm:$0xff]   ;;  %v726_v4 = vld [vmem:[%s196_s21 + $0x10] sm:$0xff]  }
  0x12   : > { %626 = vmatprep.mubr.msk.bf16.mxu0 %vm234_vm1, %v724_v2  ;;  %v727_v5 = vld [vmem:[%s196_s21 + $0x18] sm:$0xff]  }
  0x13   : > { %627 = vmatmul.mubr.msk.bf16.vlgmr.msra.gmra.mrb[0].mxu0 %vm234_vm1, %v725_v3 }
  0x14   : > { %630 = vmatprep.mubr.msk.bf16.mxu0 %vm234_vm1, %v726_v4 }
  0x1b   : > { %631 = vmatmul.mubr.msk.bf16.gmra.mrb[4].mxu0 %vm234_vm1, %v727_v5 }
  0x1c   : > { %669 = vmatprep.mubr.msk.f32.mxu0 %vm753_vm2, %v754_v7 }
  0xe6   : > { %v628_v8 = vpop.f32.mrb[0].mxu0 }
  0xe7   : > { %v285_v9 = vpop.f32.mrb[1].mxu0  ;;  %v400_v11 = vmul.f32 %v628_v8, %v628_v8 }
  0xe8   : > { %v629_v10 = vpop.f32.mrb[2].mxu0  ;;  %v398_v15 = vmul.f32 %v285_v9, %v285_v9 }
  0xe9   : > { %v676_v12 = vpack.c.bf16 %v629_v10, %v628_v8  ;;  %v401_v13 = vmul.f32 %v629_v10, %v629_v10  ;;  %v288_v14 = vpop.f32.mrb[3].mxu0 }
  0xea   : > { %v399_v16 = vmul.f32 %v288_v14, %v288_v14  ;;  %v673_v17 = vpack.c.bf16 %v288_v14, %v285_v9 }
  0xeb   : > { %v688_v18 = vpack.c.bf16 %v401_v13, %v400_v11 }
  0xec   : > { %v685_v19 = vpack.c.bf16 %v399_v16, %v398_v15  ;;  %674 = vmatpush3.bf16.msra.mxu1 %v673_v17 }
  0xed   : > { %675 = vmatprep.subr.bf16.mxu1 %v752_v6 }
  0xee   : > { %v632_v21 = vpop.f32.mrb[4].mxu0  ;;  %686 = vmatpush3.bf16.msra.mxu0 %v685_v19 }
  0xef   : > { %v301_v22 = vpop.f32.mrb[5].mxu0  ;;  %687 = vmatprep.subr.bf16.mxu0 %v752_v6  ;;  %v404_v24 = vmul.f32 %v632_v21, %v632_v21 }
  0xf0   : > { %v633_v23 = vpop.f32.mrb[6].mxu0  ;;  %677 = vmatpush3.bf16.msra.mxu1 %v676_v12  ;;  %v402_v29 = vmul.f32 %v301_v22, %v301_v22 }
  0xf1   : > { %v682_v25 = vpack.c.bf16 %v633_v23, %v632_v21  ;;  %v405_v26 = vmul.f32 %v633_v23, %v633_v23  ;;  %v304_v27 = vpop.f32.mrb[7].mxu0  ;;  %678 = vmatprep.subr.bf16.mxu1 %v752_v6 }
  0xf2   : > { %v679_v30 = vpack.c.bf16 %v304_v27, %v301_v22  ;;  %v403_v31 = vmul.f32 %v304_v27, %v304_v27  ;;  %689 = vmatpush3.bf16.msra.mxu0 %v688_v18 }
  0xf3   : > { %v694_v32 = vpack.c.bf16 %v405_v26, %v404_v24  ;;  %690 = vmatprep.subr.bf16.mxu0 %v752_v6 }
  0xf4   : > { %v691_v33 = vpack.c.bf16 %v403_v31, %v402_v29  ;;  %680 = vmatpush3.bf16.msra.mxu1 %v679_v30 }
  0xf5   : > { %681 = vmatprep.subr.bf16.mxu1 %v752_v6 }
  0xf6   : > { %692 = vmatpush3.bf16.msra.mxu0 %v691_v33 }
  0xf7   : > { %693 = vmatprep.subr.bf16.mxu0 %v752_v6 }
  0xf8   : > { %683 = vmatpush3.bf16.msra.mxu1 %v682_v25 }
  0xfa   : > { %695 = vmatpush3.bf16.msra.mxu0 %v694_v32 }
  0xfb   : > { %651 = vmatmul.mubr.msk.f32.vlgmr.msra.gmra.mrb[0].mxu1 %vm324_vm4, %v595_v34 }
  0xfd   : > { %670 = vmatmul.mubr.msk.f32.vlgmr.msra.gmra.mrb[8].mxu0 %vm324_vm4, %v595_v34 }
 0x1ce   : > { %v394_v35 = vpop.f32.mrb[0].mxu1 }
 0x1cf   : > { %481 = vst.msk [vmem:[%s200_s24] sm:$0x1] %vm480_vm5, %v394_v35  ;;  %v652_v36 = vpop.f32.mrb[1].mxu1 }
 0x1d0   : > { %v472_v37 = vpop.f32.mrb[8].mxu0 }
 0x1d1   : > { %482 = vst.msk [vmem:[%s203_s27] sm:$0x1] %vm480_vm5, %v472_v37  ;;  %v671_v38 = vpop.f32.mrb[9].mxu0 }
 0x1d2 PF: > { %s14_s14 = sadd.s32 1, %s750_s14   ;;  %s823_s12 = smov %s746_s13 }
 0x1d3   : > { %p11_p5 = scmp.ge.s32.totalorder %s14_s14, 4   ;;  %s824_s13 = smov %s826_s15 }
 0x1d5   :  { %13 = sbr.rel (!%p11_p5) target bundleno = 2 (0x2), region = 78 }

// kernel: stn3d_forward.5
= control target key start
LH: loop header
LB: loop body
LE: loop exit
PB: predicated region body
PF: predicated region fallthrough
CT: control target
= control target key end

     0   :  { %s1058_s21 = smov 0   ;;  %s1060_s22 = smov 0   ;;  %s1126_s0 = inlined_call_operand.vmem [shape: bf16[2,64,8], index: 0, kind: input, shape index: {}]   ;;  %s1127_s1 = inlined_call_operand.vmem [shape: bf16[8,64], index: 1, kind: input, shape index: {}]   ;;  %s1128_s2 = inlined_call_operand.vmem [shape: f32[1,64], index: 2, kind: input, shape index: {}]   ;;  %s1129_s3 = inlined_call_operand.vmem [shape: f32[1,64], index: 3, kind: input, shape index: {}]   ;;  %s1130_s4 = inlined_call_operand.vmem [shape: bf16[64,128], index: 4, kind: input, shape index: {}]   ;;  %s1131_s5 = inlined_call_operand.vmem [shape: f32[2,1,128], index: 5, kind: output, shape index: {0}]   ;;  %s1132_s6 = inlined_call_operand.vmem [shape: f32[2,1,128], index: 6, kind: output, shape index: {1}]  }
   0x1   :  { %s1062_s23 = smov 0  }
   0x2 LB: > { %s29_s24 = sadd.s32 1, %s1014_s22  ;;  %p814_p0 = scmp.ge.s32.totalorder %s1018_s23, 1  ;;  %s1018_s23 = sphi %s1062_s23, %s17_s23   ;;  %s1014_s22 = sphi %s1060_s22, %s1134_s22   ;;  %s1010_s21 = sphi %s1058_s21, %s1133_s21  }
   0x3   : > { %p31_p1 = scmp.ge.s32.totalorder %s29_s24, 2  ;;  %p234_p2 = scmp.lt.s32.totalorder %s1018_s23, 3 }
   0x5   : > { %s1136_s24 = smov (%p31_p1, %s29_s24), 0  ;;  %p235_p3 = pnand %p814_p0, %p234_p2 }
   0x6   : > { %v294_v0 = vld [vmem:[%s1127_s1] sm:$0xf] (!%p235_p3)  ;;  %vm328_vm0 = vcmask (!%p235_p3), 1043456   ;;  %p270_p4 = scmp.lt.s32.totalorder (!%p235_p3), %s1010_s21, 1  ;;  %vm315_vm1 = vcmask (!%p235_p3), 64512   ;;  %v993_v7 = vld [vmem:[%s1130_s4 + $0x8] sm:$0xff] (!%p235_p3)   ;;  %v550_v62 = vlaneseq (!%p235_p3) }
   0x7   : > { %238 = sbr.rel (%p235_p3) target bundleno = 690 (0x2b2), region = 40  ;;  %v992_v1 = vld [vmem:[%s1130_s4] sm:$0xff] (!%p235_p3)   ;;  %960 = vmatprep.subr.msk.bf16.mxu0 (!%p235_p3), %vm328_vm0, %v294_v0  ;;  %v330_v2 = vsel (!%p235_p3), %vm328_vm0, %v294_v0, 0  ;;  %v994_v8 = vld [vmem:[%s1130_s4 + $0x10] sm:$0xff] (!%p235_p3)   ;;  %v995_v9 = vld [vmem:[%s1130_s4 + $0x18] sm:$0xff] (!%p235_p3)   ;;  %vm471_vm2 = vcmask (!%p235_p3), 523264  }
   0x8   : > { %873 = vmatpush3.bf16.msra.mxu0 (!%p235_p3), %v330_v2  ;;  %882 = vmatprep.subr.bf16.mxu1 (!%p235_p3), %v992_v1  ;;  %v825_v10 = vld [vmem:[%s1128_s2] ss:$0 sm:$0xff] (!%p235_p3)  ;;  %v1020_v48 = vmov (!%p235_p3), 0.0|0.0   ;;  %vm1021_vm3 = vmmov (!%p235_p3), 0   ;;  %v1022_v49 = vmov (!%p235_p3), 0.0  }
   0x9   : > { %883 = vmatpush3.bf16.msra.mxu1 (!%p235_p3), %v992_v1  ;;  %v826_v12 = vld [vmem:[%s1129_s3] ss:$0 sm:$0xff] (!%p235_p3)  ;;  %936 = vmatprep.subr.bf16.mxu0 (!%p235_p3), %v1020_v48 }
   0xa   : > { %884 = vmatprep.subr.bf16.mxu1 (!%p235_p3), %v993_v7 }
   0xd   : > { %885 = vmatpush3.bf16.msra.mxu1 (!%p235_p3), %v993_v7 }
   0xe   : > { %s1138_s21 = smov (!%p270_p4, %s1010_s21), 1  ;;  %886 = vmatprep.subr.bf16.mxu1 %v994_v8 }
   0xf   : > { %s840_s29 = sshll.u32 %s1138_s21, 5  ;;  %s281_s25 = scalar_lea.vmem %s1131_s5, %s1138_s21 }
  0x10   : > { %s277_s8 = scalar_lea.vmem %s1126_s0, %s840_s29  ;;  %s284_s28 = scalar_lea.vmem %s1132_s6, %s1138_s21 }
  0x11   : > { %v988_v3 = vld [vmem:[%s277_s8] sm:$0xff]   ;;  %v989_v4 = vld [vmem:[%s277_s8 + $0x8] sm:$0xff]   ;;  %v990_v5 = vld [vmem:[%s277_s8 + $0x10] sm:$0xff]   ;;  %887 = vmatpush3.bf16.msra.mxu1 %v994_v8 }
  0x12   : > { %874 = vmatprep.mubr.msk.bf16.mxu0 %vm315_vm1, %v988_v3  ;;  %v991_v6 = vld [vmem:[%s277_s8 + $0x18] sm:$0xff]   ;;  %888 = vmatprep.subr.bf16.mxu1 %v995_v9 }
  0x13   : > { %875 = vmatmul.mubr.msk.bf16.vlgmr.msra.gmra.mrb[0].mxu0 %vm315_vm1, %v989_v4 }
  0x14   : > { %878 = vmatprep.mubr.msk.bf16.mxu0 %vm315_vm1, %v990_v5 }
  0x15   : > { %889 = vmatpush3.bf16.msra.mxu1 %v995_v9 }
  0x16   : > { %948 = vmatprep.subr.bf16.mxu1 %v1020_v48 }
  0x1b   : > { %879 = vmatmul.mubr.msk.bf16.gmra.mrb[4].mxu0 %vm315_vm1, %v991_v6  ;;  %v551_v6 = vand.u32 127, %v550_v62 }
  0x1c   : > { %914 = vmatprep.mubr.msk.f32.mxu0 %vm1021_vm3, %v1022_v49 }
  0x1d   : > { %vm554_vm4 = vcmp.lt.s32.totalorder %v551_v6, 64 }
  0xe6   : > { %v876_v11 = vpop.f32.mrb[0].mxu0 }
  0xe7   : > { %v406_v13 = vmul.f32 %v876_v11, %v825_v10  ;;  %v366_v14 = vpop.f32.mrb[1].mxu0 }
  0xe8   : > { %v404_v15 = vmul.f32 %v825_v10, %v366_v14  ;;  %v877_v16 = vpop.f32.mrb[2].mxu0 }
  0xe9   : > { %v421_v17 = vadd.f32 %v826_v12, %v406_v13  ;;  %v407_v18 = vmul.f32 %v877_v16, %v825_v10  ;;  %v369_v19 = vpop.f32.mrb[3].mxu0 }
  0xea   : > { %v419_v20 = vadd.f32 %v826_v12, %v404_v15  ;;  %v405_v21 = vmul.f32 %v825_v10, %v369_v19 }
  0xeb   : > { %v422_v22 = vadd.f32 %v826_v12, %v407_v18  ;;  %v429_v24 = vmax.f32 %v421_v17, 0.0 }
  0xec   : > { %v420_v23 = vadd.f32 %v826_v12, %v405_v21  ;;  %v427_v26 = vmax.f32 %v419_v20, 0.0 }
  0xed   : > { %v430_v25 = vmax.f32 %v422_v22, 0.0 }
  0xee   : > { %v428_v27 = vmax.f32 %v420_v23, 0.0  ;;  %v880_v28 = vpop.f32.mrb[4].mxu0 }
  0xef   : > { %v436_v29 = vpack.c.bf16 %v430_v25, %v429_v24  ;;  %v410_v30 = vmul.f32 %v880_v28, %v825_v10  ;;  %v382_v31 = vpop.f32.mrb[5].mxu0 }
  0xf0   : > { %v408_v32 = vmul.f32 %v825_v10, %v382_v31  ;;  %v881_v33 = vpop.f32.mrb[6].mxu0  ;;  %v435_v34 = vpack.c.bf16 %v428_v27, %v427_v26 }
  0xf1   : > { %v425_v35 = vadd.f32 %v826_v12, %v410_v30  ;;  %v411_v36 = vmul.f32 %v881_v33, %v825_v10  ;;  %v385_v37 = vpop.f32.mrb[7].mxu0 }
  0xf2   : > { %v423_v38 = vadd.f32 %v826_v12, %v408_v32  ;;  %v409_v39 = vmul.f32 %v825_v10, %v385_v37  ;;  %890 = vmatprep.mubr.msk.bf16.mxu1 %vm471_vm2, %v435_v34 }
  0xf3   : > { %v426_v40 = vadd.f32 %v826_v12, %v411_v36  ;;  %891 = vmatmul.mubr.msk.bf16.vlgmr.msra.gmra.mrb[0].mxu1 %vm471_vm2, %v436_v29  ;;  %v433_v42 = vmax.f32 %v425_v35, 0.0 }
  0xf4   : > { %v424_v41 = vadd.f32 %v826_v12, %v409_v39  ;;  %v431_v44 = vmax.f32 %v423_v38, 0.0  ;;  %v835_v12 = vsel %vm554_vm4, 1.0, %v1022_v49 }
  0xf5   : > { %v434_v43 = vmax.f32 %v426_v40, 0.0 }
  0xf6   : > { %v432_v45 = vmax.f32 %v424_v41, 0.0 }
  0xf7   : > { %v438_v46 = vpack.c.bf16 %v434_v43, %v433_v42 }
  0xf8   : > { %v437_v47 = vpack.c.bf16 %v432_v45, %v431_v44 }
  0xfa   : > { %894 = vmatprep.mubr.msk.bf16.mxu1 %vm471_vm2, %v437_v47 }
  0xfb   : > { %895 = vmatmul.mubr.msk.bf16.gmra.mrb[4].mxu1 %vm471_vm2, %v438_v46 }
  0xfc   : > { %933 = vmatprep.mubr.msk.f32.mxu1 %vm1021_vm3, %v1022_v49 }
 0x1c6   : > { %v892_v50 = vpop.f32.mrb[0].mxu1 }
 0x1c7   : > { %v518_v51 = vpop.f32.mrb[1].mxu1  ;;  %v632_v53 = vmul.f32 %v892_v50, %v892_v50 }
 0x1c8   : > { %v893_v52 = vpop.f32.mrb[2].mxu1  ;;  %v630_v57 = vmul.f32 %v518_v51, %v518_v51 }
 0x1c9   : > { %v940_v54 = vpack.c.bf16 %v893_v52, %v892_v50  ;;  %v633_v55 = vmul.f32 %v893_v52, %v893_v52  ;;  %v521_v56 = vpop.f32.mrb[3].mxu1 }
 0x1ca   : > { %v937_v58 = vpack.c.bf16 %v521_v56, %v518_v51  ;;  %v631_v59 = vmul.f32 %v521_v56, %v521_v56 }
 0x1cb   : > { %v952_v60 = vpack.c.bf16 %v633_v55, %v632_v53 }
 0x1cc   : > { %v949_v61 = vpack.c.bf16 %v631_v59, %v630_v57  ;;  %938 = vmatpush3.bf16.msra.mxu0 %v937_v58 }
 0x1cd   : > { %939 = vmatprep.subr.bf16.mxu0 %v1020_v48 }
 0x1ce   : > { %v896_v63 = vpop.f32.mrb[4].mxu1  ;;  %950 = vmatpush3.bf16.msra.mxu1 %v949_v61 }
 0x1cf   : > { %v534_v0 = vpop.f32.mrb[5].mxu1  ;;  %951 = vmatprep.subr.bf16.mxu1 %v1020_v48  ;;  %v636_v2 = vmul.f32 %v896_v63, %v896_v63 }
 0x1d0   : > { %v897_v1 = vpop.f32.mrb[6].mxu1  ;;  %941 = vmatpush3.bf16.msra.mxu0 %v940_v54  ;;  %v634_v7 = vmul.f32 %v534_v0, %v534_v0 }
 0x1d1   : > { %v946_v3 = vpack.c.bf16 %v897_v1, %v896_v63  ;;  %v637_v4 = vmul.f32 %v897_v1, %v897_v1  ;;  %v537_v5 = vpop.f32.mrb[7].mxu1  ;;  %942 = vmatprep.subr.bf16.mxu0 %v1020_v48 }
 0x1d2   : > { %v943_v8 = vpack.c.bf16 %v537_v5, %v534_v0  ;;  %v635_v9 = vmul.f32 %v537_v5, %v537_v5  ;;  %953 = vmatpush3.bf16.msra.mxu1 %v952_v60 }
 0x1d3   : > { %v958_v10 = vpack.c.bf16 %v637_v4, %v636_v2  ;;  %954 = vmatprep.subr.bf16.mxu1 %v1020_v48 }
 0x1d4   : > { %v955_v11 = vpack.c.bf16 %v635_v9, %v634_v7  ;;  %944 = vmatpush3.bf16.msra.mxu0 %v943_v8 }
 0x1d5   : > { %945 = vmatprep.subr.bf16.mxu0 %v1020_v48 }
 0x1d6   : > { %956 = vmatpush3.bf16.msra.mxu1 %v955_v11 }
 0x1d7   : > { %957 = vmatprep.subr.bf16.mxu1 %v1020_v48 }
 0x1d8   : > { %947 = vmatpush3.bf16.msra.mxu0 %v946_v3 }
 0x1da   : > { %959 = vmatpush3.bf16.msra.mxu1 %v958_v10 }
 0x1db   : > { %915 = vmatmul.mubr.msk.f32.vlgmr.msra.gmra.mrb[8].mxu0 %vm471_vm2, %v835_v12 }
 0x1dd   : > { %934 = vmatmul.mubr.msk.f32.vlgmr.msra.gmra.mrb[8].mxu1 %vm471_vm2, %v835_v12 }
 0x2ae   : > { %v626_v13 = vpop.f32.mrb[8].mxu0 }
 0x2af   : > { %712 = vst [vmem:[%s281_s25] sm:$0x1] %v626_v13  ;;  %v916_v14 = vpop.f32.mrb[9].mxu0 }
 0x2b0   : > { %v704_v15 = vpop.f32.mrb[8].mxu1 }
 0x2b1   : > { %713 = vst [vmem:[%s284_s28] sm:$0x1] %v704_v15  ;;  %v935_v16 = vpop.f32.mrb[9].mxu1 }
 0x2b2 PF: > { %s17_s23 = sadd.s32 1, %s1018_s23   ;;  %s1133_s21 = smov %s1014_s22 }
 0x2b3   : > { %p14_p5 = scmp.ge.s32.totalorder %s17_s23, 4   ;;  %s1134_s22 = smov %s1136_s24 }
 0x2b5   :  { %16 = sbr.rel (!%p14_p5) target bundleno = 2 (0x2), region = 90 }

// kernel: stn3d_forward.6
= control target key start
LH: loop header
LB: loop body
LE: loop exit
PB: predicated region body
PF: predicated region fallthrough
CT: control target
= control target key end

     0   :  { %s3375_s17 = smov 0   ;;  %s3377_s18 = smov 0   ;;  %s4281_s0 = inlined_call_operand.vmem [shape: bf16[2,64,8], index: 0, kind: input, shape index: {}]   ;;  %s4282_s1 = inlined_call_operand.vmem [shape: bf16[8,64], index: 1, kind: input, shape index: {}]   ;;  %s4283_s2 = inlined_call_operand.vmem [shape: f32[1,64], index: 2, kind: input, shape index: {}]   ;;  %s4284_s3 = inlined_call_operand.vmem [shape: f32[1,64], index: 3, kind: input, shape index: {}]   ;;  %s4285_s4 = inlined_call_operand.vmem [shape: bf16[64,128], index: 4, kind: input, shape index: {}]   ;;  %s4286_s5 = inlined_call_operand.vmem [shape: f32[1,128], index: 5, kind: input, shape index: {}]   ;;  %s4287_s6 = inlined_call_operand.vmem [shape: f32[1,128], index: 6, kind: input, shape index: {}]   ;;  %s4288_s7 = inlined_call_operand.vmem [shape: bf16[128,1024], index: 7, kind: input, shape index: {}]   ;;  %s4289_s8 = inlined_call_operand.vmem [shape: f32[2,1,1024], index: 8, kind: output, shape index: {0}]   ;;  %s4290_s9 = inlined_call_operand.vmem [shape: f32[2,1,1024], index: 9, kind: output, shape index: {1}]   ;;  %s4291_s10 = inlined_call_operand.vmem [shape: f32[2,1,1024], index: 10, kind: output, shape index: {2}]   ;;  %s4292_s11 = inlined_call_operand.vmem [shape: f32[2,1,1024], index: 11, kind: output, shape index: {3}]  }
   0x1   :  { %s3379_s19 = smov 0  }
   0x2 LB: > { %s34_s20 = sadd.s32 1, %s3306_s18  ;;  %p2982_p0 = scmp.ge.s32.totalorder %s3310_s19, 1  ;;  %s3310_s19 = sphi %s3379_s19, %s22_s19   ;;  %s3306_s18 = sphi %s3377_s18, %s4421_s18   ;;  %s3302_s17 = sphi %s3375_s17, %s4420_s17  }
   0x3   : > { %p36_p1 = scmp.ge.s32.totalorder %s34_s20, 2  ;;  %p363_p2 = scmp.lt.s32.totalorder %s3310_s19, 3 }
   0x5   : > { %s4423_s20 = smov (%p36_p1, %s34_s20), 0  ;;  %p364_p3 = pnand %p2982_p0, %p363_p2 }
   0x7   : > { %367 = sbr.rel (%p364_p3) target bundleno = 1032 (0x408), region = 52 }
   0xe   : > { %v453_v0 = vld [vmem:[%s4282_s1] sm:$0xf]  ;;  %vm487_vm0 = vcmask 1043456   ;;  %p419_p4 = scmp.lt.s32.totalorder %s3302_s17, 1  ;;  %vm474_vm1 = vcmask 64512   ;;  %v3285_v7 = vld [vmem:[%s4285_s4 + $0x8] sm:$0xff]  }
   0xf   : > { %v3284_v1 = vld [vmem:[%s4285_s4] sm:$0xff]   ;;  %3252 = vmatprep.subr.msk.bf16.mxu0 %vm487_vm0, %v453_v0  ;;  %v489_v2 = vsel %vm487_vm0, %v453_v0, 0  ;;  %v3286_v8 = vld [vmem:[%s4285_s4 + $0x10] sm:$0xff]   ;;  %v3287_v9 = vld [vmem:[%s4285_s4 + $0x18] sm:$0xff]   ;;  %vm630_vm2 = vcmask 523264  }
  0x10   : > { %3099 = vmatpush3.bf16.msra.mxu0 %v489_v2  ;;  %s4425_s17 = smov (!%p419_p4, %s3302_s17), 1  ;;  %3108 = vmatprep.subr.bf16.mxu1 %v3284_v1  ;;  %v805_v10 = vld [vmem:[%s4288_s7] sm:$0xff]  ;;  %v3423_v12 = vld [vmem:[%s4288_s7 + $0x8] sm:$0xff] }
  0x11   : > { %3109 = vmatpush3.bf16.msra.mxu1 %v3284_v1  ;;  %s3084_s25 = sshll.u32 %s4425_s17, 5  ;;  %v809_v11 = vld [vmem:[%s4288_s7 + $0x20] sm:$0xff]  ;;  %v3428_v15 = vld [vmem:[%s4288_s7 + $0x28] sm:$0xff]  ;;  %s4196_s21 = sshll.u32 %s4425_s17, 3 }
  0x12   : > { %s426_s28 = scalar_lea.vmem %s4281_s0, %s3084_s25  ;;  %3110 = vmatprep.subr.bf16.mxu1 %v3285_v7  ;;  %v3009_v13 = vcombine.low %v805_v10, %v809_v11  ;;  %v3010_v14 = vcombine.high %v805_v10, %v809_v11  ;;  %v813_v16 = vld [vmem:[%s4288_s7 + $0x40] sm:$0xff]  ;;  %v3011_v18 = vcombine.low %v3423_v12, %v3428_v15  ;;  %v3012_v19 = vcombine.high %v3423_v12, %v3428_v15  ;;  %v814_v57 = vld [vmem:[%s4288_s7 + $0x48] sm:$0xff]  ;;  %s439_s23 = scalar_lea.vmem %s4291_s10, %s4196_s21 }
  0x13   : > { %v3280_v3 = vld [vmem:[%s426_s28] sm:$0xff]   ;;  %v3281_v4 = vld [vmem:[%s426_s28 + $0x8] sm:$0xff]   ;;  %v3282_v5 = vld [vmem:[%s426_s28 + $0x10] sm:$0xff]   ;;  %s443_s26 = scalar_lea.vmem %s4292_s11, %s4196_s21  ;;  %s431_s29 = scalar_lea.vmem %s4289_s8, %s4196_s21 }
  0x14   : > { %3100 = vmatprep.mubr.msk.bf16.mxu0 %vm474_vm1, %v3280_v3  ;;  %v3283_v6 = vld [vmem:[%s426_s28 + $0x18] sm:$0xff]   ;;  %v817_v17 = vld [vmem:[%s4288_s7 + $0x60] sm:$0xff]  ;;  %1189 = vmatprep.subr.bf16.mxu0 %v3010_v14  ;;  %v818_v58 = vld [vmem:[%s4288_s7 + $0x68] sm:$0xff]  ;;  %s435_s13 = scalar_lea.vmem %s4290_s9, %s4196_s21 }
  0x15   : > { %3101 = vmatmul.mubr.msk.bf16.vlgmr.msra.gmra.mrb[0].mxu0 %vm474_vm1, %v3281_v4  ;;  %3111 = vmatpush3.bf16.msra.mxu1 %v3285_v7  ;;  %v3018_v20 = vcombine.high %v813_v16, %v817_v17  ;;  %v821_v21 = vld [vmem:[%s4288_s7 + $0x80] sm:$0xff]  ;;  %v3017_v23 = vcombine.low %v813_v16, %v817_v17  ;;  %v3020_v4 = vcombine.high %v814_v57, %v818_v58  ;;  %v822_v7 = vld [vmem:[%s4288_s7 + $0x88] sm:$0xff] }
  0x16   : > { %3104 = vmatprep.mubr.msk.bf16.mxu0 %vm474_vm1, %v3282_v5  ;;  %3112 = vmatprep.subr.bf16.mxu1 %v3286_v8  ;;  %v825_v22 = vld [vmem:[%s4288_s7 + $0xa0] sm:$0xff]  ;;  %v3019_v14 = vcombine.low %v814_v57, %v818_v58  ;;  %v838_v15 = vld [vmem:[%s4288_s7 + $0x108] sm:$0xff] }
  0x17   : > { %1190 = vmatpush1.bf16.msra.mxu0 %v3009_v13  ;;  %v3026_v24 = vcombine.high %v821_v21, %v825_v22  ;;  %v829_v25 = vld [vmem:[%s4288_s7 + $0xc0] sm:$0xff]  ;;  %v3025_v27 = vcombine.low %v821_v21, %v825_v22  ;;  %v834_v21 = vld [vmem:[%s4288_s7 + $0xe8] sm:$0xff] }
  0x18   : > { %1191 = vmatprep.subr.bf16.mxu0 %v3018_v20  ;;  %v833_v26 = vld [vmem:[%s4288_s7 + $0xe0] sm:$0xff]  ;;  %v830_v20 = vld [vmem:[%s4288_s7 + $0xc8] sm:$0xff] }
  0x19   : > { %3113 = vmatpush3.bf16.msra.mxu1 %v3286_v8  ;;  %v3034_v28 = vcombine.high %v829_v25, %v833_v26  ;;  %v837_v29 = vld [vmem:[%s4288_s7 + $0x100] sm:$0xff]  ;;  %v3033_v31 = vcombine.low %v829_v25, %v833_v26  ;;  %v826_v8 = vld [vmem:[%s4288_s7 + $0xa8] sm:$0xff]  ;;  %v3036_v12 = vcombine.high %v830_v20, %v834_v21  ;;  %v3035_v25 = vcombine.low %v830_v20, %v834_v21 }
  0x1a   : > { %3114 = vmatprep.subr.bf16.mxu1 %v3287_v9  ;;  %v841_v30 = vld [vmem:[%s4288_s7 + $0x120] sm:$0xff]  ;;  %v3028_v17 = vcombine.high %v822_v7, %v826_v8 }
  0x1b   : > { %1192 = vmatpush1.bf16.msra.mxu0 %v3017_v23  ;;  %v3042_v32 = vcombine.high %v837_v29, %v841_v30  ;;  %v845_v33 = vld [vmem:[%s4288_s7 + $0x140] sm:$0xff]  ;;  %v3041_v35 = vcombine.low %v837_v29, %v841_v30 }
  0x1c   : > { %1193 = vmatprep.subr.bf16.mxu0 %v3026_v24  ;;  %v849_v34 = vld [vmem:[%s4288_s7 + $0x160] sm:$0xff]  ;;  %v3027_v24 = vcombine.low %v822_v7, %v826_v8  ;;  %v815_v7 = vld [vmem:[%s4288_s7 + $0x50] sm:$0xff] }
  0x1d   : > { %3105 = vmatmul.mubr.msk.bf16.gmra.mrb[4].mxu0 %vm474_vm1, %v3283_v6  ;;  %3115 = vmatpush3.bf16.msra.mxu1 %v3287_v9  ;;  %v3050_v36 = vcombine.high %v845_v33, %v849_v34  ;;  %v3049_v37 = vcombine.low %v845_v33, %v849_v34  ;;  %v2997_v38 = vld [vmem:[%s4283_s2] ss:$0 sm:$0xff] }
  0x1e   : > { %1262 = vmatprep.subr.bf16.mxu1 %v3012_v19  ;;  %v2998_v40 = vld [vmem:[%s4284_s3] ss:$0 sm:$0xff] }
  0x1f   : > { %1194 = vmatpush1.bf16.msra.mxu0 %v3025_v27  ;;  %v846_v27 = vld [vmem:[%s4288_s7 + $0x148] sm:$0xff]  ;;  %v857_v33 = vld [vmem:[%s4288_s7 + $0x1a0] sm:$0xff] }
  0x20   : > { %1195 = vmatprep.subr.bf16.mxu0 %v3034_v28  ;;  %v850_v28 = vld [vmem:[%s4288_s7 + $0x168] sm:$0xff]  ;;  %v3007_v57 = vld [vmem:[%s4286_s5] ss:$0 sm:$0xff] }
  0x21   : > { %v3052_v30 = vcombine.high %v846_v27, %v850_v28 }
  0x23   : > { %1196 = vmatpush1.bf16.msra.mxu0 %v3033_v31  ;;  %v3051_v31 = vcombine.low %v846_v27, %v850_v28  ;;  %v827_v28 = vld [vmem:[%s4288_s7 + $0xb0] sm:$0xff] }
  0x24   : > { %1197 = vmatprep.subr.bf16.mxu0 %v3042_v32  ;;  %v853_v32 = vld [vmem:[%s4288_s7 + $0x180] sm:$0xff] }
  0x25   : > { %v3058_v34 = vcombine.high %v853_v32, %v857_v33 }
  0x27   : > { %1198 = vmatpush1.bf16.msra.mxu0 %v3041_v35  ;;  %v854_v35 = vld [vmem:[%s4288_s7 + $0x188] sm:$0xff] }
  0x28   : > { %1199 = vmatprep.subr.bf16.mxu0 %v3050_v36  ;;  %v858_v36 = vld [vmem:[%s4288_s7 + $0x1a8] sm:$0xff] }
  0x2b   : > { %1200 = vmatpush1.bf16.msra.mxu0 %v3049_v37  ;;  %v3057_v37 = vcombine.low %v853_v32, %v857_v33 }
  0x2c   : > { %1201 = vmatprep.subr.bf16.mxu0 %v3058_v34 }
  0x2f   : > { %1202 = vmatpush1.bf16.msra.mxu0 %v3057_v37 }
  0xe8   : > { %v3102_v39 = vpop.f32.mrb[0].mxu0 }
  0xe9   : > { %v565_v41 = vmul.f32 %v3102_v39, %v2997_v38  ;;  %v525_v42 = vpop.f32.mrb[1].mxu0  ;;  %v3060_v39 = vcombine.high %v854_v35, %v858_v36 }
  0xea   : > { %v563_v43 = vmul.f32 %v2997_v38, %v525_v42  ;;  %v3103_v44 = vpop.f32.mrb[2].mxu0  ;;  %v862_v42 = vld [vmem:[%s4288_s7 + $0x1c8] sm:$0xff] }
  0xeb   : > { %v580_v45 = vadd.f32 %v2998_v40, %v565_v41  ;;  %v566_v46 = vmul.f32 %v3103_v44, %v2997_v38  ;;  %v528_v47 = vpop.f32.mrb[3].mxu0  ;;  %v865_v41 = vld [vmem:[%s4288_s7 + $0x1e0] sm:$0xff]  ;;  %v866_v44 = vld [vmem:[%s4288_s7 + $0x1e8] sm:$0xff] }
  0xec   : > { %v578_v48 = vadd.f32 %v2998_v40, %v563_v43  ;;  %v564_v49 = vmul.f32 %v2997_v38, %v528_v47  ;;  %v3068_v47 = vcombine.high %v862_v42, %v866_v44 }
  0xed   : > { %v581_v50 = vadd.f32 %v2998_v40, %v566_v46  ;;  %v588_v52 = vmax.f32 %v580_v45, 0.0  ;;  %v3067_v46 = vcombine.low %v862_v42, %v866_v44  ;;  %v832_v44 = vld [vmem:[%s4288_s7 + $0xd8] sm:$0xff] }
  0xee   : > { %v579_v51 = vadd.f32 %v2998_v40, %v564_v49  ;;  %v586_v54 = vmax.f32 %v578_v48, 0.0  ;;  %v807_v48 = vld [vmem:[%s4288_s7 + $0x10] sm:$0xff] }
  0xef   : > { %v589_v53 = vmax.f32 %v581_v50, 0.0  ;;  %v811_v49 = vld [vmem:[%s4288_s7 + $0x30] sm:$0xff]  ;;  %v808_v50 = vld [vmem:[%s4288_s7 + $0x18] sm:$0xff] }
  0xf0   : > { %v587_v55 = vmax.f32 %v579_v51, 0.0  ;;  %v3106_v56 = vpop.f32.mrb[4].mxu0  ;;  %v3014_v51 = vcombine.high %v807_v48, %v811_v49 }
  0xf1   : > { %v595_v59 = vpack.c.bf16 %v589_v53, %v588_v52  ;;  %v569_v60 = vmul.f32 %v3106_v56, %v2997_v38  ;;  %v541_v61 = vpop.f32.mrb[5].mxu0  ;;  %v812_v52 = vld [vmem:[%s4288_s7 + $0x38] sm:$0xff]  ;;  %v3312_v53 = vmov 0  }
  0xf2   : > { %v567_v62 = vmul.f32 %v2997_v38, %v541_v61  ;;  %v3107_v63 = vpop.f32.mrb[6].mxu0  ;;  %v594_v0 = vpack.c.bf16 %v587_v55, %v586_v54  ;;  %1221 = vmatprep.mubr.bf16.mxu0 %v3312_v53  ;;  %v3013_v54 = vcombine.low %v807_v48, %v811_v49  ;;  %v3015_v55 = vcombine.low %v808_v50, %v812_v52 }
  0xf3   : > { %v584_v1 = vadd.f32 %v2998_v40, %v569_v60  ;;  %v570_v2 = vmul.f32 %v3107_v63, %v2997_v38  ;;  %v544_v3 = vpop.f32.mrb[7].mxu0  ;;  %v3016_v56 = vcombine.high %v808_v50, %v812_v52 }
  0xf4   : > { %v582_v5 = vadd.f32 %v2998_v40, %v567_v62  ;;  %v568_v6 = vmul.f32 %v2997_v38, %v544_v3  ;;  %3116 = vmatprep.mubr.msk.bf16.mxu1 %vm630_vm2, %v594_v0  ;;  %v3059_v38 = vcombine.low %v854_v35, %v858_v36 }
  0xf5   : > { %v592_v9 = vmax.f32 %v584_v1, 0.0  ;;  %v585_v10 = vadd.f32 %v2998_v40, %v570_v2  ;;  %3117 = vmatmul.mubr.msk.bf16.vlgmr.msra.gmra.mrb[0].mxu1 %vm630_vm2, %v595_v59  ;;  %v3008_v59 = vld [vmem:[%s4287_s6] ss:$0 sm:$0xff] }
  0xf6   : > { %v590_v11 = vmax.f32 %v582_v5, 0.0  ;;  %v583_v13 = vadd.f32 %v2998_v40, %v568_v6  ;;  %1263 = vmatpush1.bf16.msra.mxu1 %v3011_v18  ;;  %v842_v18 = vld [vmem:[%s4288_s7 + $0x128] sm:$0xff]  ;;  %v861_v40 = vld [vmem:[%s4288_s7 + $0x1c0] sm:$0xff] }
  0xf7   : > { %v593_v16 = vmax.f32 %v585_v10, 0.0  ;;  %1264 = vmatprep.subr.bf16.mxu1 %v3020_v4  ;;  %v3044_v26 = vcombine.high %v838_v15, %v842_v18  ;;  %v3043_v29 = vcombine.low %v838_v15, %v842_v18  ;;  %v3066_v43 = vcombine.high %v861_v40, %v865_v41  ;;  %v819_v10 = vld [vmem:[%s4288_s7 + $0x70] sm:$0xff] }
  0xf8   : > { %v591_v19 = vmax.f32 %v583_v13, 0.0  ;;  %v3065_v45 = vcombine.low %v861_v40, %v865_v41  ;;  %v820_v13 = vld [vmem:[%s4288_s7 + $0x78] sm:$0xff]  ;;  %v823_v18 = vld [vmem:[%s4288_s7 + $0x90] sm:$0xff]  ;;  %v3021_v35 = vcombine.low %v815_v7, %v819_v10 }
  0xf9   : > { %v597_v22 = vpack.c.bf16 %v593_v16, %v592_v9  ;;  %1203 = vmatprep.subr.bf16.mxu0 %v3066_v43  ;;  %v831_v41 = vld [vmem:[%s4288_s7 + $0xd0] sm:$0xff]  ;;  %v3029_v48 = vcombine.low %v823_v18, %v827_v28 }
  0xfa   : > { %v596_v23 = vpack.c.bf16 %v591_v19, %v590_v11  ;;  %1265 = vmatpush1.bf16.msra.mxu1 %v3019_v14  ;;  %1204 = vmatpush1.bf16.msra.mxu0 %v3065_v45  ;;  %v816_v11 = vld [vmem:[%s4288_s7 + $0x58] sm:$0xff]  ;;  %v835_v43 = vld [vmem:[%s4288_s7 + $0xf0] sm:$0xff] }
  0xfb   : > { %1266 = vmatprep.subr.bf16.mxu1 %v3028_v17  ;;  %1335 = vmatprep.subr.bf16.mxu0 %v3014_v51  ;;  %v3024_v15 = vcombine.high %v816_v11, %v820_v13  ;;  %v3023_v36 = vcombine.low %v816_v11, %v820_v13  ;;  %v836_v45 = vld [vmem:[%s4288_s7 + $0xf8] sm:$0xff]  ;;  %v3038_v51 = vcombine.high %v831_v41, %v835_v43 }
  0xfc   : > { %3120 = vmatprep.mubr.msk.bf16.mxu1 %vm630_vm2, %v596_v23  ;;  %v3040_v52 = vcombine.high %v832_v44, %v836_v45 }
  0xfd   : > { %3121 = vmatmul.mubr.msk.bf16.gmra.mrb[4].mxu1 %vm630_vm2, %v597_v22 }
  0xfe   : > { %1267 = vmatpush1.bf16.msra.mxu1 %v3027_v24  ;;  %1294 = vmatprep.mubr.bf16.mxu1 %v3312_v53 }
  0xff   : > { %1268 = vmatprep.subr.bf16.mxu1 %v3036_v12  ;;  %v3022_v12 = vcombine.high %v815_v7, %v819_v10  ;;  %v859_v7 = vld [vmem:[%s4288_s7 + $0x1b0] sm:$0xff] }
 0x102   : > { %1269 = vmatpush1.bf16.msra.mxu1 %v3035_v25 }
 0x103   : > { %1270 = vmatprep.subr.bf16.mxu1 %v3044_v26 }
 0x106   : > { %1271 = vmatpush1.bf16.msra.mxu1 %v3043_v29  ;;  %v824_v29 = vld [vmem:[%s4288_s7 + $0x98] sm:$0xff] }
 0x107   : > { %1272 = vmatprep.subr.bf16.mxu1 %v3052_v30  ;;  %v828_v30 = vld [vmem:[%s4288_s7 + $0xb8] sm:$0xff] }
 0x108   : > { %v3032_v40 = vcombine.high %v824_v29, %v828_v30  ;;  %v3031_v49 = vcombine.low %v824_v29, %v828_v30 }
 0x10a   : > { %1273 = vmatpush1.bf16.msra.mxu1 %v3051_v31 }
 0x10b   : > { %1274 = vmatprep.subr.bf16.mxu1 %v3060_v39  ;;  %v3030_v39 = vcombine.high %v823_v18, %v827_v28 }
 0x10e   : > { %1275 = vmatpush1.bf16.msra.mxu1 %v3059_v38 }
 0x10f   : > { %1276 = vmatprep.subr.bf16.mxu1 %v3068_v47 }
 0x112   : > { %1277 = vmatpush1.bf16.msra.mxu1 %v3067_v46 }
 0x113   : > { %1408 = vmatprep.subr.bf16.mxu1 %v3016_v56  ;;  %v840_v56 = vld [vmem:[%s4288_s7 + $0x118] sm:$0xff] }
 0x1c8   : > { %v3118_v58 = vpop.f32.mrb[0].mxu1 }
 0x1c9   : > { %v717_v60 = vmul.f32 %v3118_v58, %v3007_v57  ;;  %v677_v61 = vpop.f32.mrb[1].mxu1  ;;  %v3037_v58 = vcombine.low %v831_v41, %v835_v43 }
 0x1ca   : > { %v715_v62 = vmul.f32 %v3007_v57, %v677_v61  ;;  %v3119_v63 = vpop.f32.mrb[2].mxu1 }
 0x1cb   : > { %v732_v0 = vadd.f32 %v3008_v59, %v717_v60  ;;  %v718_v1 = vmul.f32 %v3119_v63, %v3007_v57  ;;  %v680_v2 = vpop.f32.mrb[3].mxu1  ;;  %v851_v63 = vld [vmem:[%s4288_s7 + $0x170] sm:$0xff] }
 0x1cc   : > { %v730_v3 = vadd.f32 %v3008_v59, %v715_v62  ;;  %v716_v4 = vmul.f32 %v3007_v57, %v680_v2  ;;  %v847_v62 = vld [vmem:[%s4288_s7 + $0x150] sm:$0xff] }
 0x1cd   : > { %v733_v5 = vadd.f32 %v3008_v59, %v718_v1  ;;  %v740_v8 = vmax.f32 %v732_v0, 0.0  ;;  %v848_v0 = vld [vmem:[%s4288_s7 + $0x158] sm:$0xff]  ;;  %v3053_v10 = vcombine.low %v847_v62, %v851_v63 }
 0x1ce   : > { %v731_v6 = vadd.f32 %v3008_v59, %v716_v4  ;;  %v738_v14 = vmax.f32 %v730_v3, 0.0  ;;  %v852_v1 = vld [vmem:[%s4288_s7 + $0x178] sm:$0xff]  ;;  %v3054_v4 = vcombine.high %v847_v62, %v851_v63 }
 0x1cf   : > { %v741_v9 = vmax.f32 %v733_v5, 0.0  ;;  %v3056_v5 = vcombine.high %v848_v0, %v852_v1  ;;  %v3055_v11 = vcombine.low %v848_v0, %v852_v1 }
 0x1d0   : > { %v739_v16 = vmax.f32 %v731_v6, 0.0  ;;  %v3122_v17 = vpop.f32.mrb[4].mxu1  ;;  %v855_v6 = vld [vmem:[%s4288_s7 + $0x190] sm:$0xff] }
 0x1d1   : > { %v3563_v19 = vpack.c.bf16 %v741_v9, %v740_v8  ;;  %v721_v20 = vmul.f32 %v3122_v17, %v3007_v57  ;;  %v693_v21 = vpop.f32.mrb[5].mxu1  ;;  %v856_v8 = vld [vmem:[%s4288_s7 + $0x198] sm:$0xff]  ;;  %v3062_v13 = vcombine.high %v855_v6, %v859_v7  ;;  %v867_v17 = vld [vmem:[%s4288_s7 + $0x1f0] sm:$0xff] }
 0x1d2   : > { %v3565_v22 = vpack.c.bf16 %v739_v16, %v738_v14  ;;  %v719_v23 = vmul.f32 %v3007_v57, %v693_v21  ;;  %v3123_v24 = vpop.f32.mrb[6].mxu1  ;;  %v860_v9 = vld [vmem:[%s4288_s7 + $0x1b8] sm:$0xff]  ;;  %v863_v16 = vld [vmem:[%s4288_s7 + $0x1d0] sm:$0xff] }
 0x1d3   : > { %v736_v25 = vadd.f32 %v3008_v59, %v721_v20  ;;  %v722_v26 = vmul.f32 %v3123_v24, %v3007_v57  ;;  %v696_v27 = vpop.f32.mrb[7].mxu1  ;;  %v3064_v14 = vcombine.high %v856_v8, %v860_v9  ;;  %v864_v20 = vld [vmem:[%s4288_s7 + $0x1d8] sm:$0xff]  ;;  %v3063_v24 = vcombine.low %v856_v8, %v860_v9 }
 0x1d4   : > { %v734_v31 = vadd.f32 %v3008_v59, %v719_v23  ;;  %v720_v32 = vmul.f32 %v3007_v57, %v696_v27  ;;  %1222 = vmatmul.mubr.bf16.vlgmr.msra.gmra.mrb[8].mxu0 %v3565_v22  ;;  %1295 = vmatmul.mubr.bf16.vlgmr.msra.gmra.mrb[8].mxu1 %v3565_v22  ;;  %v844_v57 = vld [vmem:[%s4288_s7 + $0x138] sm:$0xff]  ;;  %v3061_v23 = vcombine.low %v855_v6, %v859_v7  ;;  %v1481_v27 = vlaneseq }
 0x1d5   : > { %v744_v33 = vmax.f32 %v736_v25, 0.0  ;;  %v737_v34 = vadd.f32 %v3008_v59, %v722_v26  ;;  %1336 = vmatpush1.bf16.msra.mxu0 %v3013_v54  ;;  %1409 = vmatpush1.bf16.msra.mxu1 %v3015_v55  ;;  %v839_v54 = vld [vmem:[%s4288_s7 + $0x110] sm:$0xff]  ;;  %v3048_v61 = vcombine.high %v840_v56, %v844_v57  ;;  %v3047_v3 = vcombine.low %v840_v56, %v844_v57  ;;  %v868_v21 = vld [vmem:[%s4288_s7 + $0x1f8] sm:$0xff] }
 0x1d6   : > { %v742_v37 = vmax.f32 %v734_v31, 0.0  ;;  %v735_v38 = vadd.f32 %v3008_v59, %v720_v32  ;;  %1337 = vmatprep.subr.bf16.mxu0 %v3022_v12  ;;  %1410 = vmatprep.subr.bf16.mxu1 %v3024_v15  ;;  %v843_v55 = vld [vmem:[%s4288_s7 + $0x130] sm:$0xff]  ;;  %v3039_v59 = vcombine.low %v832_v44, %v836_v45  ;;  %v3070_v12 = vcombine.high %v863_v16, %v867_v17 }
 0x1d7   : > { %v745_v42 = vmax.f32 %v737_v34, 0.0  ;;  %1231 = vmatprep.mubr.bf16.mxu0 %v3312_v53  ;;  %1304 = vmatprep.mubr.bf16.mxu1 %v3312_v53  ;;  %v3046_v60 = vcombine.high %v839_v54, %v843_v55  ;;  %v3045_v2 = vcombine.low %v839_v54, %v843_v55  ;;  %v3072_v15 = vcombine.high %v864_v20, %v868_v21 }
 0x1d8   : > { %v743_v46 = vmax.f32 %v735_v38, 0.0  ;;  %v3069_v18 = vcombine.low %v863_v16, %v867_v17  ;;  %v3071_v25 = vcombine.low %v864_v20, %v868_v21 }
 0x1d9   : > { %v3595_v47 = vpack.c.bf16 %v745_v42, %v744_v33  ;;  %1338 = vmatpush1.bf16.msra.mxu0 %v3021_v35  ;;  %1411 = vmatpush1.bf16.msra.mxu1 %v3023_v36  ;;  %v2350_v33 = vshrl.u32 %v1481_v27, 7 }
 0x1da   : > { %v3597_v50 = vpack.c.bf16 %v743_v46, %v742_v37  ;;  %1339 = vmatprep.subr.bf16.mxu0 %v3030_v39  ;;  %1412 = vmatprep.subr.bf16.mxu1 %v3032_v40 }
 0x1dc   : > { %1232 = vmatmul.mubr.bf16.gmra.mrb[12].mxu0 %v3563_v19  ;;  %1305 = vmatmul.mubr.bf16.gmra.mrb[12].mxu1 %v3563_v19 }
 0x1dd   : > { %1340 = vmatpush1.bf16.msra.mxu0 %v3029_v48  ;;  %1413 = vmatpush1.bf16.msra.mxu1 %v3031_v49 }
 0x1de   : > { %1341 = vmatprep.subr.bf16.mxu0 %v3038_v51  ;;  %1414 = vmatprep.subr.bf16.mxu1 %v3040_v52 }
 0x1df   : > { %1241 = vmatprep.mubr.bf16.mxu0 %v3312_v53  ;;  %1314 = vmatprep.mubr.bf16.mxu1 %v3312_v53 }
 0x1e1   : > { %1342 = vmatpush1.bf16.msra.mxu0 %v3037_v58  ;;  %1415 = vmatpush1.bf16.msra.mxu1 %v3039_v59 }
 0x1e2   : > { %1343 = vmatprep.subr.bf16.mxu0 %v3046_v60  ;;  %1416 = vmatprep.subr.bf16.mxu1 %v3048_v61 }
 0x1e4   : > { %1242 = vmatmul.mubr.bf16.gmra.mrb[16].mxu0 %v3597_v50  ;;  %1315 = vmatmul.mubr.bf16.gmra.mrb[16].mxu1 %v3597_v50 }
 0x1e5   : > { %1344 = vmatpush1.bf16.msra.mxu0 %v3045_v2  ;;  %1417 = vmatpush1.bf16.msra.mxu1 %v3047_v3 }
 0x1e6   : > { %1345 = vmatprep.subr.bf16.mxu0 %v3054_v4  ;;  %1418 = vmatprep.subr.bf16.mxu1 %v3056_v5 }
 0x1e7   : > { %1251 = vmatprep.mubr.bf16.mxu0 %v3312_v53  ;;  %1324 = vmatprep.mubr.bf16.mxu1 %v3312_v53 }
 0x1e9   : > { %1346 = vmatpush1.bf16.msra.mxu0 %v3053_v10  ;;  %1419 = vmatpush1.bf16.msra.mxu1 %v3055_v11 }
 0x1ea   : > { %1347 = vmatprep.subr.bf16.mxu0 %v3062_v13  ;;  %1420 = vmatprep.subr.bf16.mxu1 %v3064_v14 }
 0x1ec   : > { %1252 = vmatmul.mubr.bf16.gmra.mrb[20].mxu0 %v3595_v47  ;;  %1325 = vmatmul.mubr.bf16.gmra.mrb[20].mxu1 %v3595_v47 }
 0x1ed   : > { %1348 = vmatpush1.bf16.msra.mxu0 %v3061_v23  ;;  %1421 = vmatpush1.bf16.msra.mxu1 %v3063_v24 }
 0x1ee   : > { %1349 = vmatprep.subr.bf16.mxu0 %v3070_v12  ;;  %1422 = vmatprep.subr.bf16.mxu1 %v3072_v15 }
 0x1ef   : > { %1367 = vmatprep.mubr.bf16.mxu0 %v3312_v53  ;;  %1440 = vmatprep.mubr.bf16.mxu1 %v3312_v53 }
 0x1f1   : > { %1350 = vmatpush1.bf16.msra.mxu0 %v3069_v18  ;;  %1423 = vmatpush1.bf16.msra.mxu1 %v3071_v25 }
 0x1f4   : > { %1368 = vmatmul.mubr.bf16.vlgmr.msra.gmra.mrb[24].mxu0 %v3565_v22  ;;  %1441 = vmatmul.mubr.bf16.vlgmr.msra.gmra.mrb[24].mxu1 %v3565_v22  ;;  %v4293_v22 = vmov 0.0  }
 0x1f5   : > { %1377 = vmatprep.mubr.bf16.mxu0 %v3312_v53  ;;  %1450 = vmatprep.mubr.bf16.mxu1 %v3312_v53 }
 0x1fc   : > { %1378 = vmatmul.mubr.bf16.gmra.mrb[28].mxu0 %v3563_v19  ;;  %1451 = vmatmul.mubr.bf16.gmra.mrb[28].mxu1 %v3563_v19  ;;  %v3314_v19 = vmov 1966171168  }
 0x1fd   : > { %1387 = vmatprep.mubr.bf16.mxu0 %v3312_v53  ;;  %1460 = vmatprep.mubr.bf16.mxu1 %v3312_v53  ;;  %v2347_v26 = vunpack.c.l.s4 %v3314_v19 }
 0x1ff   : > { %v2348_v32 = vunpack.c.0.s8 %v2347_v26 }
 0x201   : > { %v3700_v0 = vsub.s32 %v2348_v32, %v2350_v33 }
 0x204   : > { %1388 = vmatmul.mubr.bf16.gmra.mrb[32].mxu0 %v3597_v50  ;;  %1461 = vmatmul.mubr.bf16.gmra.mrb[32].mxu1 %v3597_v50 }
 0x205   : > { %1397 = vmatprep.mubr.bf16.mxu0 %v3312_v53  ;;  %1470 = vmatprep.mubr.bf16.mxu1 %v3312_v53 }
 0x20c   : > { %1398 = vmatmul.mubr.bf16.gmra.mrb[36].mxu0 %v3595_v47  ;;  %1471 = vmatmul.mubr.bf16.gmra.mrb[36].mxu1 %v3595_v47 }
 0x20d   : > { %1554 = vmatprep.mubr.f32.mxu0 %v4293_v22  ;;  %1625 = vmatprep.mubr.f32.mxu1 %v4293_v22 }
 0x2a7   : > { %v1223_v28 = vpop.f32.mrb[8].mxu0  ;;  %v1296_v29 = vpop.f32.mrb[8].mxu1 }
 0x2a8   : > { %v1225_v30 = vpop.f32.mrb[9].mxu0  ;;  %v1298_v31 = vpop.f32.mrb[9].mxu1  ;;  %v3676_v53 = vmul.f32 %v1223_v28, %v1223_v28  ;;  %v3678_v34 = vmul.f32 %v1296_v29, %v1296_v29 }
 0x2a9   : > { %v3680_v35 = vmul.f32 %v1225_v30, %v1225_v30  ;;  %v3682_v36 = vmul.f32 %v1298_v31, %v1298_v31  ;;  %v1227_v37 = vpop.f32.mrb[10].mxu0  ;;  %v1300_v38 = vpop.f32.mrb[10].mxu1 }
 0x2aa   : > { %4312 = vst [vmem:[#allocation2_spill] sm:$0xff] %v3676_v53  ;;  %4313 = vst [vmem:[#allocation3_spill] sm:$0xff] %v3678_v34  ;;  %v3126_v39 = vpack.c.bf16 %v1227_v37, %v1223_v28  ;;  %v3684_v40 = vmul.f32 %v1227_v37, %v1227_v37  ;;  %v2122_v41 = vmax.f32 %v1223_v28, %v1227_v37  ;;  %v1229_v43 = vpop.f32.mrb[11].mxu0  ;;  %v1302_v44 = vpop.f32.mrb[11].mxu1 }
 0x2ab   : > { %v2226_v42 = vmin.f32 %v1223_v28, %v1227_v37  ;;  %v3142_v45 = vpack.c.bf16 %v1300_v38, %v1296_v29  ;;  %v3686_v46 = vmul.f32 %v1300_v38, %v1300_v38  ;;  %v2148_v47 = vmax.f32 %v1296_v29, %v1300_v38 }
 0x2ac   : > { %4314 = vst [vmem:[#allocation4_spill] sm:$0xff] %v3684_v40  ;;  %v2252_v48 = vmin.f32 %v1296_v29, %v1300_v38  ;;  %v3688_v49 = vmul.f32 %v1229_v43, %v1229_v43  ;;  %v2135_v50 = vmax.f32 %v1225_v30, %v1229_v43  ;;  %v2239_v51 = vmin.f32 %v1225_v30, %v1229_v43 }
 0x2ad   : > { %4315 = vst [vmem:[#allocation5_spill] sm:$0xff] %v3686_v46  ;;  %v3690_v52 = vmul.f32 %v1302_v44, %v1302_v44  ;;  %v2161_v54 = vmax.f32 %v1298_v31, %v1302_v44  ;;  %v2265_v55 = vmin.f32 %v1298_v31, %v1302_v44  ;;  %v3124_v56 = vpack.c.bf16 %v1229_v43, %v1225_v30 }
 0x2ae   : > { %v3140_v57 = vpack.c.bf16 %v1302_v44, %v1298_v31 }
 0x2af   : > { %3125 = vmatprep.subr.bf16.mxu0 %v3124_v56  ;;  %v1233_v62 = vpop.f32.mrb[12].mxu0  ;;  %v1306_v63 = vpop.f32.mrb[12].mxu1 }
 0x2b0   : > { %3141 = vmatprep.subr.bf16.mxu1 %v3140_v57  ;;  %3127 = vmatpush1.bf16.msra.mxu0 %v3126_v39  ;;  %v3702_v1 = vmul.f32 %v1233_v62, %v1233_v62  ;;  %v2123_v2 = vmax.f32 %v2122_v41, %v1233_v62  ;;  %v2227_v3 = vmin.f32 %v2226_v42, %v1233_v62  ;;  %v1235_v4 = vpop.f32.mrb[13].mxu0  ;;  %v1308_v5 = vpop.f32.mrb[13].mxu1 }
 0x2b1   : > { %3143 = vmatpush1.bf16.msra.mxu1 %v3142_v45  ;;  %v3704_v6 = vmul.f32 %v1306_v63, %v1306_v63  ;;  %v2149_v7 = vmax.f32 %v2148_v47, %v1306_v63  ;;  %v2253_v8 = vmin.f32 %v2252_v48, %v1306_v63  ;;  %v3706_v9 = vmul.f32 %v1235_v4, %v1235_v4  ;;  %v1237_v10 = vpop.f32.mrb[14].mxu0  ;;  %v1310_v11 = vpop.f32.mrb[14].mxu1 }
 0x2b2   : > { %4316 = vst [vmem:[#allocation6_spill] sm:$0xff] %v3702_v1  ;;  %v2136_v13 = vmax.f32 %v2135_v50, %v1235_v4  ;;  %v2240_v14 = vmin.f32 %v2239_v51, %v1235_v4  ;;  %v3708_v16 = vmul.f32 %v1308_v5, %v1308_v5  ;;  %v2162_v17 = vmax.f32 %v2161_v54, %v1308_v5  ;;  %v1239_v20 = vpop.f32.mrb[15].mxu0  ;;  %v1312_v21 = vpop.f32.mrb[15].mxu1 }
 0x2b3   : > { %4317 = vst [vmem:[#allocation7_spill] sm:$0xff] %v3704_v6  ;;  %4318 = vst [vmem:[#allocation8_spill] sm:$0xff] %v3706_v9  ;;  %v2266_v23 = vmin.f32 %v2265_v55, %v1308_v5  ;;  %v3130_v24 = vpack.c.bf16 %v1237_v10, %v1233_v62  ;;  %v3710_v12 = vmul.f32 %v1237_v10, %v1237_v10 }
 0x2b4   : > { %4319 = vst [vmem:[#allocation9_spill] sm:$0xff] %v3708_v16  ;;  %v2124_v15 = vmax.f32 %v2123_v2, %v1237_v10  ;;  %v2228_v18 = vmin.f32 %v2227_v3, %v1237_v10  ;;  %v3146_v25 = vpack.c.bf16 %v1310_v11, %v1306_v63  ;;  %v3712_v19 = vmul.f32 %v1310_v11, %v1310_v11 }
 0x2b5   : > { %4320 = vst [vmem:[#allocation10_spill] sm:$0xff] %v3710_v12  ;;  %v2150_v26 = vmax.f32 %v2149_v7, %v1310_v11  ;;  %v2254_v28 = vmin.f32 %v2253_v8, %v1310_v11  ;;  %v3714_v29 = vmul.f32 %v1239_v20, %v1239_v20  ;;  %v2137_v30 = vmax.f32 %v2136_v13, %v1239_v20 }
 0x2b6   : > { %4321 = vst [vmem:[#allocation11_spill] sm:$0xff] %v3712_v19  ;;  %v2241_v31 = vmin.f32 %v2240_v14, %v1239_v20  ;;  %v3716_v32 = vmul.f32 %v1312_v21, %v1312_v21  ;;  %v2163_v33 = vmax.f32 %v2162_v17, %v1312_v21  ;;  %v2267_v37 = vmin.f32 %v2266_v23, %v1312_v21 }
 0x2b7   : > { %4322 = vst [vmem:[#allocation12_spill] sm:$0xff] %v3714_v29  ;;  %v3128_v38 = vpack.c.bf16 %v1239_v20, %v1235_v4  ;;  %v3144_v39 = vpack.c.bf16 %v1312_v21, %v1308_v5  ;;  %v1243_v41 = vpop.f32.mrb[16].mxu0  ;;  %v1316_v42 = vpop.f32.mrb[16].mxu1 }
 0x2b8   : > { %4323 = vst [vmem:[#allocation13_spill] sm:$0xff] %v3716_v32  ;;  %v3724_v47 = vmul.f32 %v1243_v41, %v1243_v41  ;;  %v2125_v48 = vmax.f32 %v2124_v15, %v1243_v41  ;;  %v2229_v50 = vmin.f32 %v2228_v18, %v1243_v41  ;;  %v3726_v51 = vmul.f32 %v1316_v42, %v1316_v42  ;;  %v1245_v54 = vpop.f32.mrb[17].mxu0  ;;  %v1318_v55 = vpop.f32.mrb[17].mxu1 }
 0x2b9   : > { %3129 = vmatprep.subr.bf16.mxu0 %v3128_v38  ;;  %3145 = vmatprep.subr.bf16.mxu1 %v3144_v39  ;;  %v2151_v56 = vmax.f32 %v2150_v26, %v1316_v42  ;;  %v2255_v57 = vmin.f32 %v2254_v28, %v1316_v42  ;;  %v3728_v62 = vmul.f32 %v1245_v54, %v1245_v54  ;;  %v1247_v63 = vpop.f32.mrb[18].mxu0  ;;  %v1320_v2 = vpop.f32.mrb[18].mxu1 }
 0x2ba   : > { %4324 = vst [vmem:[#allocation14_spill] sm:$0xff] %v3724_v47  ;;  %3131 = vmatpush1.bf16.msra.mxu0 %v3130_v24  ;;  %3147 = vmatpush1.bf16.msra.mxu1 %v3146_v25  ;;  %v2138_v3 = vmax.f32 %v2137_v30, %v1245_v54  ;;  %v2242_v4 = vmin.f32 %v2241_v31, %v1245_v54  ;;  %v1249_v8 = vpop.f32.mrb[19].mxu0  ;;  %v1322_v10 = vpop.f32.mrb[19].mxu1 }
 0x2bb   : > { %4325 = vst [vmem:[#allocation15_spill] sm:$0xff] %v3728_v62  ;;  %v3730_v5 = vmul.f32 %v1318_v55, %v1318_v55  ;;  %v2164_v7 = vmax.f32 %v2163_v33, %v1318_v55  ;;  %v2268_v11 = vmin.f32 %v2267_v37, %v1318_v55  ;;  %v3134_v13 = vpack.c.bf16 %v1247_v63, %v1243_v41 }
 0x2bc   : > { %v3732_v14 = vmul.f32 %v1247_v63, %v1247_v63  ;;  %v2126_v17 = vmax.f32 %v2125_v48, %v1247_v63  ;;  %v2230_v20 = vmin.f32 %v2229_v50, %v1247_v63  ;;  %v3150_v21 = vpack.c.bf16 %v1320_v2, %v1316_v42 }
 0x2bd   : > { %v3734_v23 = vmul.f32 %v1320_v2, %v1320_v2  ;;  %v2152_v24 = vmax.f32 %v2151_v56, %v1320_v2  ;;  %v2256_v15 = vmin.f32 %v2255_v57, %v1320_v2  ;;  %v3736_v18 = vmul.f32 %v1249_v8, %v1249_v8 }
 0x2be   : > { %4326 = vst [vmem:[#allocation16_spill] sm:$0xff] %v3732_v14  ;;  %v2139_v25 = vmax.f32 %v2138_v3, %v1249_v8  ;;  %v2243_v26 = vmin.f32 %v2242_v4, %v1249_v8  ;;  %v3738_v28 = vmul.f32 %v1322_v10, %v1322_v10  ;;  %v2165_v30 = vmax.f32 %v2164_v7, %v1322_v10 }
 0x2bf   : > { %4327 = vst [vmem:[#allocation17_spill] sm:$0xff] %v3736_v18  ;;  %v2269_v31 = vmin.f32 %v2268_v11, %v1322_v10  ;;  %v3132_v33 = vpack.c.bf16 %v1249_v8, %v1245_v54  ;;  %v3148_v37 = vpack.c.bf16 %v1322_v10, %v1318_v55  ;;  %v3740_v38 = vpop.f32.mrb[20].mxu0  ;;  %v3742_v39 = vpop.f32.mrb[20].mxu1  ;;  %v3775_v10 = vand.u32 127, %v1481_v27 }
 0x2c0   : > { %v3752_v50 = vmul.f32 %v3740_v38, %v3740_v38  ;;  %v2127_v54 = vmax.f32 %v2126_v17, %v3740_v38  ;;  %v2231_v55 = vmin.f32 %v2230_v20, %v3740_v38  ;;  %v3758_v56 = vmul.f32 %v3742_v39, %v3742_v39  ;;  %v3760_v57 = vpop.f32.mrb[21].mxu0  ;;  %v3762_v63 = vpop.f32.mrb[21].mxu1 }
 0x2c1   : > { %3133 = vmatprep.subr.bf16.mxu0 %v3132_v33  ;;  %3149 = vmatprep.subr.bf16.mxu1 %v3148_v37  ;;  %v2153_v2 = vmax.f32 %v2152_v24, %v3742_v39  ;;  %v2257_v3 = vmin.f32 %v2256_v15, %v3742_v39  ;;  %v3768_v4 = vmul.f32 %v3760_v57, %v3760_v57  ;;  %v3770_v7 = vpop.f32.mrb[22].mxu0  ;;  %v3772_v8 = vpop.f32.mrb[22].mxu1  ;;  %vm1484_vm3 = vcmp.lt.s32.totalorder %v3775_v10, 64 }
 0x2c2   : > { %4328 = vst [vmem:[#allocation18_spill] sm:$0xff] %v3758_v56  ;;  %3135 = vmatpush1.bf16.msra.mxu0 %v3134_v13  ;;  %3151 = vmatpush1.bf16.msra.mxu1 %v3150_v21  ;;  %v2140_v11 = vmax.f32 %v2139_v25, %v3760_v57  ;;  %v2244_v13 = vmin.f32 %v2243_v26, %v3760_v57  ;;  %v3784_v24 = vpop.f32.mrb[23].mxu0  ;;  %v3786_v15 = vpop.f32.mrb[23].mxu1 }
 0x2c3   : > { %v3781_v17 = vmul.f32 %v3762_v63, %v3762_v63  ;;  %v2166_v20 = vmax.f32 %v2165_v30, %v3762_v63  ;;  %v2270_v33 = vmin.f32 %v2269_v31, %v3762_v63  ;;  %v3793_v21 = vmul.f32 %v3770_v7, %v3770_v7 }
 0x2c4   : > { %v2128_v25 = vmax.f32 %v2127_v54, %v3770_v7  ;;  %v2232_v26 = vmin.f32 %v2231_v55, %v3770_v7  ;;  %v3801_v37 = vmul.f32 %v3772_v8, %v3772_v8  ;;  %v2154_v31 = vmax.f32 %v2153_v2, %v3772_v8 }
 0x2c5   : > { %4329 = vst [vmem:[#allocation19_spill] sm:$0xff] %v3793_v21  ;;  %v2258_v42 = vmin.f32 %v2257_v3, %v3772_v8  ;;  %v3807_v45 = vmul.f32 %v3784_v24, %v3784_v24  ;;  %v2141_v54 = vmax.f32 %v2140_v11, %v3784_v24  ;;  %v2245_v41 = vmin.f32 %v2244_v13, %v3784_v24 }
 0x2c6   : > { %4330 = vst [vmem:[#allocation20_spill] sm:$0xff] %v3801_v37  ;;  %v2129_v48 = vrot.slane %v2128_v25, 4  ;;  %v2233_v44 = vrot.slane %v2232_v26, 4  ;;  %v2155_v55 = vrot.slane %v2154_v31, 4  ;;  %v3813_v43 = vmul.f32 %v3786_v15, %v3786_v15 }
 0x2c7   : > { %v2259_v60 = vrot.slane %v2258_v42, 4  ;;  %v2142_v2 = vrot.slane %v2141_v54, 4  ;;  %v2167_v59 = vmax.f32 %v2166_v20, %v3786_v15  ;;  %v3816_v3 = vpop.f32.mrb[24].mxu0  ;;  %v3818_v58 = vpop.f32.mrb[24].mxu1  ;;  %v2246_v11 = vrot.slane %v2245_v41, 4 }
 0x2c8   : > { %v2130_v61 = vmax.f32 %v2128_v25, %v2129_v48  ;;  %v2234_v30 = vmin.f32 %v2232_v26, %v2233_v44  ;;  %v2156_v22 = vmax.f32 %v2154_v31, %v2155_v55  ;;  %v2271_v27 = vmin.f32 %v2270_v33, %v3786_v15  ;;  %v3821_v47 = vpop.f32.mrb[25].mxu0  ;;  %v3823_v13 = vpop.f32.mrb[25].mxu1 }
 0x2c9   : > { %v2260_v62 = vmin.f32 %v2258_v42, %v2259_v60  ;;  %v2143_v48 = vmax.f32 %v2141_v54, %v2142_v2  ;;  %v2168_v25 = vrot.slane %v2167_v59, 4  ;;  %v3825_v18 = vpop.f32.mrb[26].mxu0  ;;  %v3827_v20 = vpop.f32.mrb[26].mxu1  ;;  %v2247_v26 = vmin.f32 %v2245_v41, %v2246_v11 }
 0x2ca   : > { %v2131_v14 = vrot.slane %v2130_v61, 2  ;;  %v2235_v6 = vrot.slane %v2234_v30, 2  ;;  %v2157_v44 = vrot.slane %v2156_v22, 2  ;;  %v2272_v31 = vrot.slane %v2271_v27, 4  ;;  %v3830_v55 = vpop.f32.mrb[27].mxu0  ;;  %v3832_v33 = vpop.f32.mrb[27].mxu1 }
 0x2cb   : > { %v2261_v1 = vrot.slane %v2260_v62, 2  ;;  %v2144_v12 = vrot.slane %v2143_v48, 2  ;;  %v2169_v60 = vmax.f32 %v2167_v59, %v2168_v25  ;;  %v2248_v2 = vrot.slane %v2247_v26, 2 }
 0x2cc   : > { %v2132_v19 = vmax.f32 %v2130_v61, %v2131_v14  ;;  %v2236_v42 = vmin.f32 %v2234_v30, %v2235_v6  ;;  %v2158_v54 = vmax.f32 %v2156_v22, %v2157_v44  ;;  %v2273_v16 = vmin.f32 %v2271_v27, %v2272_v31 }
 0x2cd   : > { %v2262_v9 = vmin.f32 %v2260_v62, %v2261_v1  ;;  %v2145_v29 = vmax.f32 %v2143_v48, %v2144_v12  ;;  %v2170_v34 = vrot.slane %v2169_v60, 2  ;;  %v2249_v41 = vmin.f32 %v2247_v26, %v2248_v2 }
 0x2ce   : > { %v2133_v32 = vrot.slane %v2132_v19, 1  ;;  %v2237_v46 = vrot.slane %v2236_v42, 1  ;;  %v2159_v53 = vrot.slane %v2158_v54, 1  ;;  %v2274_v11 = vrot.slane %v2273_v16, 2 }
 0x2cf   : > { %v2263_v37 = vrot.slane %v2262_v9, 1  ;;  %v2146_v56 = vrot.slane %v2145_v29, 1  ;;  %v2171_v21 = vmax.f32 %v2169_v60, %v2170_v34  ;;  %v3834_v61 = vpop.f32.mrb[28].mxu0  ;;  %v3836_v14 = vpop.f32.mrb[28].mxu1  ;;  %v2250_v6 = vrot.slane %v2249_v41, 1 }
 0x2d0   : > { %v2134_v40 = vmax.f32 %v2132_v19, %v2133_v32  ;;  %v2238_v59 = vmin.f32 %v2236_v42, %v2237_v46  ;;  %v2160_v22 = vmax.f32 %v2158_v54, %v2159_v53  ;;  %v2275_v27 = vmin.f32 %v2273_v16, %v2274_v11  ;;  %v3838_v30 = vpop.f32.mrb[29].mxu0  ;;  %v3840_v1 = vpop.f32.mrb[29].mxu1 }
 0x2d1   : > { %v2264_v12 = vmin.f32 %v2262_v9, %v2263_v37  ;;  %v2147_v62 = vmax.f32 %v2145_v29, %v2146_v56  ;;  %v2172_v48 = vrot.slane %v2171_v21, 1  ;;  %v3136_v19 = vpack.c.bf16 %v3784_v24, %v3760_v57  ;;  %v3844_v32 = vpop.f32.mrb[30].mxu0  ;;  %v3846_v34 = vpop.f32.mrb[30].mxu1 }
 0x2d2   : > { %v2251_v25 = vmin.f32 %v2249_v41, %v2250_v6  ;;  %v2276_v44 = vrot.slane %v2275_v27, 1  ;;  %v3152_v53 = vpack.c.bf16 %v3786_v15, %v3762_v63  ;;  %v3852_v46 = vmul.f32 %v3816_v3, %v3816_v3  ;;  %v3854_v16 = vpop.f32.mrb[31].mxu0  ;;  %v3856_v9 = vpop.f32.mrb[31].mxu1 }
 0x2d3   : > { %v2460_v29 = vcombine.low %v2134_v40, %v2147_v62  ;;  %v2173_v56 = vmax.f32 %v2171_v21, %v2172_v48  ;;  %3137 = vmatprep.subr.bf16.mxu0 %v3136_v19  ;;  %v3860_v57 = vmul.f32 %v3818_v58, %v3818_v58  ;;  %v3864_v24 = vmul.f32 %v3821_v47, %v3821_v47 }
 0x2d4   : > { %v2519_v63 = vcombine.low %v2238_v59, %v2251_v25  ;;  %v2277_v15 = vmin.f32 %v2275_v27, %v2276_v44  ;;  %3153 = vmatprep.subr.bf16.mxu1 %v3152_v53  ;;  %v4331_v37 = vpack.c.bf16 %v3770_v7, %v3740_v38  ;;  %v3871_v40 = vmul.f32 %v3823_v13, %v3823_v13 }
 0x2d5   : > { %v4332_v21 = vmov 0.0   ;;  %v2470_v31 = vrot.slane %v2460_v29, %v3700_v0  ;;  %v2461_v60 = vcombine.low %v2160_v22, %v2173_v56  ;;  %v4333_v42 = vpack.c.bf16 %v3772_v8, %v3742_v39 }
 0x2d6   : > { %3139 = vmatpush1.bf16.msra.mxu0 %v4331_v37  ;;  %v3876_v26 = vsel %vm1484_vm3, 1.0, %v4332_v21  ;;  %v3158_v38 = vpack.c.bf16 %v3825_v18, %v3816_v3  ;;  %v3886_v7 = vmul.f32 %v3825_v18, %v3825_v18  ;;  %v2529_v54 = vrot.slane %v2519_v63, %v3700_v0 }
 0x2d7   : > { %3155 = vmatpush1.bf16.msra.mxu1 %v4333_v42  ;;  %v2520_v2 = vcombine.low %v2264_v12, %v2277_v15  ;;  %v2174_v10 = vmax.f32 %v3816_v3, %v3825_v18  ;;  %v2278_v41 = vmin.f32 %v3816_v3, %v3825_v18  ;;  %v2477_v11 = vrot.slane %v2461_v60, %v3700_v0  ;;  %v3904_v22 = vpop.f32.mrb[32].mxu0  ;;  %v3906_v6 = vpop.f32.mrb[32].mxu1 }
 0x2d8   : > { %v3174_v39 = vpack.c.bf16 %v3827_v20, %v3818_v58  ;;  %v3898_v8 = vmul.f32 %v3827_v20, %v3827_v20  ;;  %v2200_v59 = vmax.f32 %v3818_v58, %v3827_v20  ;;  %v2304_v3 = vmin.f32 %v3818_v58, %v3827_v20  ;;  %v3919_v62 = vpop.f32.mrb[33].mxu0  ;;  %v3921_v48 = vpop.f32.mrb[33].mxu1 }
 0x2d9   : > { %3074 = vmatmul.mubr.msk.f32.vlgmr.msra.gmra.mrb[40].mxu0 %vm630_vm2, %v3876_v26  ;;  %v2536_v18 = vrot.slane %v2520_v2, %v3700_v0  ;;  %v3913_v27 = vmul.f32 %v3830_v55, %v3830_v55  ;;  %v2187_v12 = vmax.f32 %v3821_v47, %v3830_v55  ;;  %v2492_v19 = vcombine.low %v2470_v31, %v2477_v11  ;;  %v3931_v44 = vpop.f32.mrb[34].mxu0  ;;  %v3933_v53 = vpop.f32.mrb[34].mxu1 }
 0x2da   : > { %4334 = vst [vmem:[#allocation21_spill] sm:$0xff] %v3898_v8  ;;  %3075 = vmatmul.mubr.msk.f32.vlgmr.msra.gmra.mrb[40].mxu1 %vm630_vm2, %v3876_v26  ;;  %v2291_v25 = vmin.f32 %v3821_v47, %v3830_v55  ;;  %v3927_v58 = vmul.f32 %v3832_v33, %v3832_v33  ;;  %v2213_v20 = vmax.f32 %v3823_v13, %v3832_v33  ;;  %v3942_v37 = vpop.f32.mrb[35].mxu0  ;;  %v3944_v31 = vpop.f32.mrb[35].mxu1 }
 0x2db   : > { %1696 = vmatprep.mubr.f32.mxu0 %v4332_v21  ;;  %v2551_v29 = vcombine.low %v2529_v54, %v2536_v18  ;;  %v2317_v56 = vmin.f32 %v3823_v13, %v3832_v33  ;;  %v3156_v63 = vpack.c.bf16 %v3830_v55, %v3821_v47  ;;  %v3172_v15 = vpack.c.bf16 %v3832_v33, %v3823_v13 }
 0x2dc   : > { %1767 = vmatprep.mubr.f32.mxu1 %v4332_v21  ;;  %v3948_v60 = vrot.slane %v2492_v19, %v3700_v0  ;;  %v3952_v42 = vmul.f32 %v3834_v61, %v3834_v61  ;;  %v2175_v54 = vmax.f32 %v2174_v10, %v3834_v61  ;;  %v2279_v47 = vmin.f32 %v2278_v41, %v3834_v61 }
 0x2dd   : > { %v3957_v55 = vrot.slane %v2551_v29, %v3700_v0  ;;  %3157 = vmatprep.subr.bf16.mxu0 %v3156_v63  ;;  %3173 = vmatprep.subr.bf16.mxu1 %v3172_v15  ;;  %v3961_v13 = vmul.f32 %v3836_v14, %v3836_v14  ;;  %v2201_v33 = vmax.f32 %v2200_v59, %v3836_v14 }
 0x2de   : > { %4335 = vst [vmem:[#allocation22_spill] sm:$0xff] %v3948_v60  ;;  %4336 = vst [vmem:[#allocation23_spill] sm:$0xff] %v3952_v42  ;;  %3159 = vmatpush1.bf16.msra.mxu0 %v3158_v38  ;;  %3175 = vmatpush1.bf16.msra.mxu1 %v3174_v39  ;;  %v2305_v2 = vmin.f32 %v2304_v3, %v3836_v14  ;;  %v3967_v10 = vmul.f32 %v3838_v30, %v3838_v30 }
 0x2df   : > { %4337 = vst [vmem:[#allocation24_spill] sm:$0xff] %v3957_v55  ;;  %4338 = vst [vmem:[#allocation25_spill] sm:$0xff] %v3961_v13  ;;  %v2188_v41 = vmax.f32 %v2187_v12, %v3838_v30  ;;  %v2292_v11 = vmin.f32 %v2291_v25, %v3838_v30  ;;  %v3973_v18 = vmul.f32 %v3840_v1, %v3840_v1  ;;  %v3985_v25 = vpop.f32.mrb[36].mxu0  ;;  %v3987_v29 = vpop.f32.mrb[36].mxu1 }
 0x2e0   : > { %4339 = vst [vmem:[#allocation26_spill] sm:$0xff] %v3967_v10  ;;  %v2214_v19 = vmax.f32 %v2213_v20, %v3840_v1  ;;  %v2318_v59 = vmin.f32 %v2317_v56, %v3840_v1  ;;  %v3162_v38 = vpack.c.bf16 %v3844_v32, %v3834_v61  ;;  %v3981_v39 = vmul.f32 %v3844_v32, %v3844_v32  ;;  %v3997_v15 = vpop.f32.mrb[37].mxu0 }
 0x2e1   : > { %4340 = vst [vmem:[#allocation27_spill] sm:$0xff] %v3973_v18  ;;  %v2176_v3 = vmax.f32 %v2175_v54, %v3844_v32  ;;  %v2280_v12 = vmin.f32 %v2279_v47, %v3844_v32  ;;  %v3178_v20 = vpack.c.bf16 %v3846_v34, %v3836_v14  ;;  %v3993_v56 = vmul.f32 %v3846_v34, %v3846_v34  ;;  %v3999_v54 = vpop.f32.mrb[37].mxu1  ;;  %v4011_v60 = vpop.f32.mrb[38].mxu0 }
 0x2e2   : > { %4341 = vst [vmem:[#allocation28_spill] sm:$0xff] %v3981_v39  ;;  %v2202_v61 = vmax.f32 %v2201_v33, %v3846_v34  ;;  %v2306_v63 = vmin.f32 %v2305_v2, %v3846_v34  ;;  %v4003_v32 = vmul.f32 %v3854_v16, %v3854_v16  ;;  %v2189_v47 = vmax.f32 %v2188_v41, %v3854_v16  ;;  %v4013_v33 = vpop.f32.mrb[38].mxu1  ;;  %v4021_v13 = vpop.f32.mrb[39].mxu0 }
 0x2e3   : > { %4342 = vst [vmem:[#allocation29_spill] sm:$0xff] %v3993_v56  ;;  %v2293_v14 = vmin.f32 %v2292_v11, %v3854_v16  ;;  %v4009_v55 = vmul.f32 %v3856_v9, %v3856_v9  ;;  %v2215_v34 = vmax.f32 %v2214_v19, %v3856_v9  ;;  %v2319_v2 = vmin.f32 %v2318_v59, %v3856_v9  ;;  %v4023_v11 = vpop.f32.mrb[39].mxu1 }
 0x2e4   : > { %4343 = vst [vmem:[#allocation30_spill] sm:$0xff] %v4003_v32  ;;  %v3160_v56 = vpack.c.bf16 %v3854_v16, %v3838_v30  ;;  %v3176_v41 = vpack.c.bf16 %v3856_v9, %v3840_v1  ;;  %v4027_v21 = vmul.f32 %v3904_v22, %v3904_v22  ;;  %v2177_v39 = vmax.f32 %v2176_v3, %v3904_v22 }
 0x2e5   : > { %4344 = vst [vmem:[#allocation31_spill] sm:$0xff] %v4009_v55  ;;  %v2281_v19 = vmin.f32 %v2280_v12, %v3904_v22  ;;  %v4033_v59 = vmul.f32 %v3906_v6, %v3906_v6  ;;  %v2203_v30 = vmax.f32 %v2202_v61, %v3906_v6  ;;  %v2307_v1 = vmin.f32 %v2306_v63, %v3906_v6 }
 0x2e6   : > { %4345 = vst [vmem:[#allocation32_spill] sm:$0xff] %v4027_v21  ;;  %3161 = vmatprep.subr.bf16.mxu0 %v3160_v56  ;;  %3177 = vmatprep.subr.bf16.mxu1 %v3176_v41  ;;  %v4039_v16 = vmul.f32 %v3919_v62, %v3919_v62  ;;  %v2190_v9 = vmax.f32 %v2189_v47, %v3919_v62 }
 0x2e7   : > { %4346 = vst [vmem:[#allocation33_spill] sm:$0xff] %v4033_v59  ;;  %3163 = vmatpush1.bf16.msra.mxu0 %v3162_v38  ;;  %3179 = vmatpush1.bf16.msra.mxu1 %v3178_v20  ;;  %v2294_v3 = vmin.f32 %v2293_v14, %v3919_v62  ;;  %v4045_v12 = vmul.f32 %v3921_v48, %v3921_v48 }
 0x2e8   : > { %4347 = vst [vmem:[#allocation34_spill] sm:$0xff] %v4039_v16  ;;  %v2216_v56 = vmax.f32 %v2215_v34, %v3921_v48  ;;  %v2320_v61 = vmin.f32 %v2319_v2, %v3921_v48  ;;  %v3166_v63 = vpack.c.bf16 %v3931_v44, %v3904_v22  ;;  %v4053_v41 = vmul.f32 %v3931_v44, %v3931_v44 }
 0x2e9   : > { %4348 = vst [vmem:[#allocation35_spill] sm:$0xff] %v4045_v12  ;;  %v2178_v38 = vmax.f32 %v2177_v39, %v3931_v44  ;;  %v2282_v20 = vmin.f32 %v2281_v19, %v3931_v44  ;;  %v3182_v47 = vpack.c.bf16 %v3933_v53, %v3906_v6  ;;  %v4061_v14 = vmul.f32 %v3933_v53, %v3933_v53 }
 0x2ea   : > { %4349 = vst [vmem:[#allocation36_spill] sm:$0xff] %v4053_v41  ;;  %v2204_v34 = vmax.f32 %v2203_v30, %v3933_v53  ;;  %v2308_v2 = vmin.f32 %v2307_v1, %v3933_v53  ;;  %v4067_v22 = vmul.f32 %v3942_v37, %v3942_v37  ;;  %v2191_v59 = vmax.f32 %v2190_v9, %v3942_v37 }
 0x2eb   : > { %4350 = vst [vmem:[#allocation37_spill] sm:$0xff] %v4061_v14  ;;  %v2295_v39 = vmin.f32 %v2294_v3, %v3942_v37  ;;  %v4073_v44 = vmul.f32 %v3944_v31, %v3944_v31  ;;  %v2217_v6 = vmax.f32 %v2216_v56, %v3944_v31  ;;  %v2321_v19 = vmin.f32 %v2320_v61, %v3944_v31 }
 0x2ec   : > { %4351 = vst [vmem:[#allocation38_spill] sm:$0xff] %v4067_v22  ;;  %v3164_v30 = vpack.c.bf16 %v3942_v37, %v3919_v62  ;;  %v3180_v53 = vpack.c.bf16 %v3944_v31, %v3921_v48  ;;  %v4083_v1 = vmul.f32 %v3985_v25, %v3985_v25  ;;  %v2179_v9 = vmax.f32 %v2178_v38, %v3985_v25 }
 0x2ed   : > { %4352 = vst [vmem:[#allocation39_spill] sm:$0xff] %v4073_v44  ;;  %v2283_v3 = vmin.f32 %v2282_v20, %v3985_v25  ;;  %v4089_v14 = vmul.f32 %v3987_v29, %v3987_v29  ;;  %v2205_v56 = vmax.f32 %v2204_v34, %v3987_v29  ;;  %v2309_v61 = vmin.f32 %v2308_v2, %v3987_v29 }
 0x2ee   : > { %4353 = vst [vmem:[#allocation40_spill] sm:$0xff] %v4083_v1  ;;  %3165 = vmatprep.subr.bf16.mxu0 %v3164_v30  ;;  %3181 = vmatprep.subr.bf16.mxu1 %v3180_v53  ;;  %v4095_v62 = vmul.f32 %v3997_v15, %v3997_v15  ;;  %v2192_v48 = vmax.f32 %v2191_v59, %v3997_v15 }
 0x2ef   : > { %4354 = vst [vmem:[#allocation41_spill] sm:$0xff] %v4089_v14  ;;  %v2296_v37 = vmin.f32 %v2295_v39, %v3997_v15  ;;  %3167 = vmatpush1.bf16.msra.mxu0 %v3166_v63  ;;  %3183 = vmatpush1.bf16.msra.mxu1 %v3182_v47  ;;  %v4101_v31 = vmul.f32 %v3999_v54, %v3999_v54 }
 0x2f0   : > { %4355 = vst [vmem:[#allocation42_spill] sm:$0xff] %v4095_v62  ;;  %v2218_v38 = vmax.f32 %v2217_v6, %v3999_v54  ;;  %v2322_v20 = vmin.f32 %v2321_v19, %v3999_v54  ;;  %v4109_v2 = vmul.f32 %v4011_v60, %v4011_v60  ;;  %v2180_v59 = vmax.f32 %v2179_v9, %v4011_v60 }
 0x2f1   : > { %4356 = vst [vmem:[#allocation43_spill] sm:$0xff] %v4101_v31  ;;  %v2284_v63 = vmin.f32 %v2283_v3, %v4011_v60  ;;  %v4117_v39 = vmul.f32 %v4013_v33, %v4013_v33  ;;  %v2206_v6 = vmax.f32 %v2205_v56, %v4013_v33  ;;  %v2310_v19 = vmin.f32 %v2309_v61, %v4013_v33 }
 0x2f2   : > { %4357 = vst [vmem:[#allocation44_spill] sm:$0xff] %v4109_v2  ;;  %v2181_v30 = vrot.slane %v2180_v59, 4  ;;  %v4123_v34 = vmul.f32 %v4021_v13, %v4021_v13  ;;  %v2193_v9 = vmax.f32 %v2192_v48, %v4021_v13  ;;  %v2297_v47 = vmin.f32 %v2296_v37, %v4021_v13 }
 0x2f3   : > { %4358 = vst [vmem:[#allocation45_spill] sm:$0xff] %v4117_v39  ;;  %v2285_v53 = vrot.slane %v2284_v63, 4  ;;  %v2207_v3 = vrot.slane %v2206_v6, 4  ;;  %v2311_v14 = vrot.slane %v2310_v19, 4  ;;  %v4129_v2 = vmul.f32 %v4023_v11, %v4023_v11 }
 0x2f4   : > { %4359 = vst [vmem:[#allocation46_spill] sm:$0xff] %v4123_v34  ;;  %v2182_v39 = vmax.f32 %v2180_v59, %v2181_v30  ;;  %v2194_v1 = vrot.slane %v2193_v9, 4  ;;  %v2219_v61 = vmax.f32 %v2218_v38, %v4023_v11  ;;  %v2298_v41 = vrot.slane %v2297_v47, 4 }
 0x2f5   : > { %4360 = vst [vmem:[#allocation47_spill] sm:$0xff] %v4129_v2  ;;  %v2286_v56 = vmin.f32 %v2284_v63, %v2285_v53  ;;  %v2208_v31 = vmax.f32 %v2206_v6, %v2207_v3  ;;  %v2312_v62 = vmin.f32 %v2310_v19, %v2311_v14  ;;  %v2323_v34 = vmin.f32 %v2322_v20, %v4023_v11 }
 0x2f6   : > { %v2183_v21 = vrot.slane %v2182_v39, 2  ;;  %v2195_v44 = vmax.f32 %v2193_v9, %v2194_v1  ;;  %v2220_v12 = vrot.slane %v2219_v61, 4  ;;  %v2299_v16 = vmin.f32 %v2297_v47, %v2298_v41 }
 0x2f7   : > { %v2287_v48 = vrot.slane %v2286_v56, 2  ;;  %v2209_v22 = vrot.slane %v2208_v31, 2  ;;  %v2313_v37 = vrot.slane %v2312_v62, 2  ;;  %v2324_v42 = vrot.slane %v2323_v34, 4 }
 0x2f8   : > { %v2184_v55 = vmax.f32 %v2182_v39, %v2183_v21  ;;  %v2196_v59 = vrot.slane %v2195_v44, 2  ;;  %v2221_v63 = vmax.f32 %v2219_v61, %v2220_v12  ;;  %v2300_v38 = vrot.slane %v2299_v16, 2 }
 0x2f9   : > { %v2288_v2 = vmin.f32 %v2286_v56, %v2287_v48  ;;  %v2210_v30 = vmax.f32 %v2208_v31, %v2209_v22  ;;  %v2314_v53 = vmin.f32 %v2312_v62, %v2313_v37  ;;  %v2325_v6 = vmin.f32 %v2323_v34, %v2324_v42  ;;  %v4374_v37 = vld [vmem:[#allocation21_spill] sm:$0xff] }
 0x2fa   : > { %v2185_v14 = vrot.slane %v2184_v55, 1  ;;  %v2197_v3 = vmax.f32 %v2195_v44, %v2196_v59  ;;  %v2222_v20 = vrot.slane %v2221_v63, 2  ;;  %v2301_v1 = vmin.f32 %v2299_v16, %v2300_v38  ;;  %v4378_v38 = vld [vmem:[#allocation8_spill] sm:$0xff] }
 0x2fb   : > { %v2289_v19 = vrot.slane %v2288_v2, 1  ;;  %v2211_v18 = vrot.slane %v2210_v30, 1  ;;  %v2315_v32 = vrot.slane %v2314_v53, 1  ;;  %v2326_v9 = vrot.slane %v2325_v6, 2 }
 0x2fc   : > { %v2186_v10 = vmax.f32 %v2184_v55, %v2185_v14  ;;  %v2198_v41 = vrot.slane %v2197_v3, 1  ;;  %v2223_v47 = vmax.f32 %v2221_v63, %v2222_v20  ;;  %v2302_v56 = vrot.slane %v2301_v1, 1  ;;  %v4375_v63 = vld [vmem:[#allocation26_spill] sm:$0xff] }
 0x2fd   : > { %v2290_v8 = vmin.f32 %v2288_v2, %v2289_v19  ;;  %v2212_v21 = vmax.f32 %v2210_v30, %v2211_v18  ;;  %v2316_v39 = vmin.f32 %v2314_v53, %v2315_v32  ;;  %v2327_v12 = vmin.f32 %v2325_v6, %v2326_v9  ;;  %v4376_v30 = vld [vmem:[#allocation30_spill] sm:$0xff]  ;;  %v4381_v6 = vld [vmem:[#allocation9_spill] sm:$0xff]  ;;  %v4383_v19 = vld [vmem:[#allocation27_spill] sm:$0xff] }
 0x2fe   : > { %v2199_v22 = vmax.f32 %v2197_v3, %v2198_v41  ;;  %v2224_v62 = vrot.slane %v2223_v47, 1  ;;  %v3168_v42 = vpack.c.bf16 %v4021_v13, %v3997_v15  ;;  %v3184_v44 = vpack.c.bf16 %v4023_v11, %v3999_v54  ;;  %v4372_v11 = vld [vmem:[#allocation3_spill] sm:$0xff]  ;;  %v4386_v9 = vld [vmem:[#allocation28_spill] sm:$0xff] }
 0x2ff   : > { %v2303_v31 = vmin.f32 %v2301_v1, %v2302_v56  ;;  %v2328_v34 = vrot.slane %v2327_v12, 1  ;;  %v3212_v55 = vpack.c.bf16 %v3738_v28, %v3730_v5  ;;  %v3214_v16 = vpack.c.bf16 %v3734_v23, %v3726_v51  ;;  %v4384_v3 = vld [vmem:[#allocation31_spill] sm:$0xff] }
 0x300   : > { %v2462_v18 = vcombine.low %v2186_v10, %v2199_v22  ;;  %v2225_v32 = vmax.f32 %v2223_v47, %v2224_v62  ;;  %3169 = vmatprep.subr.bf16.mxu0 %v3168_v42  ;;  %3185 = vmatprep.subr.bf16.mxu1 %v3184_v44  ;;  %v3200_v2 = vpack.c.bf16 %v3807_v45, %v3768_v4  ;;  %v4365_v4 = vld [vmem:[#allocation19_spill] sm:$0xff]  ;;  %v4387_v47 = vmov 0.0   ;;  %v4391_v22 = vld [vmem:[#allocation38_spill] sm:$0xff] }
 0x301   : > { %v2521_v61 = vcombine.low %v2290_v8, %v2303_v31  ;;  %v2329_v13 = vmin.f32 %v2327_v12, %v2328_v34  ;;  %v4361_v15 = vpack.c.bf16 %v4011_v60, %v3985_v25  ;;  %v4362_v54 = vpack.c.bf16 %v4013_v33, %v3987_v29  ;;  %v4366_v25 = vld [vmem:[#allocation18_spill] sm:$0xff]  ;;  %v4367_v29 = vld [vmem:[#allocation20_spill] sm:$0xff]  ;;  %v4385_v1 = vld [vmem:[#allocation23_spill] sm:$0xff] }
 0x302   : > { %v3216_v51 = vpack.c.bf16 %v3813_v43, %v3781_v17  ;;  %v2484_v5 = vrot.slane %v2462_v18, %v3700_v0  ;;  %v2463_v23 = vcombine.low %v2212_v21, %v2225_v32  ;;  %v4363_v28 = vpack.c.bf16 %v3688_v49, %v3680_v35  ;;  %v4369_v33 = vld [vmem:[#allocation2_spill] sm:$0xff]  ;;  %v4388_v21 = vld [vmem:[#allocation25_spill] sm:$0xff]  ;;  %v4392_v44 = vld [vmem:[#allocation35_spill] sm:$0xff] }
 0x303   : > { %3171 = vmatpush1.bf16.msra.mxu0 %v4361_v15  ;;  %3187 = vmatpush1.bf16.msra.mxu1 %v4362_v54  ;;  %v4364_v45 = vpack.c.bf16 %v3690_v52, %v3682_v36  ;;  %v3202_v8 = vpack.c.bf16 %v4365_v4, %v3752_v50  ;;  %v2543_v60 = vrot.slane %v2521_v61, %v3700_v0  ;;  %v4368_v50 = vld [vmem:[#allocation4_spill] sm:$0xff]  ;;  %v4390_v12 = vld [vmem:[#allocation34_spill] sm:$0xff]  ;;  %v4393_v31 = vld [vmem:[#allocation39_spill] sm:$0xff] }
 0x304   : > { %3189 = vmatprep.subr.bf16.mxu0 %v4363_v28  ;;  %v2522_v10 = vcombine.low %v2316_v39, %v2329_v13  ;;  %v3218_v43 = vpack.c.bf16 %v4367_v29, %v4366_v25  ;;  %v3220_v17 = vpack.c.bf16 %v3913_v27, %v3864_v24  ;;  %v2491_v35 = vrot.slane %v2463_v23, %v3700_v0  ;;  %v4371_v27 = vld [vmem:[#allocation5_spill] sm:$0xff]  ;;  %v4394_v18 = vld [vmem:[#allocation32_spill] sm:$0xff]  ;;  %v4398_v23 = vld [vmem:[#allocation10_spill] sm:$0xff] }
 0x305   : > { %3205 = vmatprep.subr.bf16.mxu1 %v4364_v45  ;;  %v3236_v36 = vpack.c.bf16 %v3927_v58, %v3871_v40  ;;  %v3222_v49 = vpack.c.bf16 %v3886_v7, %v3852_v46  ;;  %v4370_v24 = vpack.c.bf16 %v4368_v50, %v4369_v33  ;;  %v4373_v48 = vpack.c.bf16 %v4371_v27, %v4372_v11  ;;  %v4377_v58 = vld [vmem:[#allocation12_spill] sm:$0xff]  ;;  %v4380_v7 = vld [vmem:[#allocation13_spill] sm:$0xff]  ;;  %v4399_v28 = vld [vmem:[#allocation6_spill] sm:$0xff] }
 0x306   : > { %3076 = vmatmul.mubr.msk.f32.vlgmr.msra.gmra.mrb[42].mxu0 %vm630_vm2, %v3876_v26  ;;  %3077 = vmatmul.mubr.msk.f32.vlgmr.msra.gmra.mrb[42].mxu1 %vm630_vm2, %v3876_v26  ;;  %v2550_v52 = vrot.slane %v2522_v10, %v3700_v0  ;;  %v3238_v59 = vpack.c.bf16 %v4374_v37, %v3860_v57  ;;  %v3224_v53 = vpack.c.bf16 %v4376_v30, %v4375_v63  ;;  %v4389_v39 = vld [vmem:[#allocation29_spill] sm:$0xff]  ;;  %v4395_v32 = vld [vmem:[#allocation36_spill] sm:$0xff]  ;;  %v4401_v4 = vld [vmem:[#allocation11_spill] sm:$0xff] }
 0x307   : > { %3191 = vmatpush1.bf16.msra.mxu0 %v4370_v24  ;;  %3207 = vmatpush1.bf16.msra.mxu1 %v4373_v48  ;;  %v2493_v40 = vcombine.low %v2484_v5, %v2491_v35  ;;  %v4379_v46 = vpack.c.bf16 %v4377_v58, %v4378_v38  ;;  %v4382_v14 = vpack.c.bf16 %v4380_v7, %v4381_v6  ;;  %v4396_v13 = vld [vmem:[#allocation33_spill] sm:$0xff]  ;;  %v4404_v25 = vld [vmem:[#allocation42_spill] sm:$0xff]  ;;  %v4407_v50 = vld [vmem:[#allocation47_spill] sm:$0xff] }
 0x308   : > { %v3240_v20 = vpack.c.bf16 %v4384_v3, %v4383_v19  ;;  %v3226_v41 = vpack.c.bf16 %v4386_v9, %v4385_v1  ;;  %v2552_v57 = vcombine.low %v2543_v60, %v2550_v52  ;;  %1902 = vmatprep.mubr.f32.mxu0 %v4387_v47  ;;  %1973 = vmatprep.mubr.f32.mxu1 %v4387_v47  ;;  %v4397_v15 = vld [vmem:[#allocation37_spill] sm:$0xff]  ;;  %v4402_v60 = vld [vmem:[#allocation7_spill] sm:$0xff]  ;;  %v4405_v29 = vld [vmem:[#allocation46_spill] sm:$0xff] }
 0x309   : > { %3193 = vmatprep.subr.bf16.mxu0 %v4379_v46  ;;  %3209 = vmatprep.subr.bf16.mxu1 %v4382_v14  ;;  %v3242_v56 = vpack.c.bf16 %v4389_v39, %v4388_v21  ;;  %v3228_v62 = vpack.c.bf16 %v4391_v22, %v4390_v12  ;;  %v2507_v42 = vrot.slane %v2493_v40, %v3700_v0  ;;  %v4406_v52 = vld [vmem:[#allocation43_spill] sm:$0xff]  ;;  %v4408_v24 = vld [vmem:[#allocation22_spill] sm:$0xff]  ;;  %v4409_v11 = vld [vmem:[#allocation17_spill] sm:$0xff] }
 0x30a   : > { %v3244_v34 = vpack.c.bf16 %v4393_v31, %v4392_v44  ;;  %v3230_v61 = vpack.c.bf16 %v4395_v32, %v4394_v18  ;;  %v3246_v54 = vpack.c.bf16 %v4397_v15, %v4396_v13  ;;  %v2566_v5 = vrot.slane %v2552_v57, %v3700_v0  ;;  %v4410_v48 = vld [vmem:[#allocation15_spill] sm:$0xff]  ;;  %v4412_v63 = vld [vmem:[#allocation40_spill] sm:$0xff]  ;;  %v4414_v58 = vld [vmem:[#allocation41_spill] sm:$0xff] }
 0x30b   : > { %v4400_v45 = vpack.c.bf16 %v4398_v23, %v4399_v28  ;;  %v4403_v10 = vpack.c.bf16 %v4401_v4, %v4402_v60  ;;  %v3232_v35 = vpack.c.bf16 %v4405_v29, %v4404_v25  ;;  %v3248_v33 = vpack.c.bf16 %v4407_v50, %v4406_v52  ;;  %v4413_v30 = vld [vmem:[#allocation44_spill] sm:$0xff]  ;;  %v4415_v38 = vld [vmem:[#allocation45_spill] sm:$0xff]  ;;  %v4418_v19 = vld [vmem:[#allocation14_spill] sm:$0xff] }
 0x30c   : > { %v2508_v27 = vcombine.low %v4408_v24, %v2507_v42  ;;  %v4411_v37 = vpack.c.bf16 %v4409_v11, %v4410_v48  ;;  %v3234_v40 = vpack.c.bf16 %v4413_v30, %v4412_v63  ;;  %v3250_v46 = vpack.c.bf16 %v4415_v38, %v4414_v58  ;;  %v4416_v7 = vld [vmem:[#allocation24_spill] sm:$0xff] }
 0x30d   : > { %3195 = vmatpush1.bf16.msra.mxu0 %v4400_v45  ;;  %3211 = vmatpush1.bf16.msra.mxu1 %v4403_v10  ;;  %v2567_v6 = vcombine.low %v4416_v7, %v2566_v5  ;;  %v4417_v14 = vld [vmem:[#allocation16_spill] sm:$0xff] }
 0x30e   : > { %3197 = vmatprep.subr.bf16.mxu0 %v4411_v37  ;;  %3213 = vmatprep.subr.bf16.mxu1 %v3212_v55  ;;  %2510 = vst [vmem:[%s439_s23] sm:$0xff] %v2508_v27  ;;  %v4419_v3 = vpack.c.bf16 %v4417_v14, %v4418_v19 }
 0x30f   : > { %2569 = vst [vmem:[%s443_s26] sm:$0xff] %v2567_v6 }
 0x311   : > { %3199 = vmatpush1.bf16.msra.mxu0 %v4419_v3  ;;  %3215 = vmatpush1.bf16.msra.mxu1 %v3214_v16 }
 0x312   : > { %3201 = vmatprep.subr.bf16.mxu0 %v3200_v2  ;;  %3217 = vmatprep.subr.bf16.mxu1 %v3216_v51 }
 0x315   : > { %3203 = vmatpush1.bf16.msra.mxu0 %v3202_v8  ;;  %3219 = vmatpush1.bf16.msra.mxu1 %v3218_v43 }
 0x316   : > { %3221 = vmatprep.subr.bf16.mxu0 %v3220_v17  ;;  %3237 = vmatprep.subr.bf16.mxu1 %v3236_v36 }
 0x318   : > { %3078 = vmatmul.mubr.msk.f32.vlgmr.msra.gmra.mrb[44].mxu0 %vm630_vm2, %v3876_v26  ;;  %3079 = vmatmul.mubr.msk.f32.vlgmr.msra.gmra.mrb[44].mxu1 %vm630_vm2, %v3876_v26 }
 0x319   : > { %3223 = vmatpush1.bf16.msra.mxu0 %v3222_v49  ;;  %3239 = vmatpush1.bf16.msra.mxu1 %v3238_v59 }
 0x31a   : > { %3225 = vmatprep.subr.bf16.mxu0 %v3224_v53  ;;  %3241 = vmatprep.subr.bf16.mxu1 %v3240_v20 }
 0x31b   : > { %2044 = vmatprep.mubr.f32.mxu0 %v4387_v47  ;;  %2115 = vmatprep.mubr.f32.mxu1 %v4387_v47 }
 0x31d   : > { %3227 = vmatpush1.bf16.msra.mxu0 %v3226_v41  ;;  %3243 = vmatpush1.bf16.msra.mxu1 %v3242_v56 }
 0x31e   : > { %3229 = vmatprep.subr.bf16.mxu0 %v3228_v62  ;;  %3245 = vmatprep.subr.bf16.mxu1 %v3244_v34 }
 0x321   : > { %3231 = vmatpush1.bf16.msra.mxu0 %v3230_v61  ;;  %3247 = vmatpush1.bf16.msra.mxu1 %v3246_v54 }
 0x322   : > { %3233 = vmatprep.subr.bf16.mxu0 %v3232_v35  ;;  %3249 = vmatprep.subr.bf16.mxu1 %v3248_v33 }
 0x325   : > { %3235 = vmatpush1.bf16.msra.mxu0 %v3234_v40  ;;  %3251 = vmatpush1.bf16.msra.mxu1 %v3250_v46 }
 0x328   : > { %3080 = vmatmul.mubr.msk.f32.vlgmr.msra.gmra.mrb[46].mxu0 %vm630_vm2, %v3876_v26  ;;  %3081 = vmatmul.mubr.msk.f32.vlgmr.msra.gmra.mrb[46].mxu1 %vm630_vm2, %v3876_v26 }
 0x3ac   : > { %v1556_v55 = vpop.f32.mrb[40].mxu0 }
 0x3ad   : > { %v1627_v16 = vpop.f32.mrb[40].mxu1  ;;  %v1558_v2 = vpop.f32.mrb[41].mxu0 }
 0x3ae   : > { %v2342_v51 = vcombine.low %v1556_v55, %v1558_v2  ;;  %v1629_v8 = vpop.f32.mrb[41].mxu1 }
 0x3af   : > { %v2343_v43 = vcombine.low %v1627_v16, %v1629_v8 }
 0x3b0   : > { %v2352_v17 = vrot.slane %v2342_v51, %v3700_v0 }
 0x3b1   : > { %v2359_v36 = vrot.slane %v2343_v43, %v3700_v0 }
 0x3b3   : > { %v2374_v49 = vcombine.low %v2352_v17, %v2359_v36 }
 0x3b5   : > { %v2382_v21 = vrot.slane %v2374_v49, %v3700_v0 }
 0x3d9   : > { %v1698_v59 = vpop.f32.mrb[42].mxu0  ;;  %v1769_v53 = vpop.f32.mrb[42].mxu1 }
 0x3da   : > { %v1700_v20 = vpop.f32.mrb[43].mxu0  ;;  %v1771_v1 = vpop.f32.mrb[43].mxu1 }
 0x3db   : > { %v2344_v9 = vcombine.low %v1698_v59, %v1700_v20  ;;  %v2345_v41 = vcombine.low %v1769_v53, %v1771_v1 }
 0x3dd   : > { %v2366_v26 = vrot.slane %v2344_v9, %v3700_v0  ;;  %v2373_v57 = vrot.slane %v2345_v41, %v3700_v0 }
 0x3df   : > { %v2375_v47 = vcombine.low %v2366_v26, %v2373_v57 }
 0x3e1   : > { %v2389_v39 = vrot.slane %v2375_v47, %v3700_v0 }
 0x3e3   : > { %v2390_v56 = vcombine.low %v2382_v21, %v2389_v39 }
 0x3e5   : > { %2392 = vst [vmem:[%s431_s29] sm:$0xff] %v2390_v56 }
 0x3eb   : > { %v1904_v12 = vpop.f32.mrb[44].mxu0  ;;  %v1975_v22 = vpop.f32.mrb[44].mxu1 }
 0x3ec   : > { %v1906_v62 = vpop.f32.mrb[45].mxu0  ;;  %v1977_v42 = vpop.f32.mrb[45].mxu1 }
 0x3ed   : > { %v2401_v44 = vcombine.low %v1904_v12, %v1906_v62  ;;  %v2402_v31 = vcombine.low %v1975_v22, %v1977_v42 }
 0x3ef   : > { %v2411_v34 = vrot.slane %v2401_v44, %v3700_v0  ;;  %v2418_v18 = vrot.slane %v2402_v31, %v3700_v0 }
 0x3f1   : > { %v2433_v32 = vcombine.low %v2411_v34, %v2418_v18 }
 0x3f3   : > { %v2441_v60 = vrot.slane %v2433_v32, %v3700_v0 }
 0x3fb   : > { %v2046_v61 = vpop.f32.mrb[46].mxu0  ;;  %v2117_v13 = vpop.f32.mrb[46].mxu1 }
 0x3fc   : > { %v2048_v15 = vpop.f32.mrb[47].mxu0  ;;  %v2119_v54 = vpop.f32.mrb[47].mxu1 }
 0x3fd   : > { %v2403_v5 = vcombine.low %v2046_v61, %v2048_v15  ;;  %v2404_v23 = vcombine.low %v2117_v13, %v2119_v54 }
 0x3ff   : > { %v2425_v28 = vrot.slane %v2403_v5, %v3700_v0  ;;  %v2432_v45 = vrot.slane %v2404_v23, %v3700_v0 }
 0x401   : > { %v2434_v4 = vcombine.low %v2425_v28, %v2432_v45 }
 0x403   : > { %v2448_v10 = vrot.slane %v2434_v4, %v3700_v0 }
 0x405   : > { %v2449_v25 = vcombine.low %v2441_v60, %v2448_v10 }
 0x407   : > { %2451 = vst [vmem:[%s435_s13] sm:$0xff] %v2449_v25 }
 0x408 PF: > { %s22_s19 = sadd.s32 1, %s3310_s19   ;;  %s4420_s17 = smov %s3306_s18 }
 0x409   : > { %p19_p5 = scmp.ge.s32.totalorder %s22_s19, 4   ;;  %s4421_s18 = smov %s4423_s20 }
 0x40b   :  { %21 = sbr.rel (!%p19_p5) target bundleno = 2 (0x2), region = 126 }

// kernel: stn3d_forward.7
= control target key start
LH: loop header
LB: loop body
LE: loop exit
PB: predicated region body
PF: predicated region fallthrough
CT: control target
= control target key end

     0   :  { %v45_v37 = vlaneseq  ;;  %v3859_v38 = vmov 1983009808   ;;  %vm2129_vm0 = vcmask 1041408   ;;  %vm2940_vm2 = vcmask 66560   ;;  %s5179_s4 = inlined_call_operand.vmem [shape: bf16[1024,512], index: 4, kind: input, shape index: {}]   ;;  %s5180_s2 = inlined_call_operand.vmem [shape: f32[1,1024], index: 2, kind: input, shape index: {}]   ;;  %s5181_s0 = inlined_call_operand.vmem [shape: f32[2,1024], index: 0, kind: input, shape index: {}]   ;;  %s5182_s1 = inlined_call_operand.vmem [shape: f32[2,1024], index: 1, kind: input, shape index: {}]   ;;  %s5183_s3 = inlined_call_operand.vmem [shape: f32[1,1024], index: 3, kind: input, shape index: {}]   ;;  %s5184_s7 = inlined_call_operand.vmem [shape: bf16[512,256], index: 7, kind: input, shape index: {}]   ;;  %s5185_s5 = inlined_call_operand.vmem [shape: f32[1,512], index: 5, kind: input, shape index: {}]   ;;  %s5186_s6 = inlined_call_operand.vmem [shape: f32[1,512], index: 6, kind: input, shape index: {}]   ;;  %s5187_s10 = inlined_call_operand.vmem [shape: f32[256,9], index: 10, kind: input, shape index: {}]   ;;  %s5188_s8 = inlined_call_operand.vmem [shape: f32[1,256], index: 8, kind: input, shape index: {}]   ;;  %s5189_s9 = inlined_call_operand.vmem [shape: f32[1,256], index: 9, kind: input, shape index: {}]   ;;  %s5190_s11 = inlined_call_operand.vmem [shape: f32[1,9], index: 11, kind: input, shape index: {}]   ;;  %s5191_s12 = inlined_call_operand.vmem [shape: f32[2,9], index: 12, kind: output, shape index: {}]  }
   0x1   :  { %v3363_v0 = vld [vmem:[%s5179_s4 + $0x4] ss:$16 sps:$4 sm:$0xff]   ;;  %v3367_v2 = vld [vmem:[%s5179_s4] ss:$16 sps:$4 sm:$0xff]   ;;  %v89_v39 = vunpack.c.l.s4 %v3859_v38  ;;  %v4099_v60 = vld [vmem:[%s5181_s0 + $0x8] sm:$0xff] }
   0x2   :  { %v3365_v1 = vld [vmem:[%s5179_s4 + $0x204] ss:$16 sps:$4 sm:$0xff]   ;;  %1801 = vmatprep.subr.bf16.mxu1 %v3363_v0  ;;  %v3368_v3 = vld [vmem:[%s5179_s4 + $0x200] ss:$16 sps:$4 sm:$0xff]   ;;  %v4050_v44 = vshrl.u32 %v45_v37, 7 }
   0x3   :  { %1842 = vmatprep.subr.bf16.mxu0 %v3365_v1  ;;  %v3369_v4 = vld [vmem:[%s5179_s4 + $0x24] ss:$16 sps:$4 sm:$0xff]   ;;  %1802 = vmatpush1.bf16.msra.mxu1 %v3367_v2  ;;  %v3373_v6 = vld [vmem:[%s5179_s4 + $0x20] ss:$16 sps:$4 sm:$0xff]   ;;  %v90_v45 = vunpack.c.0.s8 %v89_v39 }
   0x4   :  { %1843 = vmatpush1.bf16.msra.mxu0 %v3368_v3  ;;  %v3371_v5 = vld [vmem:[%s5179_s4 + $0x224] ss:$16 sps:$4 sm:$0xff]   ;;  %1803 = vmatprep.subr.bf16.mxu1 %v3369_v4  ;;  %v3374_v7 = vld [vmem:[%s5179_s4 + $0x220] ss:$16 sps:$4 sm:$0xff]   ;;  %v4056_v47 = vsub.s32 1, %v4050_v44  ;;  %v4059_v48 = vsub.s32 0, %v4050_v44  ;;  %v104_v3 = vcombine.high %v4099_v60, %v4099_v60 }
   0x5   :  { %1844 = vmatprep.subr.bf16.mxu0 %v3371_v5  ;;  %v3375_v8 = vld [vmem:[%s5179_s4 + $0x44] ss:$16 sps:$4 sm:$0xff]   ;;  %v3379_v10 = vld [vmem:[%s5179_s4 + $0x40] ss:$16 sps:$4 sm:$0xff]   ;;  %v4068_v51 = vsub.s32 3, %v4050_v44  ;;  %v4071_v52 = vsub.s32 2, %v4050_v44  ;;  %v4077_v54 = vsub.s32 %v90_v45, %v4050_v44 }
   0x6   :  { %v3377_v9 = vld [vmem:[%s5179_s4 + $0x244] ss:$16 sps:$4 sm:$0xff]   ;;  %v3380_v11 = vld [vmem:[%s5179_s4 + $0x240] ss:$16 sps:$4 sm:$0xff]   ;;  %v4118_v4 = vld [vmem:[%s5182_s1 + $0x8] sm:$0xff] }
   0x7   :  { %1804 = vmatpush1.bf16.msra.mxu1 %v3373_v6  ;;  %v3381_v12 = vld [vmem:[%s5179_s4 + $0x64] ss:$16 sps:$4 sm:$0xff]   ;;  %v3385_v14 = vld [vmem:[%s5179_s4 + $0x60] ss:$16 sps:$4 sm:$0xff]  }
   0x8   :  { %1845 = vmatpush1.bf16.msra.mxu0 %v3374_v7  ;;  %1805 = vmatprep.subr.bf16.mxu1 %v3375_v8  ;;  %v3383_v13 = vld [vmem:[%s5179_s4 + $0x264] ss:$16 sps:$4 sm:$0xff]   ;;  %v3386_v15 = vld [vmem:[%s5179_s4 + $0x260] ss:$16 sps:$4 sm:$0xff]  }
   0x9   :  { %1846 = vmatprep.subr.bf16.mxu0 %v3377_v9  ;;  %v3387_v16 = vld [vmem:[%s5179_s4 + $0x84] ss:$16 sps:$4 sm:$0xff]   ;;  %v3391_v18 = vld [vmem:[%s5179_s4 + $0x80] ss:$16 sps:$4 sm:$0xff]   ;;  %v158_v9 = vcombine.high %v4118_v4, %v4118_v4 }
   0xa   :  { %v3389_v17 = vld [vmem:[%s5179_s4 + $0x284] ss:$16 sps:$4 sm:$0xff]   ;;  %v3392_v19 = vld [vmem:[%s5179_s4 + $0x280] ss:$16 sps:$4 sm:$0xff]  }
   0xb   :  { %1806 = vmatpush1.bf16.msra.mxu1 %v3379_v10  ;;  %v3393_v20 = vld [vmem:[%s5179_s4 + $0xa4] ss:$16 sps:$4 sm:$0xff]   ;;  %v3397_v22 = vld [vmem:[%s5179_s4 + $0xa0] ss:$16 sps:$4 sm:$0xff]  }
   0xc   :  { %1847 = vmatpush1.bf16.msra.mxu0 %v3380_v11  ;;  %1807 = vmatprep.subr.bf16.mxu1 %v3381_v12  ;;  %v3395_v21 = vld [vmem:[%s5179_s4 + $0x2a4] ss:$16 sps:$4 sm:$0xff]   ;;  %v3398_v23 = vld [vmem:[%s5179_s4 + $0x2a0] ss:$16 sps:$4 sm:$0xff]   ;;  %v67_v12 = vsub.s32 5, %v4050_v44 }
   0xd   :  { %1848 = vmatprep.subr.bf16.mxu0 %v3383_v13  ;;  %v3399_v24 = vld [vmem:[%s5179_s4 + $0xc4] ss:$16 sps:$4 sm:$0xff]   ;;  %v3403_v26 = vld [vmem:[%s5179_s4 + $0xc0] ss:$16 sps:$4 sm:$0xff]  }
   0xe   :  { %v3401_v25 = vld [vmem:[%s5179_s4 + $0x2c4] ss:$16 sps:$4 sm:$0xff]   ;;  %v3404_v27 = vld [vmem:[%s5179_s4 + $0x2c0] ss:$16 sps:$4 sm:$0xff]  }
   0xf   :  { %1808 = vmatpush1.bf16.msra.mxu1 %v3385_v14  ;;  %v3405_v28 = vld [vmem:[%s5179_s4 + $0xe4] ss:$16 sps:$4 sm:$0xff]   ;;  %v3409_v30 = vld [vmem:[%s5179_s4 + $0xe0] ss:$16 sps:$4 sm:$0xff]  }
  0x10   :  { %1849 = vmatpush1.bf16.msra.mxu0 %v3386_v15  ;;  %1809 = vmatprep.subr.bf16.mxu1 %v3387_v16  ;;  %v3407_v29 = vld [vmem:[%s5179_s4 + $0x2e4] ss:$16 sps:$4 sm:$0xff]   ;;  %v3410_v31 = vld [vmem:[%s5179_s4 + $0x2e0] ss:$16 sps:$4 sm:$0xff]  }
  0x11   :  { %1850 = vmatprep.subr.bf16.mxu0 %v3389_v17  ;;  %v3411_v32 = vld [vmem:[%s5179_s4 + $0x104] ss:$16 sps:$4 sm:$0xff]   ;;  %v3415_v34 = vld [vmem:[%s5179_s4 + $0x100] ss:$16 sps:$4 sm:$0xff]  }
  0x12   :  { %v3413_v33 = vld [vmem:[%s5179_s4 + $0x304] ss:$16 sps:$4 sm:$0xff]   ;;  %v3416_v35 = vld [vmem:[%s5179_s4 + $0x300] ss:$16 sps:$4 sm:$0xff]  }
  0x13   :  { %1810 = vmatpush1.bf16.msra.mxu1 %v3391_v18  ;;  %v3417_v36 = vld [vmem:[%s5179_s4 + $0x124] ss:$16 sps:$4 sm:$0xff]   ;;  %v3421_v41 = vld [vmem:[%s5179_s4 + $0x120] ss:$16 sps:$4 sm:$0xff]  }
  0x14   :  { %1851 = vmatpush1.bf16.msra.mxu0 %v3392_v19  ;;  %1811 = vmatprep.subr.bf16.mxu1 %v3393_v20  ;;  %v3419_v40 = vld [vmem:[%s5179_s4 + $0x324] ss:$16 sps:$4 sm:$0xff]   ;;  %v3422_v42 = vld [vmem:[%s5179_s4 + $0x320] ss:$16 sps:$4 sm:$0xff]  }
  0x15   :  { %1852 = vmatprep.subr.bf16.mxu0 %v3395_v21  ;;  %v3423_v43 = vld [vmem:[%s5179_s4 + $0x144] ss:$16 sps:$4 sm:$0xff]   ;;  %v3427_v49 = vld [vmem:[%s5179_s4 + $0x140] ss:$16 sps:$4 sm:$0xff]  }
  0x16   :  { %v3425_v46 = vld [vmem:[%s5179_s4 + $0x344] ss:$16 sps:$4 sm:$0xff]   ;;  %v3428_v50 = vld [vmem:[%s5179_s4 + $0x340] ss:$16 sps:$4 sm:$0xff]  }
  0x17   :  { %1812 = vmatpush1.bf16.msra.mxu1 %v3397_v22  ;;  %v3429_v53 = vld [vmem:[%s5179_s4 + $0x164] ss:$16 sps:$4 sm:$0xff]   ;;  %v3433_v56 = vld [vmem:[%s5179_s4 + $0x160] ss:$16 sps:$4 sm:$0xff]  }
  0x18   :  { %1853 = vmatpush1.bf16.msra.mxu0 %v3398_v23  ;;  %1813 = vmatprep.subr.bf16.mxu1 %v3399_v24  ;;  %v3431_v55 = vld [vmem:[%s5179_s4 + $0x364] ss:$16 sps:$4 sm:$0xff]   ;;  %v3434_v57 = vld [vmem:[%s5179_s4 + $0x360] ss:$16 sps:$4 sm:$0xff]  }
  0x19   :  { %1854 = vmatprep.subr.bf16.mxu0 %v3401_v25  ;;  %v4091_v58 = vld [vmem:[%s5180_s2] sm:$0xff] }
  0x1a   :  { %v42_v59 = vld [vmem:[%s5181_s0] sm:$0xff]  ;;  %v52_v61 = vrot.slane %v4091_v58, %v4056_v47  ;;  %v48_v63 = vrot.slane %v4091_v58, %v4059_v48  ;;  %v60_v0 = vrot.slane %v4091_v58, %v4068_v51  ;;  %v56_v1 = vrot.slane %v4091_v58, %v4071_v52 }
  0x1b   :  { %1814 = vmatpush1.bf16.msra.mxu1 %v3403_v26  ;;  %v137_v62 = vld [vmem:[%s5182_s1] sm:$0xff]  ;;  %v94_v2 = vrot.slane %v42_v59, %v4077_v54  ;;  %v87_v17 = vcombine.high %v42_v59, %v42_v59 }
  0x1c   :  { %1855 = vmatpush1.bf16.msra.mxu0 %v3404_v27  ;;  %1815 = vmatprep.subr.bf16.mxu1 %v3405_v28  ;;  %v148_v5 = vrot.slane %v137_v62, %v4077_v54  ;;  %v4124_v6 = vld [vmem:[%s5183_s3] sm:$0xff]  ;;  %v141_v18 = vcombine.high %v137_v62, %v137_v62  ;;  %v75_v62 = vsub.s32 7, %v4050_v44 }
  0x1d   :  { %1856 = vmatprep.subr.bf16.mxu0 %v3407_v29  ;;  %v3435_v7 = vld [vmem:[%s5179_s4 + $0x184] ss:$16 sps:$4 sm:$0xff]   ;;  %v208_v10 = vrot.slane %v4124_v6, %v4056_v47  ;;  %v204_v11 = vrot.slane %v4124_v6, %v4059_v48  ;;  %v102_v13 = vcombine.high %v94_v2, %v94_v2  ;;  %v129_v15 = vmul.f32 %v94_v2, %v48_v63  ;;  %v3439_v21 = vld [vmem:[%s5179_s4 + $0x180] ss:$16 sps:$4 sm:$0xff]  }
  0x1e   :  { %v3437_v8 = vld [vmem:[%s5179_s4 + $0x384] ss:$16 sps:$4 sm:$0xff]   ;;  %v156_v14 = vcombine.high %v148_v5, %v148_v5  ;;  %v183_v16 = vmul.f32 %v148_v5, %v48_v63  ;;  %v216_v19 = vrot.slane %v4124_v6, %v4068_v51  ;;  %v212_v20 = vrot.slane %v4124_v6, %v4071_v52  ;;  %v3440_v22 = vld [vmem:[%s5179_s4 + $0x380] ss:$16 sps:$4 sm:$0xff]  }
  0x1f   :  { %1816 = vmatpush1.bf16.msra.mxu1 %v3409_v30  ;;  %v130_v23 = vmul.f32 %v102_v13, %v52_v61  ;;  %v3441_v26 = vld [vmem:[%s5179_s4 + $0x1a4] ss:$16 sps:$4 sm:$0xff]   ;;  %v101_v28 = vrot.slane %v87_v17, %v4077_v54  ;;  %v155_v29 = vrot.slane %v141_v18, %v4077_v54  ;;  %v68_v30 = vrot.slane %v4091_v58, %v67_v12 }
  0x20   :  { %1857 = vmatpush1.bf16.msra.mxu0 %v3410_v31  ;;  %1817 = vmatprep.subr.bf16.mxu1 %v3411_v32  ;;  %v184_v24 = vmul.f32 %v156_v14, %v52_v61  ;;  %v191_v25 = vmax.f32 %v129_v15, %v183_v16  ;;  %v3443_v27 = vld [vmem:[%s5179_s4 + $0x3a4] ss:$16 sps:$4 sm:$0xff]   ;;  %v63_v31 = vsub.s32 4, %v4050_v44  ;;  %v224_v2 = vrot.slane %v4124_v6, %v67_v12 }
  0x21   :  { %1858 = vmatprep.subr.bf16.mxu0 %v3413_v33  ;;  %v157_v38 = vcombine.high %v155_v29, %v155_v29  ;;  %v131_v39 = vmul.f32 %v101_v28, %v56_v1  ;;  %v71_v13 = vsub.s32 6, %v4050_v44  ;;  %v3453_v12 = vld [vmem:[%s5179_s4 + $0x1e4] ss:$16 sps:$4 sm:$0xff]   ;;  %v76_v44 = vrot.slane %v4091_v58, %v75_v62 }
  0x22   :  { %v192_v32 = vmax.f32 %v130_v23, %v184_v24  ;;  %v4159_v33 = vadd.f32 %v204_v11, %v191_v25  ;;  %v64_v5 = vrot.slane %v4091_v58, %v63_v31  ;;  %v220_v11 = vrot.slane %v4124_v6, %v63_v31  ;;  %v3455_v14 = vld [vmem:[%s5179_s4 + $0x3e4] ss:$16 sps:$4 sm:$0xff]  }
  0x23   :  { %1818 = vmatpush1.bf16.msra.mxu1 %v3415_v34  ;;  %v111_v34 = vrot.slane %v4099_v60, %v4077_v54  ;;  %v232_v25 = vrot.slane %v4124_v6, %v75_v62  ;;  %v3458_v60 = vld [vmem:[%s5179_s4 + $0x3e0] ss:$16 sps:$4 sm:$0xff]  }
  0x24   :  { %1859 = vmatpush1.bf16.msra.mxu0 %v3416_v35  ;;  %1819 = vmatprep.subr.bf16.mxu1 %v3417_v36  ;;  %v165_v35 = vrot.slane %v4118_v4, %v4077_v54  ;;  %v103_v36 = vcombine.high %v101_v28, %v101_v28  ;;  %v249_v15 = vmax.f32 %v4159_v33, 0.0  ;;  %v72_v4 = vrot.slane %v4091_v58, %v71_v13  ;;  %v3468_v28 = vld [vmem:[%s5179_s4 + $0xc] ss:$16 sps:$4 sm:$0xff]   ;;  %v3481_v62 = vld [vmem:[%s5179_s4 + $0x460] ss:$16 sps:$4 sm:$0xff]  }
  0x25   :  { %1860 = vmatprep.subr.bf16.mxu0 %v3419_v40  ;;  %v185_v40 = vmul.f32 %v155_v29, %v56_v1  ;;  %v119_v45 = vcombine.high %v111_v34, %v111_v34  ;;  %v133_v17 = vmul.f32 %v111_v34, %v64_v5 }
  0x26   :  { %v187_v18 = vmul.f32 %v165_v35, %v64_v5  ;;  %v4226_v34 = vpack.c.bf16 %v249_v15, %v249_v15  ;;  %v3487_v5 = vld [vmem:[%s5179_s4 + $0x480] ss:$16 sps:$4 sm:$0xff]   ;;  %v3502_v15 = vld [vmem:[%s5179_s4 + $0xc8] ss:$16 sps:$4 sm:$0xff]  }
  0x27   :  { %1820 = vmatpush1.bf16.msra.mxu1 %v3421_v41  ;;  %v3445_v41 = vld [vmem:[%s5179_s4 + $0x1a0] ss:$16 sps:$4 sm:$0xff]   ;;  %v134_v59 = vmul.f32 %v119_v45, %v68_v30 }
  0x28   :  { %1861 = vmatpush1.bf16.msra.mxu0 %v3422_v42  ;;  %1821 = vmatprep.subr.bf16.mxu1 %v3423_v43  ;;  %v3446_v42 = vld [vmem:[%s5179_s4 + $0x3a0] ss:$16 sps:$4 sm:$0xff]   ;;  %v242_v43 = vadd.f32 %v208_v10, %v192_v32 }
  0x29   :  { %1862 = vmatprep.subr.bf16.mxu0 %v3425_v46  ;;  %v173_v46 = vcombine.high %v165_v35, %v165_v35 }
  0x2b   :  { %1822 = vmatpush1.bf16.msra.mxu1 %v3427_v49  ;;  %v3447_v49 = vld [vmem:[%s5179_s4 + $0x1c4] ss:$16 sps:$4 sm:$0xff]   ;;  %v188_v61 = vmul.f32 %v173_v46, %v68_v30  ;;  %v228_v30 = vrot.slane %v4124_v6, %v71_v13  ;;  %v3466_v6 = vld [vmem:[%s5179_s4 + $0x8] ss:$16 sps:$4 sm:$0xff]  }
  0x2c   :  { %1863 = vmatpush1.bf16.msra.mxu0 %v3428_v50  ;;  %1823 = vmatprep.subr.bf16.mxu1 %v3429_v53  ;;  %v3449_v50 = vld [vmem:[%s5179_s4 + $0x3c4] ss:$16 sps:$4 sm:$0xff]   ;;  %v132_v53 = vmul.f32 %v103_v36, %v60_v0 }
  0x2d   :  { %1864 = vmatprep.subr.bf16.mxu0 %v3431_v55  ;;  %v186_v55 = vmul.f32 %v157_v38, %v60_v0  ;;  %v3452_v0 = vld [vmem:[%s5179_s4 + $0x3c0] ss:$16 sps:$4 sm:$0xff]   ;;  %v196_v10 = vmax.f32 %v134_v59, %v188_v61  ;;  %v3483_v59 = vld [vmem:[%s5179_s4 + $0x464] ss:$16 sps:$4 sm:$0xff]   ;;  %v3486_v61 = vld [vmem:[%s5179_s4 + $0x6c] ss:$16 sps:$4 sm:$0xff]  }
  0x2e   :  { %v3463_v38 = vld [vmem:[%s5179_s4 + $0x400] ss:$16 sps:$4 sm:$0xff]   ;;  %v3501_v13 = vld [vmem:[%s5179_s4 + $0x4c4] ss:$16 sps:$4 sm:$0xff]  }
  0x2f   :  { %1824 = vmatpush1.bf16.msra.mxu1 %v3433_v56  ;;  %v193_v56 = vmax.f32 %v131_v39, %v185_v40  ;;  %v194_v63 = vmax.f32 %v132_v53, %v186_v55  ;;  %v3471_v40 = vld [vmem:[%s5179_s4 + $0x424] ss:$16 sps:$4 sm:$0xff]   ;;  %v3480_v55 = vld [vmem:[%s5179_s4 + $0x4c] ss:$16 sps:$4 sm:$0xff]  }
  0x30   :  { %1865 = vmatpush1.bf16.msra.mxu0 %v3434_v57  ;;  %1825 = vmatprep.subr.bf16.mxu1 %v3435_v7  ;;  %v250_v57 = vmax.f32 %v242_v43, 0.0  ;;  %v3451_v7 = vld [vmem:[%s5179_s4 + $0x1c0] ss:$16 sps:$4 sm:$0xff]   ;;  %v3477_v53 = vld [vmem:[%s5179_s4 + $0x444] ss:$16 sps:$4 sm:$0xff]  }
  0x31   :  { %1866 = vmatprep.subr.bf16.mxu0 %v3437_v8  ;;  %v243_v1 = vadd.f32 %v212_v20, %v193_v56  ;;  %v244_v16 = vadd.f32 %v216_v19, %v194_v63  ;;  %v246_v20 = vadd.f32 %v224_v2, %v196_v10  ;;  %v195_v19 = vmax.f32 %v133_v17, %v187_v18  ;;  %v3475_v56 = vld [vmem:[%s5179_s4 + $0x440] ss:$16 sps:$4 sm:$0xff]   ;;  %v3484_v63 = vld [vmem:[%s5179_s4 + $0x68] ss:$16 sps:$4 sm:$0xff]   ;;  %v3492_v2 = vld [vmem:[%s5179_s4 + $0x8c] ss:$16 sps:$4 sm:$0xff]  }
  0x32   :  { %v4186_v8 = vpack.c.bf16 %v250_v57, %v250_v57  ;;  %v3478_v57 = vld [vmem:[%s5179_s4 + $0x48] ss:$16 sps:$4 sm:$0xff]   ;;  %v3493_v10 = vld [vmem:[%s5179_s4 + $0x4a0] ss:$16 sps:$4 sm:$0xff]   ;;  %v3510_v17 = vld [vmem:[%s5179_s4 + $0xec] ss:$16 sps:$4 sm:$0xff]  }
  0x33   :  { %1826 = vmatpush1.bf16.msra.mxu1 %v3439_v21  ;;  %v118_v21 = vrot.slane %v104_v3, %v4077_v54  ;;  %v252_v23 = vmax.f32 %v244_v16, 0.0  ;;  %v251_v24 = vmax.f32 %v243_v1, 0.0  ;;  %v4223_v29 = vadd.f32 %v220_v11, %v195_v19  ;;  %v3489_v1 = vld [vmem:[%s5179_s4 + $0x484] ss:$16 sps:$4 sm:$0xff]   ;;  %v3496_v11 = vld [vmem:[%s5179_s4 + $0xa8] ss:$16 sps:$4 sm:$0xff]  }
  0x34   :  { %1867 = vmatpush1.bf16.msra.mxu0 %v3440_v22  ;;  %1827 = vmatprep.subr.bf16.mxu1 %v3441_v26  ;;  %v172_v22 = vrot.slane %v158_v9, %v4077_v54  ;;  %v3457_v26 = vld [vmem:[%s5179_s4 + $0x1e0] ss:$16 sps:$4 sm:$0xff]   ;;  %v3465_v9 = vld [vmem:[%s5179_s4 + $0x404] ss:$16 sps:$4 sm:$0xff]   ;;  %v254_v31 = vmax.f32 %v246_v20, 0.0 }
  0x35   :  { %1868 = vmatprep.subr.bf16.mxu0 %v3443_v27  ;;  %1833 = vmatprep.mubr.bf16.mxu1 %v4186_v8  ;;  %v120_v3 = vcombine.high %v118_v21, %v118_v21  ;;  %v4215_v54 = vpack.c.bf16 %v252_v23, %v252_v23  ;;  %v135_v58 = vmul.f32 %v118_v21, %v72_v4  ;;  %v3507_v16 = vld [vmem:[%s5179_s4 + $0x4e4] ss:$16 sps:$4 sm:$0xff]   ;;  %v3505_v18 = vld [vmem:[%s5179_s4 + $0x4e0] ss:$16 sps:$4 sm:$0xff]   ;;  %v3508_v20 = vld [vmem:[%s5179_s4 + $0xe8] ss:$16 sps:$4 sm:$0xff]  }
  0x36   :  { %v174_v27 = vcombine.high %v172_v22, %v172_v22  ;;  %v4229_v35 = vpack.c.bf16 %v251_v24, %v251_v24  ;;  %v189_v36 = vmul.f32 %v172_v22, %v72_v4  ;;  %v4243_v43 = vpack.c.bf16 %v254_v31, %v254_v31  ;;  %v3516_v21 = vld [vmem:[%s5179_s4 + $0x10c] ss:$16 sps:$4 sm:$0xff]   ;;  %v3511_v22 = vld [vmem:[%s5179_s4 + $0x500] ss:$16 sps:$4 sm:$0xff]   ;;  %v3514_v23 = vld [vmem:[%s5179_s4 + $0x108] ss:$16 sps:$4 sm:$0xff]  }
  0x37   :  { %1828 = vmatpush1.bf16.msra.mxu1 %v3445_v41  ;;  %v136_v32 = vmul.f32 %v120_v3, %v76_v44  ;;  %1874 = vmatprep.mubr.bf16.mxu0 %v4215_v54  ;;  %v3474_v41 = vld [vmem:[%s5179_s4 + $0x2c] ss:$16 sps:$4 sm:$0xff]   ;;  %v3519_v24 = vld [vmem:[%s5179_s4 + $0x524] ss:$16 sps:$4 sm:$0xff]   ;;  %v3526_v4 = vld [vmem:[%s5179_s4 + $0x148] ss:$16 sps:$4 sm:$0xff]  }
  0x38   :  { %1869 = vmatpush1.bf16.msra.mxu0 %v3446_v42  ;;  %1829 = vmatprep.subr.bf16.mxu1 %v3447_v49  ;;  %v190_v33 = vmul.f32 %v174_v27, %v76_v44  ;;  %v197_v42 = vmax.f32 %v135_v58, %v189_v36  ;;  %v3469_v49 = vld [vmem:[%s5179_s4 + $0x420] ss:$16 sps:$4 sm:$0xff]   ;;  %v3513_v44 = vld [vmem:[%s5179_s4 + $0x504] ss:$16 sps:$4 sm:$0xff]   ;;  %v3522_v19 = vld [vmem:[%s5179_s4 + $0x12c] ss:$16 sps:$4 sm:$0xff]  }
  0x39   :  { %1870 = vmatprep.subr.bf16.mxu0 %v3449_v50  ;;  %v3472_v50 = vld [vmem:[%s5179_s4 + $0x28] ss:$16 sps:$4 sm:$0xff]   ;;  %v3528_v3 = vld [vmem:[%s5179_s4 + $0x14c] ss:$16 sps:$4 sm:$0xff]   ;;  %v3523_v27 = vld [vmem:[%s5179_s4 + $0x540] ss:$16 sps:$4 sm:$0xff]  }
  0x3a   :  { %v198_v39 = vmax.f32 %v136_v32, %v190_v33  ;;  %v4249_v46 = vadd.f32 %v228_v30, %v197_v42  ;;  %v3529_v30 = vld [vmem:[%s5179_s4 + $0x560] ss:$16 sps:$4 sm:$0xff]   ;;  %v3532_v31 = vld [vmem:[%s5179_s4 + $0x168] ss:$16 sps:$4 sm:$0xff]   ;;  %v3537_v32 = vld [vmem:[%s5179_s4 + $0x584] ss:$16 sps:$4 sm:$0xff]  }
  0x3b   :  { %1830 = vmatpush1.bf16.msra.mxu1 %v3451_v7  ;;  %v3490_v7 = vld [vmem:[%s5179_s4 + $0x88] ss:$16 sps:$4 sm:$0xff]   ;;  %v3540_v33 = vld [vmem:[%s5179_s4 + $0x18c] ss:$16 sps:$4 sm:$0xff]   ;;  %v3535_v58 = vld [vmem:[%s5179_s4 + $0x580] ss:$16 sps:$4 sm:$0xff]  }
  0x3c   :  { %1871 = vmatpush1.bf16.msra.mxu0 %v3452_v0  ;;  %1831 = vmatprep.subr.bf16.mxu1 %v3453_v12  ;;  %v4245_v45 = vadd.f32 %v232_v25, %v198_v39  ;;  %v3495_v0 = vld [vmem:[%s5179_s4 + $0x4a4] ss:$16 sps:$4 sm:$0xff]   ;;  %v3504_v12 = vld [vmem:[%s5179_s4 + $0xcc] ss:$16 sps:$4 sm:$0xff]   ;;  %v3517_v25 = vld [vmem:[%s5179_s4 + $0x520] ss:$16 sps:$4 sm:$0xff]  }
  0x3d   :  { %1872 = vmatprep.subr.bf16.mxu0 %v3455_v14  ;;  %v3499_v14 = vld [vmem:[%s5179_s4 + $0x4c0] ss:$16 sps:$4 sm:$0xff]   ;;  %v3538_v36 = vld [vmem:[%s5179_s4 + $0x188] ss:$16 sps:$4 sm:$0xff]   ;;  %v3552_v42 = vld [vmem:[%s5179_s4 + $0x1cc] ss:$16 sps:$4 sm:$0xff]  }
  0x3e   :  { %v3541_v39 = vld [vmem:[%s5179_s4 + $0x5a0] ss:$16 sps:$4 sm:$0xff]  }
  0x3f   :  { %1832 = vmatpush1.bf16.msra.mxu1 %v3457_v26  ;;  %v3520_v26 = vld [vmem:[%s5179_s4 + $0x128] ss:$16 sps:$4 sm:$0xff]  }
  0x40   :  { %1873 = vmatpush1.bf16.msra.mxu0 %v3458_v60  ;;  %1965 = vmatprep.subr.bf16.mxu1 %v3468_v28  ;;  %v3525_v60 = vld [vmem:[%s5179_s4 + $0x544] ss:$16 sps:$4 sm:$0xff]   ;;  %v3534_v28 = vld [vmem:[%s5179_s4 + $0x16c] ss:$16 sps:$4 sm:$0xff]  }
  0x41   :  { %1883 = vmatprep.subr.bf16.mxu0 %v3465_v9  ;;  %v3531_v9 = vld [vmem:[%s5179_s4 + $0x564] ss:$16 sps:$4 sm:$0xff]  }
  0x42   :  { %1834 = vmatmul.mubr.bf16.vlgmr.msra.gmra.mrb[0].mxu1 %v4226_v34 }
  0x43   :  { %1875 = vmatmul.mubr.bf16.vlgmr.msra.gmra.mrb[0].mxu0 %v4229_v35  ;;  %1966 = vmatpush1.bf16.msra.mxu1 %v3466_v6  ;;  %v3546_v6 = vld [vmem:[%s5179_s4 + $0x1ac] ss:$16 sps:$4 sm:$0xff]  }
  0x44   :  { %1884 = vmatpush1.bf16.msra.mxu0 %v3463_v38  ;;  %1967 = vmatprep.subr.bf16.mxu1 %v3474_v41  ;;  %v3543_v38 = vld [vmem:[%s5179_s4 + $0x5a4] ss:$16 sps:$4 sm:$0xff]  }
  0x45   :  { %1885 = vmatprep.subr.bf16.mxu0 %v3471_v40  ;;  %1915 = vmatprep.mubr.bf16.mxu0 %v4243_v43  ;;  %v3544_v40 = vld [vmem:[%s5179_s4 + $0x1a8] ss:$16 sps:$4 sm:$0xff]   ;;  %v3549_v41 = vld [vmem:[%s5179_s4 + $0x5c4] ss:$16 sps:$4 sm:$0xff]  }
  0x46   :  { %1997 = vmatprep.mubr.bf16.mxu1 %v4186_v8  ;;  %v3498_v8 = vld [vmem:[%s5179_s4 + $0xac] ss:$16 sps:$4 sm:$0xff]  }
  0x47   :  { %1968 = vmatpush1.bf16.msra.mxu1 %v3472_v50  ;;  %v3550_v50 = vld [vmem:[%s5179_s4 + $0x1c8] ss:$16 sps:$4 sm:$0xff]  }
  0x48   :  { %1886 = vmatpush1.bf16.msra.mxu0 %v3469_v49  ;;  %1969 = vmatprep.subr.bf16.mxu1 %v3480_v55  ;;  %v3547_v49 = vld [vmem:[%s5179_s4 + $0x5c0] ss:$16 sps:$4 sm:$0xff]   ;;  %v3558_v55 = vld [vmem:[%s5179_s4 + $0x1ec] ss:$16 sps:$4 sm:$0xff]  }
  0x49   :  { %1887 = vmatprep.subr.bf16.mxu0 %v3477_v53  ;;  %v3555_v53 = vld [vmem:[%s5179_s4 + $0x5e4] ss:$16 sps:$4 sm:$0xff]  }
  0x4b   :  { %1970 = vmatpush1.bf16.msra.mxu1 %v3478_v57  ;;  %v3553_v57 = vld [vmem:[%s5179_s4 + $0x5e0] ss:$16 sps:$4 sm:$0xff]  }
  0x4c   :  { %1888 = vmatpush1.bf16.msra.mxu0 %v3475_v56  ;;  %1971 = vmatprep.subr.bf16.mxu1 %v3486_v61  ;;  %v253_v56 = vmax.f32 %v4223_v29, 0.0  ;;  %v3561_v61 = vld [vmem:[%s5179_s4 + $0x604] ss:$16 sps:$4 sm:$0xff]   ;;  %v3564_v29 = vld [vmem:[%s5179_s4 + $0x20c] ss:$16 sps:$4 sm:$0xff]  }
  0x4d   :  { %1889 = vmatprep.subr.bf16.mxu0 %v3483_v59  ;;  %v3556_v59 = vld [vmem:[%s5179_s4 + $0x1e8] ss:$16 sps:$4 sm:$0xff]  }
  0x4f   :  { %1972 = vmatpush1.bf16.msra.mxu1 %v3484_v63  ;;  %v4435_v63 = vpack.c.bf16 %v253_v56, %v253_v56  ;;  %v3631_v56 = vld [vmem:[%s5179_s4 + $0x780] ss:$16 sps:$4 sm:$0xff]  }
  0x50   :  { %1890 = vmatpush1.bf16.msra.mxu0 %v3481_v62  ;;  %1973 = vmatprep.subr.bf16.mxu1 %v3492_v2  ;;  %v256_v62 = vmax.f32 %v4245_v45, 0.0  ;;  %v3562_v2 = vld [vmem:[%s5179_s4 + $0x208] ss:$16 sps:$4 sm:$0xff]   ;;  %v3570_v45 = vld [vmem:[%s5179_s4 + $0x22c] ss:$16 sps:$4 sm:$0xff]  }
  0x51   :  { %1891 = vmatprep.subr.bf16.mxu0 %v3489_v1  ;;  %v3559_v1 = vld [vmem:[%s5179_s4 + $0x600] ss:$16 sps:$4 sm:$0xff]  }
  0x53   :  { %1974 = vmatpush1.bf16.msra.mxu1 %v3490_v7  ;;  %v4449_v7 = vpack.c.bf16 %v256_v62, %v256_v62  ;;  %v3640_v62 = vld [vmem:[%s5179_s4 + $0x3a8] ss:$16 sps:$4 sm:$0xff]  }
  0x54   :  { %1892 = vmatpush1.bf16.msra.mxu0 %v3487_v5  ;;  %1975 = vmatprep.subr.bf16.mxu1 %v3498_v8  ;;  %v3567_v5 = vld [vmem:[%s5179_s4 + $0x624] ss:$16 sps:$4 sm:$0xff]   ;;  %v3568_v8 = vld [vmem:[%s5179_s4 + $0x228] ss:$16 sps:$4 sm:$0xff]  }
  0x55   :  { %1893 = vmatprep.subr.bf16.mxu0 %v3495_v0  ;;  %v3565_v0 = vld [vmem:[%s5179_s4 + $0x620] ss:$16 sps:$4 sm:$0xff]  }
  0x57   :  { %1976 = vmatpush1.bf16.msra.mxu1 %v3496_v11  ;;  %v3571_v11 = vld [vmem:[%s5179_s4 + $0x640] ss:$16 sps:$4 sm:$0xff]  }
  0x58   :  { %1894 = vmatpush1.bf16.msra.mxu0 %v3493_v10  ;;  %1977 = vmatprep.subr.bf16.mxu1 %v3504_v12  ;;  %v3573_v10 = vld [vmem:[%s5179_s4 + $0x644] ss:$16 sps:$4 sm:$0xff]  }
  0x59   :  { %1895 = vmatprep.subr.bf16.mxu0 %v3501_v13  ;;  %v3574_v13 = vld [vmem:[%s5179_s4 + $0x248] ss:$16 sps:$4 sm:$0xff]   ;;  %v3579_v12 = vld [vmem:[%s5179_s4 + $0x664] ss:$16 sps:$4 sm:$0xff]  }
  0x5b   :  { %1978 = vmatpush1.bf16.msra.mxu1 %v3502_v15  ;;  %v3580_v15 = vld [vmem:[%s5179_s4 + $0x268] ss:$16 sps:$4 sm:$0xff]  }
  0x5c   :  { %1896 = vmatpush1.bf16.msra.mxu0 %v3499_v14  ;;  %1979 = vmatprep.subr.bf16.mxu1 %v3510_v17  ;;  %v3577_v14 = vld [vmem:[%s5179_s4 + $0x660] ss:$16 sps:$4 sm:$0xff]   ;;  %v3588_v17 = vld [vmem:[%s5179_s4 + $0x28c] ss:$16 sps:$4 sm:$0xff]  }
  0x5d   :  { %1897 = vmatprep.subr.bf16.mxu0 %v3507_v16  ;;  %v3585_v16 = vld [vmem:[%s5179_s4 + $0x684] ss:$16 sps:$4 sm:$0xff]  }
  0x5f   :  { %1980 = vmatpush1.bf16.msra.mxu1 %v3508_v20  ;;  %v3586_v20 = vld [vmem:[%s5179_s4 + $0x288] ss:$16 sps:$4 sm:$0xff]  }
  0x60   :  { %1898 = vmatpush1.bf16.msra.mxu0 %v3505_v18  ;;  %1981 = vmatprep.subr.bf16.mxu1 %v3516_v21  ;;  %v3583_v18 = vld [vmem:[%s5179_s4 + $0x680] ss:$16 sps:$4 sm:$0xff]   ;;  %v3594_v21 = vld [vmem:[%s5179_s4 + $0x2ac] ss:$16 sps:$4 sm:$0xff]  }
  0x61   :  { %1899 = vmatprep.subr.bf16.mxu0 %v3513_v44  ;;  %v3591_v44 = vld [vmem:[%s5179_s4 + $0x6a4] ss:$16 sps:$4 sm:$0xff]  }
  0x63   :  { %1982 = vmatpush1.bf16.msra.mxu1 %v3514_v23  ;;  %v3592_v23 = vld [vmem:[%s5179_s4 + $0x2a8] ss:$16 sps:$4 sm:$0xff]  }
  0x64   :  { %1900 = vmatpush1.bf16.msra.mxu0 %v3511_v22  ;;  %1983 = vmatprep.subr.bf16.mxu1 %v3522_v19  ;;  %v3589_v22 = vld [vmem:[%s5179_s4 + $0x6a0] ss:$16 sps:$4 sm:$0xff]   ;;  %v3600_v19 = vld [vmem:[%s5179_s4 + $0x2cc] ss:$16 sps:$4 sm:$0xff]  }
  0x65   :  { %1901 = vmatprep.subr.bf16.mxu0 %v3519_v24  ;;  %v3597_v24 = vld [vmem:[%s5179_s4 + $0x6c4] ss:$16 sps:$4 sm:$0xff]  }
  0x67   :  { %1984 = vmatpush1.bf16.msra.mxu1 %v3520_v26  ;;  %v3598_v26 = vld [vmem:[%s5179_s4 + $0x2c8] ss:$16 sps:$4 sm:$0xff]  }
  0x68   :  { %1902 = vmatpush1.bf16.msra.mxu0 %v3517_v25  ;;  %1985 = vmatprep.subr.bf16.mxu1 %v3528_v3  ;;  %v3595_v25 = vld [vmem:[%s5179_s4 + $0x6c0] ss:$16 sps:$4 sm:$0xff]   ;;  %v3606_v3 = vld [vmem:[%s5179_s4 + $0x2ec] ss:$16 sps:$4 sm:$0xff]  }
  0x69   :  { %1903 = vmatprep.subr.bf16.mxu0 %v3525_v60  ;;  %v3603_v60 = vld [vmem:[%s5179_s4 + $0x6e4] ss:$16 sps:$4 sm:$0xff]  }
  0x6b   :  { %1986 = vmatpush1.bf16.msra.mxu1 %v3526_v4  ;;  %v3604_v4 = vld [vmem:[%s5179_s4 + $0x2e8] ss:$16 sps:$4 sm:$0xff]  }
  0x6c   :  { %1904 = vmatpush1.bf16.msra.mxu0 %v3523_v27  ;;  %1987 = vmatprep.subr.bf16.mxu1 %v3534_v28  ;;  %v3601_v27 = vld [vmem:[%s5179_s4 + $0x6e0] ss:$16 sps:$4 sm:$0xff]   ;;  %v3612_v28 = vld [vmem:[%s5179_s4 + $0x30c] ss:$16 sps:$4 sm:$0xff]  }
  0x6d   :  { %1905 = vmatprep.subr.bf16.mxu0 %v3531_v9  ;;  %v3609_v9 = vld [vmem:[%s5179_s4 + $0x704] ss:$16 sps:$4 sm:$0xff]  }
  0x6f   :  { %1988 = vmatpush1.bf16.msra.mxu1 %v3532_v31  ;;  %v3610_v31 = vld [vmem:[%s5179_s4 + $0x308] ss:$16 sps:$4 sm:$0xff]  }
  0x70   :  { %1906 = vmatpush1.bf16.msra.mxu0 %v3529_v30  ;;  %1989 = vmatprep.subr.bf16.mxu1 %v3540_v33  ;;  %v3607_v30 = vld [vmem:[%s5179_s4 + $0x700] ss:$16 sps:$4 sm:$0xff]   ;;  %v3618_v33 = vld [vmem:[%s5179_s4 + $0x32c] ss:$16 sps:$4 sm:$0xff]  }
  0x71   :  { %1907 = vmatprep.subr.bf16.mxu0 %v3537_v32  ;;  %v3615_v32 = vld [vmem:[%s5179_s4 + $0x724] ss:$16 sps:$4 sm:$0xff]  }
  0x73   :  { %1990 = vmatpush1.bf16.msra.mxu1 %v3538_v36  ;;  %v3616_v36 = vld [vmem:[%s5179_s4 + $0x328] ss:$16 sps:$4 sm:$0xff]  }
  0x74   :  { %1908 = vmatpush1.bf16.msra.mxu0 %v3535_v58  ;;  %1991 = vmatprep.subr.bf16.mxu1 %v3546_v6  ;;  %v3613_v58 = vld [vmem:[%s5179_s4 + $0x720] ss:$16 sps:$4 sm:$0xff]   ;;  %v3624_v6 = vld [vmem:[%s5179_s4 + $0x34c] ss:$16 sps:$4 sm:$0xff]  }
  0x75   :  { %1909 = vmatprep.subr.bf16.mxu0 %v3543_v38  ;;  %v3621_v38 = vld [vmem:[%s5179_s4 + $0x744] ss:$16 sps:$4 sm:$0xff]  }
  0x77   :  { %1992 = vmatpush1.bf16.msra.mxu1 %v3544_v40  ;;  %v3622_v40 = vld [vmem:[%s5179_s4 + $0x348] ss:$16 sps:$4 sm:$0xff]  }
  0x78   :  { %1910 = vmatpush1.bf16.msra.mxu0 %v3541_v39  ;;  %1993 = vmatprep.subr.bf16.mxu1 %v3552_v42  ;;  %v3619_v39 = vld [vmem:[%s5179_s4 + $0x740] ss:$16 sps:$4 sm:$0xff]   ;;  %v3630_v42 = vld [vmem:[%s5179_s4 + $0x36c] ss:$16 sps:$4 sm:$0xff]  }
  0x79   :  { %1911 = vmatprep.subr.bf16.mxu0 %v3549_v41  ;;  %v3627_v41 = vld [vmem:[%s5179_s4 + $0x764] ss:$16 sps:$4 sm:$0xff]  }
  0x7b   :  { %1994 = vmatpush1.bf16.msra.mxu1 %v3550_v50  ;;  %v3628_v50 = vld [vmem:[%s5179_s4 + $0x368] ss:$16 sps:$4 sm:$0xff]  }
  0x7c   :  { %1912 = vmatpush1.bf16.msra.mxu0 %v3547_v49  ;;  %1995 = vmatprep.subr.bf16.mxu1 %v3558_v55  ;;  %v3625_v49 = vld [vmem:[%s5179_s4 + $0x760] ss:$16 sps:$4 sm:$0xff]   ;;  %v3636_v55 = vld [vmem:[%s5179_s4 + $0x38c] ss:$16 sps:$4 sm:$0xff]  }
  0x7d   :  { %1913 = vmatprep.subr.bf16.mxu0 %v3555_v53  ;;  %v3633_v53 = vld [vmem:[%s5179_s4 + $0x784] ss:$16 sps:$4 sm:$0xff]  }
  0x7f   :  { %1996 = vmatpush1.bf16.msra.mxu1 %v3556_v59  ;;  %v3639_v59 = vld [vmem:[%s5179_s4 + $0x7a4] ss:$16 sps:$4 sm:$0xff]  }
  0x80   :  { %1914 = vmatpush1.bf16.msra.mxu0 %v3553_v57  ;;  %2006 = vmatprep.subr.bf16.mxu1 %v3564_v29  ;;  %v3634_v57 = vld [vmem:[%s5179_s4 + $0x388] ss:$16 sps:$4 sm:$0xff]   ;;  %v3637_v29 = vld [vmem:[%s5179_s4 + $0x7a0] ss:$16 sps:$4 sm:$0xff]  }
  0x81   :  { %1924 = vmatprep.subr.bf16.mxu0 %v3561_v61  ;;  %v3642_v61 = vld [vmem:[%s5179_s4 + $0x3ac] ss:$16 sps:$4 sm:$0xff]  }
  0x82   :  { %1998 = vmatmul.mubr.bf16.vlgmr.msra.gmra.mrb[4].mxu1 %v4226_v34  ;;  %v3576_v34 = vld [vmem:[%s5179_s4 + $0x24c] ss:$16 sps:$4 sm:$0xff]  }
  0x83   :  { %1916 = vmatmul.mubr.bf16.vlgmr.msra.gmra.mrb[0].mxu0 %v4435_v63  ;;  %2007 = vmatpush1.bf16.msra.mxu1 %v3562_v2  ;;  %v3648_v2 = vld [vmem:[%s5179_s4 + $0x3cc] ss:$16 sps:$4 sm:$0xff]  }
  0x84   :  { %1925 = vmatpush1.bf16.msra.mxu0 %v3559_v1  ;;  %2008 = vmatprep.subr.bf16.mxu1 %v3570_v45  ;;  %v3645_v1 = vld [vmem:[%s5179_s4 + $0x7c4] ss:$16 sps:$4 sm:$0xff]   ;;  %v3646_v45 = vld [vmem:[%s5179_s4 + $0x3c8] ss:$16 sps:$4 sm:$0xff]  }
  0x85   :  { %1926 = vmatprep.subr.bf16.mxu0 %v3567_v5  ;;  %1956 = vmatprep.mubr.bf16.mxu0 %v4449_v7  ;;  %v3643_v5 = vld [vmem:[%s5179_s4 + $0x7c0] ss:$16 sps:$4 sm:$0xff]  }
  0x86   :  { %2038 = vmatprep.mubr.bf16.mxu1 %v4215_v54  ;;  %v3582_v54 = vld [vmem:[%s5179_s4 + $0x26c] ss:$16 sps:$4 sm:$0xff]  }
  0x87   :  { %2009 = vmatpush1.bf16.msra.mxu1 %v3568_v8  ;;  %v3654_v8 = vld [vmem:[%s5179_s4 + $0x3ec] ss:$16 sps:$4 sm:$0xff]  }
  0x88   :  { %1927 = vmatpush1.bf16.msra.mxu0 %v3565_v0  ;;  %2010 = vmatprep.subr.bf16.mxu1 %v3576_v34  ;;  %v3651_v0 = vld [vmem:[%s5179_s4 + $0x7e4] ss:$16 sps:$4 sm:$0xff]   ;;  %v3649_v34 = vld [vmem:[%s5179_s4 + $0x7e0] ss:$16 sps:$4 sm:$0xff]  }
  0x89   :  { %1928 = vmatprep.subr.bf16.mxu0 %v3573_v10  ;;  %v255_v10 = vmax.f32 %v4249_v46, 0.0  ;;  %v3655_v46 = vld [vmem:[%s5179_s4 + $0x408] ss:$16 sps:$4 sm:$0xff]  }
  0x8b   :  { %2011 = vmatpush1.bf16.msra.mxu1 %v3574_v13  ;;  %v3657_v13 = vld [vmem:[%s5179_s4 + $0x40c] ss:$16 sps:$4 sm:$0xff]  }
  0x8c   :  { %1929 = vmatpush1.bf16.msra.mxu0 %v3571_v11  ;;  %2012 = vmatprep.subr.bf16.mxu1 %v3582_v54  ;;  %v3652_v11 = vld [vmem:[%s5179_s4 + $0x3e8] ss:$16 sps:$4 sm:$0xff]   ;;  %v3660_v54 = vld [vmem:[%s5179_s4 + $0x42c] ss:$16 sps:$4 sm:$0xff]  }
  0x8d   :  { %1930 = vmatprep.subr.bf16.mxu0 %v3579_v12  ;;  %v4633_v12 = vpack.c.bf16 %v255_v10, %v255_v10  ;;  %v3759_v10 = vld [vmem:[%s5184_s7 + $0x24] ss:$8 sps:$4 sm:$0xff]  }
  0x8f   :  { %2013 = vmatpush1.bf16.msra.mxu1 %v3580_v15  ;;  %v3663_v15 = vld [vmem:[%s5179_s4 + $0x44c] ss:$16 sps:$4 sm:$0xff]  }
  0x90   :  { %1931 = vmatpush1.bf16.msra.mxu0 %v3577_v14  ;;  %2014 = vmatprep.subr.bf16.mxu1 %v3588_v17  ;;  %v3658_v14 = vld [vmem:[%s5179_s4 + $0x428] ss:$16 sps:$4 sm:$0xff]  }
  0x91   :  { %1932 = vmatprep.subr.bf16.mxu0 %v3585_v16  ;;  %v3751_v16 = vld [vmem:[%s5184_s7] ss:$8 sps:$4 sm:$0xff]  }
  0x92   :  { %v3661_v17 = vld [vmem:[%s5179_s4 + $0x448] ss:$16 sps:$4 sm:$0xff]  }
  0x93   :  { %2015 = vmatpush1.bf16.msra.mxu1 %v3586_v20  ;;  %v3669_v20 = vld [vmem:[%s5179_s4 + $0x48c] ss:$16 sps:$4 sm:$0xff]  }
  0x94   :  { %1933 = vmatpush1.bf16.msra.mxu0 %v3583_v18  ;;  %2016 = vmatprep.subr.bf16.mxu1 %v3594_v21  ;;  %v3666_v18 = vld [vmem:[%s5179_s4 + $0x46c] ss:$16 sps:$4 sm:$0xff]  }
  0x95   :  { %1934 = vmatprep.subr.bf16.mxu0 %v3591_v44  ;;  %v3667_v44 = vld [vmem:[%s5179_s4 + $0x488] ss:$16 sps:$4 sm:$0xff]   ;;  %v3672_v21 = vld [vmem:[%s5179_s4 + $0x4ac] ss:$16 sps:$4 sm:$0xff]  }
  0x97   :  { %2017 = vmatpush1.bf16.msra.mxu1 %v3592_v23  ;;  %v3675_v23 = vld [vmem:[%s5179_s4 + $0x4cc] ss:$16 sps:$4 sm:$0xff]  }
  0x98   :  { %1935 = vmatpush1.bf16.msra.mxu0 %v3589_v22  ;;  %2018 = vmatprep.subr.bf16.mxu1 %v3600_v19  ;;  %v3670_v22 = vld [vmem:[%s5179_s4 + $0x4a8] ss:$16 sps:$4 sm:$0xff]   ;;  %v3678_v19 = vld [vmem:[%s5179_s4 + $0x4ec] ss:$16 sps:$4 sm:$0xff]  }
  0x99   :  { %1936 = vmatprep.subr.bf16.mxu0 %v3597_v24  ;;  %v3673_v24 = vld [vmem:[%s5179_s4 + $0x4c8] ss:$16 sps:$4 sm:$0xff]  }
  0x9b   :  { %2019 = vmatpush1.bf16.msra.mxu1 %v3598_v26  ;;  %v3681_v26 = vld [vmem:[%s5179_s4 + $0x50c] ss:$16 sps:$4 sm:$0xff]  }
  0x9c   :  { %1937 = vmatpush1.bf16.msra.mxu0 %v3595_v25  ;;  %2020 = vmatprep.subr.bf16.mxu1 %v3606_v3  ;;  %v3676_v25 = vld [vmem:[%s5179_s4 + $0x4e8] ss:$16 sps:$4 sm:$0xff]   ;;  %v3684_v3 = vld [vmem:[%s5179_s4 + $0x52c] ss:$16 sps:$4 sm:$0xff]  }
  0x9d   :  { %1938 = vmatprep.subr.bf16.mxu0 %v3603_v60  ;;  %v3679_v60 = vld [vmem:[%s5179_s4 + $0x508] ss:$16 sps:$4 sm:$0xff]  }
  0x9f   :  { %2021 = vmatpush1.bf16.msra.mxu1 %v3604_v4  ;;  %v3687_v4 = vld [vmem:[%s5179_s4 + $0x54c] ss:$16 sps:$4 sm:$0xff]  }
  0xa0   :  { %1939 = vmatpush1.bf16.msra.mxu0 %v3601_v27  ;;  %2022 = vmatprep.subr.bf16.mxu1 %v3612_v28  ;;  %v3682_v27 = vld [vmem:[%s5179_s4 + $0x528] ss:$16 sps:$4 sm:$0xff]   ;;  %v3690_v28 = vld [vmem:[%s5179_s4 + $0x56c] ss:$16 sps:$4 sm:$0xff]  }
  0xa1   :  { %1940 = vmatprep.subr.bf16.mxu0 %v3609_v9  ;;  %v3685_v9 = vld [vmem:[%s5179_s4 + $0x548] ss:$16 sps:$4 sm:$0xff]  }
  0xa3   :  { %2023 = vmatpush1.bf16.msra.mxu1 %v3610_v31  ;;  %v3693_v31 = vld [vmem:[%s5179_s4 + $0x58c] ss:$16 sps:$4 sm:$0xff]  }
  0xa4   :  { %1941 = vmatpush1.bf16.msra.mxu0 %v3607_v30  ;;  %2024 = vmatprep.subr.bf16.mxu1 %v3618_v33  ;;  %v3688_v30 = vld [vmem:[%s5179_s4 + $0x568] ss:$16 sps:$4 sm:$0xff]   ;;  %v3696_v33 = vld [vmem:[%s5179_s4 + $0x5ac] ss:$16 sps:$4 sm:$0xff]  }
  0xa5   :  { %1942 = vmatprep.subr.bf16.mxu0 %v3615_v32  ;;  %v3691_v32 = vld [vmem:[%s5179_s4 + $0x588] ss:$16 sps:$4 sm:$0xff]  }
  0xa7   :  { %2025 = vmatpush1.bf16.msra.mxu1 %v3616_v36  ;;  %v3699_v36 = vld [vmem:[%s5179_s4 + $0x5cc] ss:$16 sps:$4 sm:$0xff]  }
  0xa8   :  { %1943 = vmatpush1.bf16.msra.mxu0 %v3613_v58  ;;  %2026 = vmatprep.subr.bf16.mxu1 %v3624_v6  ;;  %v3694_v58 = vld [vmem:[%s5179_s4 + $0x5a8] ss:$16 sps:$4 sm:$0xff]   ;;  %v3702_v6 = vld [vmem:[%s5179_s4 + $0x5ec] ss:$16 sps:$4 sm:$0xff]  }
  0xa9   :  { %1944 = vmatprep.subr.bf16.mxu0 %v3621_v38  ;;  %v3697_v38 = vld [vmem:[%s5179_s4 + $0x5c8] ss:$16 sps:$4 sm:$0xff]  }
  0xab   :  { %2027 = vmatpush1.bf16.msra.mxu1 %v3622_v40  ;;  %v3705_v40 = vld [vmem:[%s5179_s4 + $0x60c] ss:$16 sps:$4 sm:$0xff]  }
  0xac   :  { %1945 = vmatpush1.bf16.msra.mxu0 %v3619_v39  ;;  %2028 = vmatprep.subr.bf16.mxu1 %v3630_v42  ;;  %v3700_v39 = vld [vmem:[%s5179_s4 + $0x5e8] ss:$16 sps:$4 sm:$0xff]   ;;  %v3708_v42 = vld [vmem:[%s5179_s4 + $0x62c] ss:$16 sps:$4 sm:$0xff]  }
  0xad   :  { %1946 = vmatprep.subr.bf16.mxu0 %v3627_v41  ;;  %v3703_v41 = vld [vmem:[%s5179_s4 + $0x608] ss:$16 sps:$4 sm:$0xff]  }
  0xaf   :  { %2029 = vmatpush1.bf16.msra.mxu1 %v3628_v50  ;;  %v3711_v50 = vld [vmem:[%s5179_s4 + $0x64c] ss:$16 sps:$4 sm:$0xff]  }
  0xb0   :  { %1947 = vmatpush1.bf16.msra.mxu0 %v3625_v49  ;;  %2030 = vmatprep.subr.bf16.mxu1 %v3636_v55  ;;  %v3706_v49 = vld [vmem:[%s5179_s4 + $0x628] ss:$16 sps:$4 sm:$0xff]   ;;  %v3717_v55 = vld [vmem:[%s5179_s4 + $0x68c] ss:$16 sps:$4 sm:$0xff]  }
  0xb1   :  { %1948 = vmatprep.subr.bf16.mxu0 %v3633_v53  ;;  %v3709_v53 = vld [vmem:[%s5179_s4 + $0x648] ss:$16 sps:$4 sm:$0xff]  }
  0xb3   :  { %2031 = vmatpush1.bf16.msra.mxu1 %v3634_v57  ;;  %v3720_v57 = vld [vmem:[%s5179_s4 + $0x6ac] ss:$16 sps:$4 sm:$0xff]  }
  0xb4   :  { %1949 = vmatpush1.bf16.msra.mxu0 %v3631_v56  ;;  %2032 = vmatprep.subr.bf16.mxu1 %v3642_v61  ;;  %v3715_v56 = vld [vmem:[%s5179_s4 + $0x688] ss:$16 sps:$4 sm:$0xff]   ;;  %v3723_v61 = vld [vmem:[%s5179_s4 + $0x6cc] ss:$16 sps:$4 sm:$0xff]  }
  0xb5   :  { %1950 = vmatprep.subr.bf16.mxu0 %v3639_v59  ;;  %v3718_v59 = vld [vmem:[%s5179_s4 + $0x6a8] ss:$16 sps:$4 sm:$0xff]  }
  0xb7   :  { %2033 = vmatpush1.bf16.msra.mxu1 %v3640_v62  ;;  %v3756_v62 = vld [vmem:[%s5184_s7 + $0x14] ss:$8 sps:$4 sm:$0xff]  }
  0xb8   :  { %1951 = vmatpush1.bf16.msra.mxu0 %v3637_v29  ;;  %2034 = vmatprep.subr.bf16.mxu1 %v3648_v2  ;;  %v3754_v2 = vld [vmem:[%s5184_s7 + $0x10] ss:$8 sps:$4 sm:$0xff]  }
  0xb9   :  { %1952 = vmatprep.subr.bf16.mxu0 %v3645_v1 }
  0xbb   :  { %2035 = vmatpush1.bf16.msra.mxu1 %v3646_v45  ;;  %v3721_v45 = vld [vmem:[%s5179_s4 + $0x6c8] ss:$16 sps:$4 sm:$0xff]  }
  0xbc   :  { %1953 = vmatpush1.bf16.msra.mxu0 %v3643_v5  ;;  %2036 = vmatprep.subr.bf16.mxu1 %v3654_v8  ;;  %v3726_v8 = vld [vmem:[%s5179_s4 + $0x6ec] ss:$16 sps:$4 sm:$0xff]  }
  0xbd   :  { %1954 = vmatprep.subr.bf16.mxu0 %v3651_v0 }
  0xbf   :  { %2037 = vmatpush1.bf16.msra.mxu1 %v3652_v11  ;;  %v3724_v11 = vld [vmem:[%s5179_s4 + $0x6e8] ss:$16 sps:$4 sm:$0xff]  }
  0xc0   :  { %1955 = vmatpush1.bf16.msra.mxu0 %v3649_v34  ;;  %2047 = vmatprep.subr.bf16.mxu1 %v3657_v13  ;;  %v3757_v34 = vld [vmem:[%s5184_s7 + $0x20] ss:$8 sps:$4 sm:$0xff]   ;;  %v3729_v13 = vld [vmem:[%s5179_s4 + $0x70c] ss:$16 sps:$4 sm:$0xff]  }
  0xc2   :  { %2039 = vmatmul.mubr.bf16.vlgmr.msra.gmra.mrb[4].mxu1 %v4229_v35  ;;  %v3753_v35 = vld [vmem:[%s5184_s7 + $0x4] ss:$8 sps:$4 sm:$0xff]  }
  0xc3   :  { %1957 = vmatmul.mubr.bf16.vlgmr.msra.gmra.mrb[0].mxu0 %v4633_v12  ;;  %2048 = vmatpush1.bf16.msra.mxu1 %v3655_v46  ;;  %v3762_v46 = vld [vmem:[%s5184_s7 + $0x34] ss:$8 sps:$4 sm:$0xff]  }
  0xc4   :  { %2079 = vmatprep.mubr.bf16.mxu1 %v4243_v43  ;;  %2049 = vmatprep.subr.bf16.mxu1 %v3660_v54  ;;  %v3664_v43 = vld [vmem:[%s5179_s4 + $0x468] ss:$16 sps:$4 sm:$0xff]  }
  0xc5   :  { %2659 = vmatprep.subr.bf16.mxu0 %v3753_v35  ;;  %v3760_v54 = vld [vmem:[%s5184_s7 + $0x30] ss:$8 sps:$4 sm:$0xff]   ;;  %v3763_v35 = vld [vmem:[%s5184_s7 + $0x40] ss:$8 sps:$4 sm:$0xff]  }
  0xc6   :  { %2660 = vmatpush1.bf16.msra.mxu0 %v3751_v16  ;;  %v3765_v16 = vld [vmem:[%s5184_s7 + $0x44] ss:$8 sps:$4 sm:$0xff]  }
  0xc7   :  { %2050 = vmatpush1.bf16.msra.mxu1 %v3658_v14  ;;  %2661 = vmatprep.subr.bf16.mxu0 %v3756_v62  ;;  %v3727_v14 = vld [vmem:[%s5179_s4 + $0x708] ss:$16 sps:$4 sm:$0xff]  }
  0xc8   :  { %2051 = vmatprep.subr.bf16.mxu1 %v3663_v15  ;;  %v3732_v15 = vld [vmem:[%s5179_s4 + $0x72c] ss:$16 sps:$4 sm:$0xff]  }
  0xca   :  { %2662 = vmatpush1.bf16.msra.mxu0 %v3754_v2 }
  0xcb   :  { %2052 = vmatpush1.bf16.msra.mxu1 %v3661_v17  ;;  %2663 = vmatprep.subr.bf16.mxu0 %v3759_v10  ;;  %v3730_v17 = vld [vmem:[%s5179_s4 + $0x728] ss:$16 sps:$4 sm:$0xff]  }
  0xcc   :  { %2053 = vmatprep.subr.bf16.mxu1 %v3666_v18  ;;  %v3735_v18 = vld [vmem:[%s5179_s4 + $0x74c] ss:$16 sps:$4 sm:$0xff]  }
  0xce   :  { %2664 = vmatpush1.bf16.msra.mxu0 %v3757_v34 }
  0xcf   :  { %2054 = vmatpush1.bf16.msra.mxu1 %v3664_v43  ;;  %2665 = vmatprep.subr.bf16.mxu0 %v3762_v46  ;;  %v3768_v43 = vld [vmem:[%s5184_s7 + $0x54] ss:$8 sps:$4 sm:$0xff]  }
  0xd0   :  { %2055 = vmatprep.subr.bf16.mxu1 %v3669_v20  ;;  %v3766_v20 = vld [vmem:[%s5184_s7 + $0x50] ss:$8 sps:$4 sm:$0xff]  }
  0xd2   :  { %2666 = vmatpush1.bf16.msra.mxu0 %v3760_v54 }
  0xd3   :  { %2056 = vmatpush1.bf16.msra.mxu1 %v3667_v44  ;;  %2667 = vmatprep.subr.bf16.mxu0 %v3765_v16  ;;  %v3733_v44 = vld [vmem:[%s5179_s4 + $0x748] ss:$16 sps:$4 sm:$0xff]  }
  0xd4   :  { %2057 = vmatprep.subr.bf16.mxu1 %v3672_v21  ;;  %v3738_v21 = vld [vmem:[%s5179_s4 + $0x76c] ss:$16 sps:$4 sm:$0xff]  }
  0xd6   :  { %2668 = vmatpush1.bf16.msra.mxu0 %v3763_v35 }
  0xd7   :  { %2058 = vmatpush1.bf16.msra.mxu1 %v3670_v22  ;;  %2669 = vmatprep.subr.bf16.mxu0 %v3768_v43  ;;  %v3771_v22 = vld [vmem:[%s5184_s7 + $0x64] ss:$8 sps:$4 sm:$0xff]  }
  0xd8   :  { %2059 = vmatprep.subr.bf16.mxu1 %v3675_v23  ;;  %v3769_v23 = vld [vmem:[%s5184_s7 + $0x60] ss:$8 sps:$4 sm:$0xff]  }
  0xda   :  { %2670 = vmatpush1.bf16.msra.mxu0 %v3766_v20 }
  0xdb   :  { %2060 = vmatpush1.bf16.msra.mxu1 %v3673_v24  ;;  %v3736_v24 = vld [vmem:[%s5179_s4 + $0x768] ss:$16 sps:$4 sm:$0xff]   ;;  %2671 = vmatprep.subr.bf16.mxu0 %v3771_v22 }
  0xdc   :  { %2061 = vmatprep.subr.bf16.mxu1 %v3678_v19  ;;  %v3741_v19 = vld [vmem:[%s5179_s4 + $0x78c] ss:$16 sps:$4 sm:$0xff]  }
  0xde   :  { %2672 = vmatpush1.bf16.msra.mxu0 %v3769_v23 }
  0xdf   :  { %2062 = vmatpush1.bf16.msra.mxu1 %v3676_v25  ;;  %v3774_v25 = vld [vmem:[%s5184_s7 + $0x74] ss:$8 sps:$4 sm:$0xff]  }
  0xe0   :  { %2063 = vmatprep.subr.bf16.mxu1 %v3681_v26  ;;  %v3772_v26 = vld [vmem:[%s5184_s7 + $0x70] ss:$8 sps:$4 sm:$0xff]   ;;  %2673 = vmatprep.subr.bf16.mxu0 %v3774_v25 }
  0xe2   :  { %2674 = vmatpush1.bf16.msra.mxu0 %v3772_v26 }
  0xe3   :  { %2064 = vmatpush1.bf16.msra.mxu1 %v3679_v60  ;;  %v3739_v60 = vld [vmem:[%s5179_s4 + $0x788] ss:$16 sps:$4 sm:$0xff]  }
  0xe4   :  { %2065 = vmatprep.subr.bf16.mxu1 %v3684_v3  ;;  %v3744_v3 = vld [vmem:[%s5179_s4 + $0x7ac] ss:$16 sps:$4 sm:$0xff]  }
  0xe7   :  { %2066 = vmatpush1.bf16.msra.mxu1 %v3682_v27  ;;  %v3777_v27 = vld [vmem:[%s5184_s7 + $0x84] ss:$8 sps:$4 sm:$0xff]  }
  0xe8   :  { %2067 = vmatprep.subr.bf16.mxu1 %v3687_v4  ;;  %v3775_v4 = vld [vmem:[%s5184_s7 + $0x80] ss:$8 sps:$4 sm:$0xff]   ;;  %2675 = vmatprep.subr.bf16.mxu0 %v3777_v27 }
  0xe9   :  { %2676 = vmatpush1.bf16.msra.mxu0 %v3775_v4 }
  0xeb   :  { %2068 = vmatpush1.bf16.msra.mxu1 %v3685_v9  ;;  %v3742_v9 = vld [vmem:[%s5179_s4 + $0x7a8] ss:$16 sps:$4 sm:$0xff]  }
  0xec   :  { %2069 = vmatprep.subr.bf16.mxu1 %v3690_v28  ;;  %v3747_v28 = vld [vmem:[%s5179_s4 + $0x7cc] ss:$16 sps:$4 sm:$0xff]  }
  0xef   :  { %2070 = vmatpush1.bf16.msra.mxu1 %v3688_v30  ;;  %v3780_v30 = vld [vmem:[%s5184_s7 + $0x94] ss:$8 sps:$4 sm:$0xff]  }
  0xf0   :  { %2071 = vmatprep.subr.bf16.mxu1 %v3693_v31  ;;  %v3778_v31 = vld [vmem:[%s5184_s7 + $0x90] ss:$8 sps:$4 sm:$0xff]   ;;  %2677 = vmatprep.subr.bf16.mxu0 %v3780_v30 }
  0xf1   :  { %2678 = vmatpush1.bf16.msra.mxu0 %v3778_v31 }
  0xf3   :  { %2072 = vmatpush1.bf16.msra.mxu1 %v3691_v32  ;;  %v3745_v32 = vld [vmem:[%s5179_s4 + $0x7c8] ss:$16 sps:$4 sm:$0xff]  }
  0xf4   :  { %2073 = vmatprep.subr.bf16.mxu1 %v3696_v33  ;;  %v3750_v33 = vld [vmem:[%s5179_s4 + $0x7ec] ss:$16 sps:$4 sm:$0xff]  }
  0xf7   :  { %2074 = vmatpush1.bf16.msra.mxu1 %v3694_v58  ;;  %v3783_v58 = vld [vmem:[%s5184_s7 + $0xa4] ss:$8 sps:$4 sm:$0xff]  }
  0xf8   :  { %2075 = vmatprep.subr.bf16.mxu1 %v3699_v36  ;;  %v3781_v36 = vld [vmem:[%s5184_s7 + $0xa0] ss:$8 sps:$4 sm:$0xff]   ;;  %2679 = vmatprep.subr.bf16.mxu0 %v3783_v58 }
  0xf9   :  { %2680 = vmatpush1.bf16.msra.mxu0 %v3781_v36  ;;  %v4947_v58 = vld [vmem:[%s5186_s6] sm:$0xf] }
  0xfb   :  { %2076 = vmatpush1.bf16.msra.mxu1 %v3697_v38  ;;  %v3748_v38 = vld [vmem:[%s5179_s4 + $0x7e8] ss:$16 sps:$4 sm:$0xff]  }
  0xfc   :  { %2077 = vmatprep.subr.bf16.mxu1 %v3702_v6  ;;  %v3786_v6 = vld [vmem:[%s5184_s7 + $0xb4] ss:$8 sps:$4 sm:$0xff]  }
  0xfd   :  { %2681 = vmatprep.subr.bf16.mxu0 %v3786_v6 }
  0xff   :  { %2078 = vmatpush1.bf16.msra.mxu1 %v3700_v39  ;;  %v3784_v39 = vld [vmem:[%s5184_s7 + $0xb0] ss:$8 sps:$4 sm:$0xff]  }
 0x100   :  { %2088 = vmatprep.subr.bf16.mxu1 %v3705_v40  ;;  %2682 = vmatpush1.bf16.msra.mxu0 %v3784_v39  ;;  %v3789_v40 = vld [vmem:[%s5184_s7 + $0xc4] ss:$8 sps:$4 sm:$0xff]  }
 0x101   :  { %2683 = vmatprep.subr.bf16.mxu0 %v3789_v40 }
 0x102   :  { %2080 = vmatmul.mubr.bf16.vlgmr.msra.gmra.mrb[4].mxu1 %v4435_v63  ;;  %v3714_v63 = vld [vmem:[%s5179_s4 + $0x66c] ss:$16 sps:$4 sm:$0xff]  }
 0x103   :  { %2089 = vmatpush1.bf16.msra.mxu1 %v3703_v41  ;;  %2120 = vmatprep.mubr.bf16.mxu1 %v4449_v7  ;;  %v3712_v7 = vld [vmem:[%s5179_s4 + $0x668] ss:$16 sps:$4 sm:$0xff]  }
 0x104   :  { %2090 = vmatprep.subr.bf16.mxu1 %v3708_v42  ;;  %v3787_v41 = vld [vmem:[%s5184_s7 + $0xc0] ss:$8 sps:$4 sm:$0xff]   ;;  %v3792_v42 = vld [vmem:[%s5184_s7 + $0xd4] ss:$8 sps:$4 sm:$0xff]  }
 0x105   :  { %2684 = vmatpush1.bf16.msra.mxu0 %v3787_v41  ;;  %v2246_v41 = vrot.slane %v4947_v58, %v4059_v48 }
 0x106   :  { %2685 = vmatprep.subr.bf16.mxu0 %v3792_v42 }
 0x107   :  { %2091 = vmatpush1.bf16.msra.mxu1 %v3706_v49  ;;  %v3790_v49 = vld [vmem:[%s5184_s7 + $0xd0] ss:$8 sps:$4 sm:$0xff]  }
 0x108   :  { %2092 = vmatprep.subr.bf16.mxu1 %v3711_v50  ;;  %v3793_v50 = vld [vmem:[%s5184_s7 + $0xe0] ss:$8 sps:$4 sm:$0xff]  }
 0x109   :  { %2686 = vmatpush1.bf16.msra.mxu0 %v3790_v49  ;;  %v2250_v49 = vrot.slane %v4947_v58, %v4056_v47 }
 0x10b   :  { %2093 = vmatpush1.bf16.msra.mxu1 %v3709_v53  ;;  %v3798_v53 = vld [vmem:[%s5184_s7 + $0xf4] ss:$8 sps:$4 sm:$0xff]  }
 0x10c   :  { %2094 = vmatprep.subr.bf16.mxu1 %v3714_v63  ;;  %v3796_v63 = vld [vmem:[%s5184_s7 + $0xf0] ss:$8 sps:$4 sm:$0xff]  }
 0x10f   :  { %2095 = vmatpush1.bf16.msra.mxu1 %v3712_v7  ;;  %v3801_v7 = vld [vmem:[%s5184_s7 + $0x104] ss:$8 sps:$4 sm:$0xff]  }
 0x110   :  { %2096 = vmatprep.subr.bf16.mxu1 %v3717_v55 }
 0x113   :  { %2097 = vmatpush1.bf16.msra.mxu1 %v3715_v56 }
 0x114   :  { %2098 = vmatprep.subr.bf16.mxu1 %v3720_v57 }
 0x115   :  { %v4778_v29 = vpop.f32.mrb[0].mxu1 }
 0x116   :  { %v4783_v1 = vpop.f32.mrb[1].mxu1 }
 0x117   :  { %v1839_v5 = vpop.f32.mrb[2].mxu1  ;;  %2099 = vmatpush1.bf16.msra.mxu1 %v3718_v59 }
 0x118   :  { %v1840_v0 = vpop.f32.mrb[3].mxu1  ;;  %2100 = vmatprep.subr.bf16.mxu1 %v3723_v61 }
 0x11b   :  { %2101 = vmatpush1.bf16.msra.mxu1 %v3721_v45 }
 0x11c   :  { %2102 = vmatprep.subr.bf16.mxu1 %v3726_v8 }
 0x11f   :  { %2103 = vmatpush1.bf16.msra.mxu1 %v3724_v11 }
 0x120   :  { %2104 = vmatprep.subr.bf16.mxu1 %v3729_v13 }
 0x123   :  { %2105 = vmatpush1.bf16.msra.mxu1 %v3727_v14 }
 0x124   :  { %2106 = vmatprep.subr.bf16.mxu1 %v3732_v15 }
 0x127   :  { %2107 = vmatpush1.bf16.msra.mxu1 %v3730_v17 }
 0x128   :  { %2108 = vmatprep.subr.bf16.mxu1 %v3735_v18 }
 0x12b   :  { %2109 = vmatpush1.bf16.msra.mxu1 %v3733_v44 }
 0x12c   :  { %2110 = vmatprep.subr.bf16.mxu1 %v3738_v21 }
 0x12f   :  { %2111 = vmatpush1.bf16.msra.mxu1 %v3736_v24 }
 0x130   :  { %2112 = vmatprep.subr.bf16.mxu1 %v3741_v19 }
 0x133   :  { %2113 = vmatpush1.bf16.msra.mxu1 %v3739_v60 }
 0x134   :  { %2114 = vmatprep.subr.bf16.mxu1 %v3744_v3 }
 0x137   :  { %2115 = vmatpush1.bf16.msra.mxu1 %v3742_v9 }
 0x138   :  { %2116 = vmatprep.subr.bf16.mxu1 %v3747_v28 }
 0x13b   :  { %2117 = vmatpush1.bf16.msra.mxu1 %v3745_v32 }
 0x13c   :  { %2118 = vmatprep.subr.bf16.mxu1 %v3750_v33  ;;  %v4942_v33 = vld [vmem:[%s5185_s5] sm:$0xf] }
 0x13d   :  { %v2220_v36 = vrot.slane %v4942_v33, %v4059_v48  ;;  %v2224_v6 = vrot.slane %v4942_v33, %v4056_v47 }
 0x13f   :  { %2119 = vmatpush1.bf16.msra.mxu1 %v3748_v38 }
 0x142   :  { %2121 = vmatmul.mubr.bf16.vlgmr.msra.gmra.mrb[4].mxu1 %v4633_v12  ;;  %v3795_v12 = vld [vmem:[%s5184_s7 + $0xe4] ss:$8 sps:$4 sm:$0xff]  }
 0x143   :  { %2687 = vmatprep.subr.bf16.mxu0 %v3795_v12 }
 0x144   :  { %2688 = vmatpush1.bf16.msra.mxu0 %v3793_v50 }
 0x145   :  { %2689 = vmatprep.subr.bf16.mxu0 %v3798_v53 }
 0x148   :  { %2690 = vmatpush1.bf16.msra.mxu0 %v3796_v63 }
 0x149   :  { %2700 = vmatprep.subr.bf16.mxu0 %v3801_v7 }
 0x196   :  { %v1958_v55 = vpop.f32.mrb[0].mxu0 }
 0x197   :  { %v3335_v56 = vadd.f32 %v1958_v55, %v4778_v29  ;;  %v1960_v57 = vpop.f32.mrb[1].mxu0 }
 0x198   :  { %v3336_v59 = vadd.f32 %v1960_v57, %v4783_v1  ;;  %v1962_v61 = vpop.f32.mrb[2].mxu0  ;;  %v3799_v57 = vld [vmem:[%s5184_s7 + $0x100] ss:$8 sps:$4 sm:$0xff]  }
 0x199   :  { %v2130_v62 = vsel %vm2129_vm0, %v3335_v56, 0.0  ;;  %v1963_v2 = vpop.f32.mrb[3].mxu0  ;;  %v3804_v61 = vld [vmem:[%s5184_s7 + $0x114] ss:$8 sps:$4 sm:$0xff]  }
 0x19a   :  { %v2131_v5 = vrot.slane %v2130_v62, 4  ;;  %v2137_v45 = vsel %vm2129_vm0, %v3336_v59, 0.0  ;;  %v3807_v2 = vld [vmem:[%s5184_s7 + $0x124] ss:$8 sps:$4 sm:$0xff]  }
 0x19b   :  { %v2138_v0 = vrot.slane %v2137_v45, 4 }
 0x19c   :  { %v2132_v8 = vadd.f32 %v2131_v5, %v2130_v62  ;;  %v3802_v62 = vld [vmem:[%s5184_s7 + $0x110] ss:$8 sps:$4 sm:$0xff]   ;;  %v3805_v5 = vld [vmem:[%s5184_s7 + $0x120] ss:$8 sps:$4 sm:$0xff]  }
 0x19d   :  { %v2139_v10 = vadd.f32 %v2138_v0, %v2137_v45  ;;  %v3810_v45 = vld [vmem:[%s5184_s7 + $0x134] ss:$8 sps:$4 sm:$0xff]   ;;  %v3808_v0 = vld [vmem:[%s5184_s7 + $0x130] ss:$8 sps:$4 sm:$0xff]  }
 0x19e   :  { %v2133_v34 = vrot.slane %v2132_v8, 2 }
 0x19f   :  { %v2140_v11 = vrot.slane %v2139_v10, 2 }
 0x1a0   :  { %v2134_v13 = vadd.f32 %v2133_v34, %v2132_v8  ;;  %v3813_v8 = vld [vmem:[%s5184_s7 + $0x144] ss:$8 sps:$4 sm:$0xff]   ;;  %v3816_v34 = vld [vmem:[%s5184_s7 + $0x154] ss:$8 sps:$4 sm:$0xff]  }
 0x1a1   :  { %v2141_v46 = vadd.f32 %v2140_v11, %v2139_v10  ;;  %v3811_v10 = vld [vmem:[%s5184_s7 + $0x140] ss:$8 sps:$4 sm:$0xff]   ;;  %v3814_v11 = vld [vmem:[%s5184_s7 + $0x150] ss:$8 sps:$4 sm:$0xff]  }
 0x1a2   :  { %v2135_v54 = vrot.slane %v2134_v13, 1 }
 0x1a3   :  { %v2142_v14 = vrot.slane %v2141_v46, 1 }
 0x1a4   :  { %v2136_v29 = vadd.f32 %v2135_v54, %v2134_v13  ;;  %v3819_v13 = vld [vmem:[%s5184_s7 + $0x164] ss:$8 sps:$4 sm:$0xff]   ;;  %v3822_v54 = vld [vmem:[%s5184_s7 + $0x174] ss:$8 sps:$4 sm:$0xff]  }
 0x1a5   :  { %v2143_v15 = vadd.f32 %v2142_v14, %v2141_v46  ;;  %v3817_v46 = vld [vmem:[%s5184_s7 + $0x160] ss:$8 sps:$4 sm:$0xff]   ;;  %v3820_v14 = vld [vmem:[%s5184_s7 + $0x170] ss:$8 sps:$4 sm:$0xff]  }
 0x1a6   :  { %v2159_v16 = vmul.f32 0.5, %v2136_v29  ;;  %v3825_v29 = vld [vmem:[%s5184_s7 + $0x184] ss:$8 sps:$4 sm:$0xff]  }
 0x1a7   :  { %v2160_v1 = vmul.f32 0.5, %v2143_v15  ;;  %v3823_v15 = vld [vmem:[%s5184_s7 + $0x180] ss:$8 sps:$4 sm:$0xff]  }
 0x1a8   :  { %v2163_v35 = vsub.f32 %v3335_v56, %v2159_v16  ;;  %v3828_v16 = vld [vmem:[%s5184_s7 + $0x194] ss:$8 sps:$4 sm:$0xff]  }
 0x1a9   :  { %v2164_v17 = vsub.f32 %v3336_v59, %v2160_v1  ;;  %v3826_v1 = vld [vmem:[%s5184_s7 + $0x190] ss:$8 sps:$4 sm:$0xff]  }
 0x1aa   :  { %v2167_v18 = vmul.f32 %v2163_v35, %v2163_v35 }
 0x1ab   :  { %v2168_v43 = vmul.f32 %v2164_v17, %v2164_v17 }
 0x1ac   :  { %v2171_v20 = vsel %vm2129_vm0, %v2167_v18, 0.0  ;;  %v3834_v18 = vld [vmem:[%s5184_s7 + $0x1b4] ss:$8 sps:$4 sm:$0xff]  }
 0x1ad   :  { %v2172_v44 = vrot.slane %v2171_v20, 4  ;;  %v2178_v21 = vsel %vm2129_vm0, %v2168_v43, 0.0  ;;  %v3832_v43 = vld [vmem:[%s5184_s7 + $0x1b0] ss:$8 sps:$4 sm:$0xff]  }
 0x1ae   :  { %v2179_v22 = vrot.slane %v2178_v21, 4 }
 0x1af   :  { %v2173_v23 = vadd.f32 %v2172_v44, %v2171_v20  ;;  %v3837_v20 = vld [vmem:[%s5184_s7 + $0x1c4] ss:$8 sps:$4 sm:$0xff]   ;;  %v3835_v44 = vld [vmem:[%s5184_s7 + $0x1c0] ss:$8 sps:$4 sm:$0xff]  }
 0x1b0   :  { %v2180_v24 = vadd.f32 %v2179_v22, %v2178_v21  ;;  %v3840_v21 = vld [vmem:[%s5184_s7 + $0x1d4] ss:$8 sps:$4 sm:$0xff]   ;;  %v3838_v22 = vld [vmem:[%s5184_s7 + $0x1d0] ss:$8 sps:$4 sm:$0xff]  }
 0x1b1   :  { %v2174_v19 = vrot.slane %v2173_v23, 2 }
 0x1b2   :  { %v2181_v25 = vrot.slane %v2180_v24, 2 }
 0x1b3   :  { %v2175_v26 = vadd.f32 %v2174_v19, %v2173_v23  ;;  %v3843_v23 = vld [vmem:[%s5184_s7 + $0x1e4] ss:$8 sps:$4 sm:$0xff]   ;;  %v3846_v19 = vld [vmem:[%s5184_s7 + $0x1f4] ss:$8 sps:$4 sm:$0xff]  }
 0x1b4   :  { %v2182_v60 = vadd.f32 %v2181_v25, %v2180_v24  ;;  %v3841_v24 = vld [vmem:[%s5184_s7 + $0x1e0] ss:$8 sps:$4 sm:$0xff]   ;;  %v3844_v25 = vld [vmem:[%s5184_s7 + $0x1f0] ss:$8 sps:$4 sm:$0xff]  }
 0x1b5   :  { %v2176_v3 = vrot.slane %v2175_v26, 1 }
 0x1b6   :  { %v2183_v27 = vrot.slane %v2182_v60, 1 }
 0x1b7   :  { %v2177_v4 = vadd.f32 %v2176_v3, %v2175_v26 }
 0x1b8   :  { %v2184_v9 = vadd.f32 %v2183_v27, %v2182_v60 }
 0x1b9   :  { %v2199_v28 = vmul.f32 0.5, %v2177_v4 }
 0x1ba   :  { %v2200_v30 = vmul.f32 0.5, %v2184_v9 }
 0x1bb   :  { %v2203_v31 = vadd.f32 1e-05, %v2199_v28 }
 0x1bc   :  { %v2204_v32 = vadd.f32 1e-05, %v2200_v30 }
 0x1bd   :  { %3847 = vrsqrt.f32 %v2203_v31 }
 0x1be   :  { %3849 = vrsqrt.f32 %v2204_v32 }
 0x1c7   :  { %v3848_v38 = vpop.eup %3847 }
 0x1c8   :  { %v3850_v39 = vpop.eup %3849  ;;  %v2211_v40 = vmul.f32 %v3848_v38, %v2163_v35  ;;  %v3831_v35 = vld [vmem:[%s5184_s7 + $0x1a4] ss:$8 sps:$4 sm:$0xff]  }
 0x1c9   :  { %v2212_v42 = vmul.f32 %v3850_v39, %v2164_v17  ;;  %v3829_v17 = vld [vmem:[%s5184_s7 + $0x1a0] ss:$8 sps:$4 sm:$0xff]  }
 0x1ca   :  { %v2237_v12 = vmul.f32 %v2220_v36, %v2211_v40 }
 0x1cb   :  { %v2238_v50 = vmul.f32 %v2224_v6, %v2212_v42 }
 0x1cc   :  { %v2263_v53 = vadd.f32 %v2246_v41, %v2237_v12 }
 0x1cd   :  { %v2264_v63 = vadd.f32 %v2250_v49, %v2238_v50 }
 0x1ce   :  { %v2267_v7 = vmax.f32 %v2263_v53, 0.0 }
 0x1cf   :  { %v2268_v55 = vmax.f32 %v2264_v63, 0.0 }
 0x1d0   :  { %v2271_v59 = vpack.c.bf16 %v2267_v7, %v2267_v7 }
 0x1d1   :  { %v2272_v56 = vpack.c.bf16 %v2268_v55, %v2268_v55 }
 0x1d3   :  { %2691 = vmatprep.mubr.bf16.mxu0 %v2272_v56 }
 0x1d4   :  { %2692 = vmatmul.mubr.bf16.vlgmr.msra.gmra.mrb[4].mxu0 %v2271_v59 }
 0x1d5   :  { %2701 = vmatpush1.bf16.msra.mxu0 %v3799_v57 }
 0x1d6   :  { %2702 = vmatprep.subr.bf16.mxu0 %v3804_v61 }
 0x1d9   :  { %2703 = vmatpush1.bf16.msra.mxu0 %v3802_v62 }
 0x1da   :  { %2704 = vmatprep.subr.bf16.mxu0 %v3807_v2 }
 0x1dd   :  { %2705 = vmatpush1.bf16.msra.mxu0 %v3805_v5 }
 0x1de   :  { %2706 = vmatprep.subr.bf16.mxu0 %v3810_v45 }
 0x1e1   :  { %2707 = vmatpush1.bf16.msra.mxu0 %v3808_v0 }
 0x1e2   :  { %2708 = vmatprep.subr.bf16.mxu0 %v3813_v8 }
 0x1e5   :  { %2709 = vmatpush1.bf16.msra.mxu0 %v3811_v10 }
 0x1e6   :  { %2710 = vmatprep.subr.bf16.mxu0 %v3816_v34 }
 0x1e9   :  { %2711 = vmatpush1.bf16.msra.mxu0 %v3814_v11 }
 0x1ea   :  { %2712 = vmatprep.subr.bf16.mxu0 %v3819_v13 }
 0x1ed   :  { %2713 = vmatpush1.bf16.msra.mxu0 %v3817_v46 }
 0x1ee   :  { %2714 = vmatprep.subr.bf16.mxu0 %v3822_v54 }
 0x1f1   :  { %2715 = vmatpush1.bf16.msra.mxu0 %v3820_v14 }
 0x1f2   :  { %2716 = vmatprep.subr.bf16.mxu0 %v3825_v29 }
 0x1f5   :  { %2717 = vmatpush1.bf16.msra.mxu0 %v3823_v15  ;;  %v2228_v15 = vrot.slane %v4942_v33, %v4071_v52 }
 0x1f6   :  { %2718 = vmatprep.subr.bf16.mxu0 %v3828_v16 }
 0x1f9   :  { %2719 = vmatpush1.bf16.msra.mxu0 %v3826_v1  ;;  %v2232_v1 = vrot.slane %v4942_v33, %v4068_v51  ;;  %v2829_v33 = vld [vmem:[%s5187_s10 + $0x80] sm:$0xff] }
 0x1fa   :  { %2720 = vmatprep.subr.bf16.mxu0 %v3831_v35 }
 0x1fd   :  { %2721 = vmatpush1.bf16.msra.mxu0 %v3829_v17 }
 0x1fe   :  { %2722 = vmatprep.subr.bf16.mxu0 %v3834_v18  ;;  %v2254_v18 = vrot.slane %v4947_v58, %v4071_v52  ;;  %v2830_v52 = vld [vmem:[%s5187_s10 + $0x88] sm:$0xff] }
 0x201   :  { %2723 = vmatpush1.bf16.msra.mxu0 %v3832_v43 }
 0x202   :  { %2724 = vmatprep.subr.bf16.mxu0 %v3837_v20  ;;  %v2258_v20 = vrot.slane %v4947_v58, %v4068_v51  ;;  %v2813_v51 = vld [vmem:[%s5187_s10] sm:$0xff]  ;;  %v2814_v58 = vld [vmem:[%s5187_s10 + $0x8] sm:$0xff] }
 0x205   :  { %2725 = vmatpush1.bf16.msra.mxu0 %v3835_v44 }
 0x206   :  { %2726 = vmatprep.subr.bf16.mxu0 %v3840_v21 }
 0x209   :  { %2727 = vmatpush1.bf16.msra.mxu0 %v3838_v22 }
 0x20a   :  { %2728 = vmatprep.subr.bf16.mxu0 %v3843_v23 }
 0x20d   :  { %2729 = vmatpush1.bf16.msra.mxu0 %v3841_v24 }
 0x20e   :  { %2730 = vmatprep.subr.bf16.mxu0 %v3846_v19 }
 0x211   :  { %2731 = vmatpush1.bf16.msra.mxu0 %v3844_v25 }
 0x215   :  { %v2122_v26 = vpop.f32.mrb[4].mxu1 }
 0x216   :  { %v2144_v60 = vsel %vm2129_vm0, %v2122_v26, 0.0  ;;  %v2124_v3 = vpop.f32.mrb[5].mxu1 }
 0x217   :  { %v2145_v27 = vrot.slane %v2144_v60, 4  ;;  %v2151_v4 = vsel %vm2129_vm0, %v2124_v3, 0.0  ;;  %v2126_v9 = vpop.f32.mrb[6].mxu1 }
 0x218   :  { %v2152_v28 = vrot.slane %v2151_v4, 4  ;;  %v2127_v30 = vpop.f32.mrb[7].mxu1 }
 0x219   :  { %v2146_v31 = vadd.f32 %v2145_v27, %v2144_v60  ;;  %v3303_v60 = vpack.c.bf16 %v2830_v52, %v2829_v33  ;;  %v2831_v27 = vld [vmem:[%s5187_s10 + $0x90] sm:$0xff]  ;;  %v2816_v30 = vld [vmem:[%s5187_s10 + $0x18] sm:$0xff] }
 0x21a   :  { %v2153_v32 = vadd.f32 %v2152_v28, %v2151_v4  ;;  %v2832_v4 = vld [vmem:[%s5187_s10 + $0x98] sm:$0xff]  ;;  %v2815_v28 = vld [vmem:[%s5187_s10 + $0x10] sm:$0xff] }
 0x21b   :  { %v2147_v36 = vrot.slane %v2146_v31, 2  ;;  %3304 = vmatprep.subr.bf16.mxu1 %v3303_v60  ;;  %v3307_v9 = vpack.c.bf16 %v2832_v4, %v2831_v27 }
 0x21c   :  { %v2154_v38 = vrot.slane %v2153_v32, 2 }
 0x21d   :  { %v2148_v6 = vadd.f32 %v2147_v36, %v2146_v31  ;;  %v3309_v31 = vpack.c.bf16 %v2816_v30, %v2815_v28  ;;  %v2834_v36 = vld [vmem:[%s5187_s10 + $0xa8] sm:$0xff] }
 0x21e   :  { %v2155_v39 = vadd.f32 %v2154_v38, %v2153_v32  ;;  %v2833_v32 = vld [vmem:[%s5187_s10 + $0xa0] sm:$0xff] }
 0x21f   :  { %v2149_v40 = vrot.slane %v2148_v6, 1  ;;  %v3311_v38 = vpack.c.bf16 %v2834_v36, %v2833_v32 }
 0x220   :  { %v2156_v41 = vrot.slane %v2155_v39, 1 }
 0x221   :  { %v2150_v42 = vadd.f32 %v2149_v40, %v2148_v6  ;;  %v2817_v6 = vld [vmem:[%s5187_s10 + $0x20] sm:$0xff] }
 0x222   :  { %v2157_v49 = vadd.f32 %v2156_v41, %v2155_v39  ;;  %v2818_v39 = vld [vmem:[%s5187_s10 + $0x28] sm:$0xff]  ;;  %v2835_v41 = vld [vmem:[%s5187_s10 + $0xb0] sm:$0xff] }
 0x223   :  { %v2161_v12 = vmul.f32 0.5, %v2150_v42  ;;  %v3313_v40 = vpack.c.bf16 %v2818_v39, %v2817_v6  ;;  %v2836_v42 = vld [vmem:[%s5187_s10 + $0xb8] sm:$0xff] }
 0x224   :  { %v2162_v50 = vmul.f32 0.5, %v2157_v49  ;;  %v3315_v49 = vpack.c.bf16 %v2836_v42, %v2835_v41 }
 0x225   :  { %v2165_v53 = vsub.f32 %v2122_v26, %v2161_v12  ;;  %v2819_v12 = vld [vmem:[%s5187_s10 + $0x30] sm:$0xff] }
 0x226   :  { %v2166_v63 = vsub.f32 %v2124_v3, %v2162_v50  ;;  %v3305_v3 = vpack.c.bf16 %v2814_v58, %v2813_v51  ;;  %v2820_v50 = vld [vmem:[%s5187_s10 + $0x38] sm:$0xff] }
 0x227   :  { %v2169_v7 = vmul.f32 %v2165_v53, %v2165_v53 }
 0x228   :  { %v2170_v55 = vmul.f32 %v2166_v63, %v2166_v63  ;;  %3306 = vmatpush3.bf16.msra.mxu1 %v3305_v3 }
 0x229   :  { %v2185_v56 = vsel %vm2129_vm0, %v2169_v7, 0.0  ;;  %3308 = vmatprep.subr.bf16.mxu1 %v3307_v9  ;;  %v2838_v7 = vld [vmem:[%s5187_s10 + $0xc8] sm:$0xff] }
 0x22a   :  { %v2186_v57 = vrot.slane %v2185_v56, 4  ;;  %v2192_v59 = vsel %vm2129_vm0, %v2170_v55, 0.0 }
 0x22b   :  { %v2193_v61 = vrot.slane %v2192_v59, 4 }
 0x22c   :  { %v2187_v62 = vadd.f32 %v2186_v57, %v2185_v56  ;;  %3310 = vmatpush3.bf16.msra.mxu1 %v3309_v31  ;;  %v2821_v56 = vld [vmem:[%s5187_s10 + $0x40] sm:$0xff]  ;;  %v2822_v57 = vld [vmem:[%s5187_s10 + $0x48] sm:$0xff] }
 0x22d   :  { %v2194_v2 = vadd.f32 %v2193_v61, %v2192_v59  ;;  %3312 = vmatprep.subr.bf16.mxu1 %v3311_v38  ;;  %v3321_v59 = vpack.c.bf16 %v2822_v57, %v2821_v56  ;;  %v2839_v61 = vld [vmem:[%s5187_s10 + $0xd0] sm:$0xff] }
 0x22e   :  { %v2188_v5 = vrot.slane %v2187_v62, 2 }
 0x22f   :  { %v2195_v45 = vrot.slane %v2194_v2, 2 }
 0x230   :  { %v2189_v0 = vadd.f32 %v2188_v5, %v2187_v62  ;;  %3314 = vmatpush3.bf16.msra.mxu1 %v3313_v40  ;;  %v2840_v62 = vld [vmem:[%s5187_s10 + $0xd8] sm:$0xff]  ;;  %v2823_v5 = vld [vmem:[%s5187_s10 + $0x50] sm:$0xff] }
 0x231   :  { %v2196_v8 = vadd.f32 %v2195_v45, %v2194_v2  ;;  %3316 = vmatprep.subr.bf16.mxu1 %v3315_v49  ;;  %v3323_v2 = vpack.c.bf16 %v2840_v62, %v2839_v61  ;;  %v2824_v45 = vld [vmem:[%s5187_s10 + $0x58] sm:$0xff]  ;;  %v2797_v61 = vld [vmem:[%s5189_s9] sm:$0x3] }
 0x232   :  { %v2190_v10 = vrot.slane %v2189_v0, 1 }
 0x233   :  { %v2197_v34 = vrot.slane %v2196_v8, 1 }
 0x234   :  { %v2191_v11 = vadd.f32 %v2190_v10, %v2189_v0  ;;  %v3325_v0 = vpack.c.bf16 %v2824_v45, %v2823_v5  ;;  %v2842_v10 = vld [vmem:[%s5187_s10 + $0xe8] sm:$0xff] }
 0x235   :  { %v2198_v13 = vadd.f32 %v2197_v34, %v2196_v8  ;;  %v2841_v8 = vld [vmem:[%s5187_s10 + $0xe0] sm:$0xff] }
 0x236   :  { %v2201_v46 = vmul.f32 0.5, %v2191_v11  ;;  %v3327_v34 = vpack.c.bf16 %v2842_v10, %v2841_v8  ;;  %v2825_v11 = vld [vmem:[%s5187_s10 + $0x60] sm:$0xff]  ;;  %v2802_v8 = vrot.slane %v2797_v61, %v4059_v48 }
 0x237   :  { %v2202_v54 = vmul.f32 0.5, %v2198_v13  ;;  %v2826_v13 = vld [vmem:[%s5187_s10 + $0x68] sm:$0xff] }
 0x238   :  { %v2205_v14 = vadd.f32 1e-05, %v2201_v46  ;;  %v3329_v46 = vpack.c.bf16 %v2826_v13, %v2825_v11 }
 0x239   :  { %v2206_v29 = vadd.f32 1e-05, %v2202_v54  ;;  %v2843_v54 = vld [vmem:[%s5187_s10 + $0xf0] sm:$0xff] }
 0x23a   :  { %3851 = vrsqrt.f32 %v2205_v14  ;;  %v2844_v14 = vld [vmem:[%s5187_s10 + $0xf8] sm:$0xff] }
 0x23b   :  { %3853 = vrsqrt.f32 %v2206_v29  ;;  %v2827_v29 = vld [vmem:[%s5187_s10 + $0x70] sm:$0xff] }
 0x244   :  { %v3852_v16 = vpop.eup %3851 }
 0x245   :  { %v3854_v35 = vpop.eup %3853  ;;  %v2213_v17 = vmul.f32 %v3852_v16, %v2165_v53  ;;  %v3317_v53 = vpack.c.bf16 %v2820_v50, %v2819_v12  ;;  %v2828_v16 = vld [vmem:[%s5187_s10 + $0x78] sm:$0xff] }
 0x246   :  { %v2214_v43 = vmul.f32 %v3854_v35, %v2166_v63  ;;  %v2837_v63 = vld [vmem:[%s5187_s10 + $0xc0] sm:$0xff] }
 0x247   :  { %v2239_v44 = vmul.f32 %v2228_v15, %v2213_v17  ;;  %3318 = vmatpush3.bf16.msra.mxu1 %v3317_v53  ;;  %v3319_v55 = vpack.c.bf16 %v2838_v7, %v2837_v63  ;;  %v3331_v15 = vpack.c.bf16 %v2844_v14, %v2843_v54 }
 0x248   :  { %v2240_v21 = vmul.f32 %v2232_v1, %v2214_v43  ;;  %v3333_v1 = vpack.c.bf16 %v2828_v16, %v2827_v29 }
 0x249   :  { %v2265_v22 = vadd.f32 %v2254_v18, %v2239_v44  ;;  %3320 = vmatprep.subr.bf16.mxu1 %v3319_v55 }
 0x24a   :  { %v2266_v23 = vadd.f32 %v2258_v20, %v2240_v21 }
 0x24b   :  { %v2269_v24 = vmax.f32 %v2265_v22, 0.0  ;;  %3322 = vmatpush3.bf16.msra.mxu1 %v3321_v59  ;;  %v2783_v59 = vld [vmem:[%s5188_s8] sm:$0x3] }
 0x24c   :  { %v2270_v19 = vmax.f32 %v2266_v23, 0.0  ;;  %3324 = vmatprep.subr.bf16.mxu1 %v3323_v2  ;;  %v2788_v62 = vrot.slane %v2783_v59, %v4059_v48  ;;  %v2792_v5 = vrot.slane %v2783_v59, %v4056_v47  ;;  %v3266_v48 = vld [vmem:[%s5190_s11] ss:$0 sm:$0xff] }
 0x24d   :  { %v2273_v26 = vpack.c.bf16 %v2269_v24, %v2269_v24 }
 0x24e   :  { %v2274_v25 = vpack.c.bf16 %v2270_v19, %v2270_v19 }
 0x24f   :  { %3326 = vmatpush3.bf16.msra.mxu1 %v3325_v0 }
 0x250   :  { %2732 = vmatprep.mubr.bf16.mxu0 %v2274_v25  ;;  %3328 = vmatprep.subr.bf16.mxu1 %v3327_v34  ;;  %v2806_v34 = vrot.slane %v2797_v61, %v4056_v47  ;;  %v3860_v47 = vmov 0.0  }
 0x251   :  { %2733 = vmatmul.mubr.bf16.vlgmr.msra.gmra.mrb[4].mxu0 %v2273_v26 }
 0x253   :  { %3330 = vmatpush3.bf16.msra.mxu1 %v3329_v46 }
 0x254   :  { %3332 = vmatprep.subr.bf16.mxu1 %v3331_v15  ;;  %v2923_v15 = vand.u32 127, %v45_v37 }
 0x256   :  { %v2928_v16 = vand.u32 3, %v2923_v15 }
 0x257   :  { %3334 = vmatpush3.bf16.msra.mxu1 %v3333_v1 }
 0x258   :  { %vm2936_vm1 = vcmp.eq.s32.totalorder %v2928_v16, 0 }
 0x324   :  { %v2734_v35 = vpop.f32.mrb[4].mxu0 }
 0x325   :  { %v2741_v17 = vsel %vm2129_vm0, %v2734_v35, 0.0  ;;  %v2736_v18 = vpop.f32.mrb[5].mxu0 }
 0x326   :  { %v2742_v43 = vrot.slane %v2741_v17, 4  ;;  %v2748_v20 = vsel %vm2129_vm0, %v2736_v18, 0.0  ;;  %v2738_v44 = vpop.f32.mrb[6].mxu0 }
 0x327   :  { %v2749_v21 = vrot.slane %v2748_v20, 4  ;;  %v2739_v22 = vpop.f32.mrb[7].mxu0 }
 0x328   :  { %v2743_v23 = vadd.f32 %v2742_v43, %v2741_v17 }
 0x329   :  { %v2750_v24 = vadd.f32 %v2749_v21, %v2748_v20 }
 0x32a   :  { %v2744_v19 = vrot.slane %v2743_v23, 2 }
 0x32b   :  { %v2751_v25 = vrot.slane %v2750_v24, 2 }
 0x32c   :  { %v2745_v26 = vadd.f32 %v2744_v19, %v2743_v23 }
 0x32d   :  { %v2752_v33 = vadd.f32 %v2751_v25, %v2750_v24 }
 0x32e   :  { %v2746_v52 = vrot.slane %v2745_v26, 1 }
 0x32f   :  { %v2753_v60 = vrot.slane %v2752_v33, 1 }
 0x330   :  { %v2747_v51 = vadd.f32 %v2746_v52, %v2745_v26 }
 0x331   :  { %v2754_v58 = vadd.f32 %v2753_v60, %v2752_v33 }
 0x332   :  { %v2755_v3 = vmul.f32 0.5, %v2747_v51 }
 0x333   :  { %v2756_v27 = vmul.f32 0.5, %v2754_v58 }
 0x334   :  { %v2757_v4 = vsub.f32 %v2734_v35, %v2755_v3 }
 0x335   :  { %v2758_v9 = vsub.f32 %v2736_v18, %v2756_v27  ;;  %v3267_v18 = vsel %vm2936_vm1, 1.0, %v3860_v47 }
 0x336   :  { %v2759_v28 = vmul.f32 %v2757_v4, %v2757_v4 }
 0x337   :  { %v2760_v30 = vmul.f32 %v2758_v9, %v2758_v9 }
 0x338   :  { %v2761_v31 = vsel %vm2129_vm0, %v2759_v28, 0.0 }
 0x339   :  { %v2762_v32 = vrot.slane %v2761_v31, 4  ;;  %v2768_v36 = vsel %vm2129_vm0, %v2760_v30, 0.0 }
 0x33a   :  { %v2769_v38 = vrot.slane %v2768_v36, 4 }
 0x33b   :  { %v2763_v6 = vadd.f32 %v2762_v32, %v2761_v31 }
 0x33c   :  { %v2770_v39 = vadd.f32 %v2769_v38, %v2768_v36 }
 0x33d   :  { %v2764_v40 = vrot.slane %v2763_v6, 2 }
 0x33e   :  { %v2771_v41 = vrot.slane %v2770_v39, 2 }
 0x33f   :  { %v2765_v42 = vadd.f32 %v2764_v40, %v2763_v6 }
 0x340   :  { %v2772_v49 = vadd.f32 %v2771_v41, %v2770_v39 }
 0x341   :  { %v2766_v12 = vrot.slane %v2765_v42, 1 }
 0x342   :  { %v2773_v50 = vrot.slane %v2772_v49, 1 }
 0x343   :  { %v2767_v53 = vadd.f32 %v2766_v12, %v2765_v42 }
 0x344   :  { %v2774_v63 = vadd.f32 %v2773_v50, %v2772_v49 }
 0x345   :  { %v2775_v7 = vmul.f32 0.5, %v2767_v53 }
 0x346   :  { %v2776_v55 = vmul.f32 0.5, %v2774_v63 }
 0x347   :  { %v2777_v56 = vadd.f32 1e-05, %v2775_v7 }
 0x348   :  { %v2778_v57 = vadd.f32 1e-05, %v2776_v55 }
 0x349   :  { %3855 = vrsqrt.f32 %v2777_v56 }
 0x34a   :  { %3857 = vrsqrt.f32 %v2778_v57 }
 0x353   :  { %v3856_v2 = vpop.eup %3855 }
 0x354   :  { %v3858_v45 = vpop.eup %3857  ;;  %v2781_v0 = vmul.f32 %v3856_v2, %v2757_v4 }
 0x355   :  { %v2782_v10 = vmul.f32 %v3858_v45, %v2758_v9 }
 0x356   :  { %v2795_v11 = vmul.f32 %v2788_v62, %v2781_v0 }
 0x357   :  { %v2796_v13 = vmul.f32 %v2792_v5, %v2782_v10 }
 0x358   :  { %v2809_v46 = vadd.f32 %v2802_v8, %v2795_v11 }
 0x359   :  { %v2810_v54 = vadd.f32 %v2806_v34, %v2796_v13 }
 0x35a   :  { %v2811_v29 = vmax.f32 %v2809_v46, 0.0 }
 0x35b   :  { %v2812_v14 = vmax.f32 %v2810_v54, 0.0 }
 0x35d   :  { %2916 = vmatprep.mubr.f32.mxu1 %v2812_v14 }
 0x35e   :  { %2917 = vmatmul.mubr.f32.vlgmr.msra.gmra.mrb[8].mxu1 %v2811_v29 }
 0x431   :  { %v3300_v1 = vpop.f32.mrb[8].mxu1 }
 0x432   :  { %v3301_v35 = vpop.f32.mrb[9].mxu1 }
 0x433   :  { %v3302_v17 = vadd.f32 %v3301_v35, %v3300_v1 }
 0x435   :  { %v2919_v43 = vadd.f32 %v3302_v17, %v3266_v48 }
 0x437   :  { %v2939_v20 = vadd.f32 %v3267_v18, %v2919_v43 }
 0x439   :  { %2941 = vst.msk [vmem:[%s5191_s12] sm:$0x3] %vm2940_vm2, %v2939_v20 }

</bundles_post_ra>
